<compile_context>
chip_gen: v5e
topology: v5e:2x2
jax: 0.10.0
libtpu: 0.0.40
codegen_flags: <defaults>
</compile_context>

<pallas_src>
import jax
import jax.numpy as jnp
from jax.experimental import pallas as pl
from jax.experimental.pallas import tpu as pltpu


# ----------------------------------------------------------------------------
# Kernel 1: fused conv-as-matmul:  out = LeakyReLU_0.2( P @ W + shift )
#   (conv bias / folded-BN scale are pre-multiplied into W; shift is per-column)
# ----------------------------------------------------------------------------
def _conv_mm_kernel(p_ref, w_ref, shift_ref, o_ref):
    y = jnp.dot(p_ref[...], w_ref[...], preferred_element_type=jnp.float32)
    y = y + shift_ref[...]
    y = jnp.where(y > 0.0, y, 0.2 * y)
    o_ref[...] = y.astype(o_ref.dtype)


def _pick_block_m(m):
    # Split rows across two blocks (v7x megacore) when cleanly divisible.
    return m // 2 if (m % 32 == 0 and m >= 64) else m


def fused_conv_matmul(patches, wmat, shift):
    """patches (M,K) bf16, wmat (K,N) bf16, shift (1,N) f32 -> (M,N) bf16."""
    M, K = patches.shape
    K2, N = wmat.shape
    assert K == K2
    bm = _pick_block_m(M)
    grid_m = M // bm
    flops = 2 * M * K * N
    bytes_accessed = patches.size * 2 + wmat.size * 2 + shift.size * 4 + M * N * 2
    return pl.pallas_call(
        _conv_mm_kernel,
        out_shape=jax.ShapeDtypeStruct((M, N), jnp.bfloat16),
        grid=(grid_m,),
        in_specs=[
            pl.BlockSpec((bm, K), lambda i: (i, 0)),
            pl.BlockSpec((K, N), lambda i: (0, 0)),
            pl.BlockSpec((1, N), lambda i: (0, 0)),
        ],
        out_specs=pl.BlockSpec((bm, N), lambda i: (i, 0)),
        compiler_params=pltpu.CompilerParams(dimension_semantics=("parallel",)),
        cost_estimate=pl.CostEstimate(
            flops=flops, transcendentals=0, bytes_accessed=bytes_accessed
        ),
    )(patches, wmat, shift)


# ----------------------------------------------------------------------------
# Kernel 2: conv3 (+folded BN + LeakyReLU) + fc + sigmoid, all fused.
#   fc is done as an elementwise multiply with the (row-order-permuted) fc
#   weights, a tiny per-batch row-group selection matmul and a lane reduction.
# ----------------------------------------------------------------------------
def _conv3_fc_kernel(p_ref, w_ref, shift_ref, wfc_ref, sel_ref, fcb_ref, o_ref):
    y = jnp.dot(p_ref[...], w_ref[...], preferred_element_type=jnp.float32)
    y = y + shift_ref[...]
    y = jnp.where(y > 0.0, y, 0.2 * y)                 # (B*16, 256) f32
    z = y * wfc_ref[...]                               # fc weights applied per element
    g = jnp.dot(sel_ref[...], z, preferred_element_type=jnp.float32)   # (B, 256)
    logit = jnp.sum(g, axis=-1, keepdims=True) + fcb_ref[0, 0]          # (B, 1)
    # numerically stable sigmoid
    e = jnp.exp(-jnp.abs(logit))
    sig = jnp.where(logit >= 0.0, 1.0 / (1.0 + e), e / (1.0 + e))
    o_ref[...] = sig.astype(o_ref.dtype)


def conv3_fc_call(patches, wmat, shift, wfc_rows, sel, fcb):
    M, K = patches.shape
    _, N = wmat.shape
    B = sel.shape[0]
    flops = 2 * M * K * N + 2 * B * M * N
    bytes_accessed = (patches.size * 2 + wmat.size * 2 + shift.size * 4
                      + wfc_rows.size * 4 + sel.size * 4 + B * 4)
    return pl.pallas_call(
        _conv3_fc_kernel,
        out_shape=jax.ShapeDtypeStruct((B, 1), jnp.float32),
        grid=(1,),
        in_specs=[
            pl.BlockSpec((M, K), lambda i: (0, 0)),
            pl.BlockSpec((K, N), lambda i: (0, 0)),
            pl.BlockSpec((1, N), lambda i: (0, 0)),
            pl.BlockSpec((M, N), lambda i: (0, 0)),
            pl.BlockSpec((B, M), lambda i: (0, 0)),
            pl.BlockSpec(memory_space=pltpu.MemorySpace.SMEM),
        ],
        out_specs=pl.BlockSpec((B, 1), lambda i: (0, 0)),
        compiler_params=pltpu.CompilerParams(dimension_semantics=("arbitrary",)),
        cost_estimate=pl.CostEstimate(
            flops=flops, transcendentals=2 * B, bytes_accessed=bytes_accessed
        ),
    )(patches, wmat, shift, wfc_rows, sel, fcb)


# ----------------------------------------------------------------------------
# XLA glue: im2col for Conv2d(k=4, s=2, p=1) on NHWC input (tap-major features).
# ----------------------------------------------------------------------------
def im2col_nhwc(x, k=4, s=2, p=1):
    B, H, W, C = x.shape
    xp = jnp.pad(x, ((0, 0), (p, p), (p, p), (0, 0)))
    Ho = (H + 2 * p - k) // s + 1
    Wo = (W + 2 * p - k) // s + 1
    taps = []
    for di in range(k):
        for dj in range(k):
            taps.append(xp[:, di:di + s * Ho:s, dj:dj + s * Wo:s, :])
    pat = jnp.stack(taps, axis=3)                     # (B, Ho, Wo, k*k, C)
    return pat.reshape(B * Ho * Wo, k * k * C), Ho, Wo


def _conv_weight_matrix(w):
    """PyTorch (Cout, Cin, kH, kW) -> (kH*kW*Cin, Cout) matching tap-major patches."""
    cout = w.shape[0]
    return w.transpose(2, 3, 1, 0).reshape(-1, cout)


# ----------------------------------------------------------------------------
# Deterministic parameter initialization (shapes from the module __init__).
# ----------------------------------------------------------------------------
def init_params(key, embedding_dim):
    ks = jax.random.split(key, 20)

    def uni(k, shape, fan_in):
        bound = 1.0 / (fan_in ** 0.5)
        return jax.random.uniform(k, shape, jnp.float32, -bound, bound)

    p = {}
    p["w1"] = uni(ks[0], (64, 4, 4, 4), 4 * 16)
    p["b1"] = uni(ks[1], (64,), 4 * 16)
    p["w2"] = uni(ks[2], (128, 64, 4, 4), 64 * 16)
    p["b2"] = uni(ks[3], (128,), 64 * 16)
    p["bn2_gamma"] = 1.0 + 0.1 * jax.random.normal(ks[4], (128,), jnp.float32)
    p["bn2_beta"] = 0.1 * jax.random.normal(ks[5], (128,), jnp.float32)
    p["bn2_mean"] = 0.1 * jax.random.normal(ks[6], (128,), jnp.float32)
    p["bn2_var"] = jnp.abs(jax.random.normal(ks[7], (128,), jnp.float32)) + 0.5
    p["w3"] = uni(ks[8], (256, 128, 4, 4), 128 * 16)
    p["b3"] = uni(ks[9], (256,), 128 * 16)
    p["bn3_gamma"] = 1.0 + 0.1 * jax.random.normal(ks[10], (256,), jnp.float32)
    p["bn3_beta"] = 0.1 * jax.random.normal(ks[11], (256,), jnp.float32)
    p["bn3_mean"] = 0.1 * jax.random.normal(ks[12], (256,), jnp.float32)
    p["bn3_var"] = jnp.abs(jax.random.normal(ks[13], (256,), jnp.float32)) + 0.5
    p["fc_w"] = uni(ks[14], (1, 256 * 4 * 4), 256 * 16)
    p["fc_b"] = uni(ks[15], (1,), 256 * 16)
    p["ew"] = uni(ks[16], (16, embedding_dim), embedding_dim)
    p["eb"] = uni(ks[17], (16,), embedding_dim)
    return p


# ----------------------------------------------------------------------------
# Forward pass (matches Discriminator.forward, inference mode).
# ----------------------------------------------------------------------------
def discriminator_forward(params, img, embed, eps=1e-5):
    B, _, H, W = img.shape

    # embed_fc(embed) -> (B,1,4,4) -> nearest-upsample to (H,W) as extra channel.
    e16 = embed.astype(jnp.float32) @ params["ew"].T + params["eb"]      # (B, 16)
    e4 = e16.reshape(B, 4, 4)
    emb_img = jnp.broadcast_to(e4[:, :, None, :, None], (B, 4, H // 4, 4, W // 4))
    emb_img = emb_img.reshape(B, H, W)

    img_nhwc = jnp.transpose(img, (0, 2, 3, 1))         # single small relayout at the API boundary
    x = jnp.concatenate([img_nhwc, emb_img[..., None]], axis=-1).astype(jnp.bfloat16)

    # ---- conv1 + bias + LeakyReLU      (TODO(synk): Dropout(0.1) = identity at inference)
    p1, Ho1, Wo1 = im2col_nhwc(x)
    w1m = _conv_weight_matrix(params["w1"]).astype(jnp.bfloat16)
    y1 = fused_conv_matmul(p1, w1m, params["b1"].reshape(1, -1).astype(jnp.float32))
    a1 = y1.reshape(B, Ho1, Wo1, 64)

    # ---- conv2 + BN2 + LeakyReLU  (BN scale folded into W, bias+BN shift per column)
    s2 = params["bn2_gamma"] / jnp.sqrt(params["bn2_var"] + eps)
    sh2 = params["bn2_beta"] + (params["b2"] - params["bn2_mean"]) * s2
    w2m = (_conv_weight_matrix(params["w2"]) * s2[None, :]).astype(jnp.bfloat16)
    p2, Ho2, Wo2 = im2col_nhwc(a1)
    y2 = fused_conv_matmul(p2, w2m, sh2.reshape(1, -1).astype(jnp.float32))
    a2 = y2.reshape(B, Ho2, Wo2, 128)

    # ---- conv3 + BN3 + LeakyReLU + fc + sigmoid (single fused kernel)
    s3 = params["bn3_gamma"] / jnp.sqrt(params["bn3_var"] + eps)
    sh3 = params["bn3_beta"] + (params["b3"] - params["bn3_mean"]) * s3
    w3m = (_conv_weight_matrix(params["w3"]) * s3[None, :]).astype(jnp.bfloat16)
    p3, Ho3, Wo3 = im2col_nhwc(a2)

    # fc weight permuted from PyTorch's NCHW flatten order to the kernel's NHWC rows.
    wfc_rows = params["fc_w"].reshape(256, Ho3, Wo3).transpose(1, 2, 0).reshape(Ho3 * Wo3, 256)
    wfc_rows = jnp.tile(wfc_rows, (B, 1)).astype(jnp.float32)            # (B*Ho3*Wo3, 256)
    sel = jnp.repeat(jnp.eye(B, dtype=jnp.float32), Ho3 * Wo3, axis=1)   # (B, B*Ho3*Wo3)
    fcb = params["fc_b"].reshape(1, 1).astype(jnp.float32)

    out = conv3_fc_call(p3, w3m, sh3.reshape(1, -1).astype(jnp.float32),
                        wfc_rows, sel, fcb)                              # (B, 1) f32
    return out


if __name__ == "__main__":
    key = jax.random.PRNGKey(0)
    kp, ki, ke = jax.random.split(key, 3)

    embedding_dim = 32
    B = 2
    # spatial must be 32 so three stride-2 convs give 4x4 (fc expects 256*4*4)
    img = jax.random.normal(ki, (B, 3, 32, 32), jnp.float32)
    embed = jax.random.normal(ke, (B, embedding_dim), jnp.float32)

    params = init_params(kp, embedding_dim)

    fwd = jax.jit(discriminator_forward)
    out = fwd(params, img, embed)
    out = jax.block_until_ready(out)
    assert out.shape == (B, 1)
    assert bool(jnp.all((out >= 0.0) & (out <= 1.0)))
    print("KERNEL_OK")
</pallas_src>

<mosaic_0001>
module attributes {stable_mosaic.version = 11 : i64} {
  func.func @_conv_mm_kernel(%arg0: i32, %arg1: memref<256x64xbf16, #tpu.memory_space<vmem>>, %arg2: memref<64x64xbf16, #tpu.memory_space<vmem>>, %arg3: memref<1x64xf32, #tpu.memory_space<vmem>>, %arg4: memref<256x64xbf16, #tpu.memory_space<vmem>>) attributes {dimension_semantics = [#tpu.dimension_semantics<parallel>], iteration_bounds = array<i64: 2>, scalar_prefetch = 0 : i64, scratch_operands = 0 : i64, tpu.core_type = #tpu.core_type<tc>, window_params = [{transform_indices = @transform_0, window_bounds = array<i64: 256, 64>}, {pipeline_mode = #tpu.pipeline_mode<synchronous>, transform_indices = @transform_1, window_bounds = array<i64: 64, 64>}, {pipeline_mode = #tpu.pipeline_mode<synchronous>, transform_indices = @transform_2, window_bounds = array<i64: 1, 64>}, {transform_indices = @transform_3, window_bounds = array<i64: 256, 64>}]} {
    %c0 = arith.constant 0 : index
    %c0_0 = arith.constant 0 : index
    %0 = vector.load %arg1[%c0, %c0_0] : memref<256x64xbf16, #tpu.memory_space<vmem>>, vector<256x64xbf16>
    %c0_1 = arith.constant 0 : index
    %c0_2 = arith.constant 0 : index
    %1 = vector.load %arg2[%c0_1, %c0_2] : memref<64x64xbf16, #tpu.memory_space<vmem>>, vector<64x64xbf16>
    %cst = arith.constant dense<0.000000e+00> : vector<256x64xf32>
    %2 = tpu.matmul %0, %1, %cst {dimension_numbers = #tpu.dot_dimension_numbers<[1], [0], [0], [1], [0, 0, 1, 1], [], []>} : vector<256x64xbf16>, vector<64x64xbf16>, vector<256x64xf32> -> vector<256x64xf32>
    %c0_3 = arith.constant 0 : index
    %c0_4 = arith.constant 0 : index
    %3 = vector.load %arg3[%c0_3, %c0_4] : memref<1x64xf32, #tpu.memory_space<vmem>>, vector<1x64xf32>
    %4 = vector.broadcast %3 : vector<1x64xf32> to vector<256x64xf32>
    %5 = arith.addf %2, %4 : vector<256x64xf32>
    %cst_5 = arith.constant 0.000000e+00 : f32
    %6 = vector.broadcast %cst_5 : f32 to vector<256x64xf32>
    %7 = arith.cmpf ogt, %5, %6 : vector<256x64xf32>
    %cst_6 = arith.constant 2.000000e-01 : f32
    %8 = vector.broadcast %cst_6 : f32 to vector<256x64xf32>
    %9 = arith.mulf %8, %5 : vector<256x64xf32>
    %10 = arith.select %7, %5, %9 : vector<256x64xi1>, vector<256x64xf32>
    %11 = arith.truncf %10 : vector<256x64xf32> to vector<256x64xbf16>
    %c0_7 = arith.constant 0 : index
    %c0_8 = arith.constant 0 : index
    %12 = vector.load %arg4[%c0_7, %c0_8] : memref<256x64xbf16, #tpu.memory_space<vmem>>, vector<256x64xbf16>
    tpu.vector_store %arg4[%c0_7, %c0_8], %11 {strides = array<i32>} : memref<256x64xbf16, #tpu.memory_space<vmem>>, vector<256x64xbf16>,
    return
  }
  func.func @transform_0(%arg0: i32) -> (i32, i32) {
    %c0_i32 = arith.constant 0 : i32
    %c0_i32_0 = arith.constant 0 : i32
    return %arg0, %c0_i32 : i32, i32
  }
  func.func @transform_1(%arg0: i32) -> (i32, i32) {
    %c0_i32 = arith.constant 0 : i32
    %c0_i32_0 = arith.constant 0 : i32
    %c0_i32_1 = arith.constant 0 : i32
    return %c0_i32, %c0_i32_0 : i32, i32
  }
  func.func @transform_2(%arg0: i32) -> (i32, i32) {
    %c0_i32 = arith.constant 0 : i32
    %c0_i32_0 = arith.constant 0 : i32
    %c0_i32_1 = arith.constant 0 : i32
    return %c0_i32, %c0_i32_0 : i32, i32
  }
  func.func @transform_3(%arg0: i32) -> (i32, i32) {
    %c0_i32 = arith.constant 0 : i32
    %c0_i32_0 = arith.constant 0 : i32
    return %arg0, %c0_i32 : i32, i32
  }
}

module attributes {stable_mosaic.version = 11 : i64} {
  func.func @_conv_mm_kernel(%arg0: i32, %arg1: memref<64x1024xbf16, #tpu.memory_space<vmem>>, %arg2: memref<1024x128xbf16, #tpu.memory_space<vmem>>, %arg3: memref<1x128xf32, #tpu.memory_space<vmem>>, %arg4: memref<64x128xbf16, #tpu.memory_space<vmem>>) attributes {dimension_semantics = [#tpu.dimension_semantics<parallel>], iteration_bounds = array<i64: 2>, scalar_prefetch = 0 : i64, scratch_operands = 0 : i64, tpu.core_type = #tpu.core_type<tc>, window_params = [{transform_indices = @transform_0, window_bounds = array<i64: 64, 1024>}, {pipeline_mode = #tpu.pipeline_mode<synchronous>, transform_indices = @transform_1, window_bounds = array<i64: 1024, 128>}, {pipeline_mode = #tpu.pipeline_mode<synchronous>, transform_indices = @transform_2, window_bounds = array<i64: 1, 128>}, {transform_indices = @transform_3, window_bounds = array<i64: 64, 128>}]} {
    %c0 = arith.constant 0 : index
    %c0_0 = arith.constant 0 : index
    %0 = vector.load %arg1[%c0, %c0_0] : memref<64x1024xbf16, #tpu.memory_space<vmem>>, vector<64x1024xbf16>
    %c0_1 = arith.constant 0 : index
    %c0_2 = arith.constant 0 : index
    %1 = vector.load %arg2[%c0_1, %c0_2] : memref<1024x128xbf16, #tpu.memory_space<vmem>>, vector<1024x128xbf16>
    %cst = arith.constant dense<0.000000e+00> : vector<64x128xf32>
    %2 = tpu.matmul %0, %1, %cst {dimension_numbers = #tpu.dot_dimension_numbers<[1], [0], [0], [1], [0, 0, 1, 1], [], []>} : vector<64x1024xbf16>, vector<1024x128xbf16>, vector<64x128xf32> -> vector<64x128xf32>
    %c0_3 = arith.constant 0 : index
    %c0_4 = arith.constant 0 : index
    %3 = vector.load %arg3[%c0_3, %c0_4] : memref<1x128xf32, #tpu.memory_space<vmem>>, vector<1x128xf32>
    %4 = vector.broadcast %3 : vector<1x128xf32> to vector<64x128xf32>
    %5 = arith.addf %2, %4 : vector<64x128xf32>
    %cst_5 = arith.constant 0.000000e+00 : f32
    %6 = vector.broadcast %cst_5 : f32 to vector<64x128xf32>
    %7 = arith.cmpf ogt, %5, %6 : vector<64x128xf32>
    %cst_6 = arith.constant 2.000000e-01 : f32
    %8 = vector.broadcast %cst_6 : f32 to vector<64x128xf32>
    %9 = arith.mulf %8, %5 : vector<64x128xf32>
    %10 = arith.select %7, %5, %9 : vector<64x128xi1>, vector<64x128xf32>
    %11 = arith.truncf %10 : vector<64x128xf32> to vector<64x128xbf16>
    %c0_7 = arith.constant 0 : index
    %c0_8 = arith.constant 0 : index
    %12 = vector.load %arg4[%c0_7, %c0_8] : memref<64x128xbf16, #tpu.memory_space<vmem>>, vector<64x128xbf16>
    tpu.vector_store %arg4[%c0_7, %c0_8], %11 {strides = array<i32>} : memref<64x128xbf16, #tpu.memory_space<vmem>>, vector<64x128xbf16>,
    return
  }
  func.func @transform_0(%arg0: i32) -> (i32, i32) {
    %c0_i32 = arith.constant 0 : i32
    %c0_i32_0 = arith.constant 0 : i32
    return %arg0, %c0_i32 : i32, i32
  }
  func.func @transform_1(%arg0: i32) -> (i32, i32) {
    %c0_i32 = arith.constant 0 : i32
    %c0_i32_0 = arith.constant 0 : i32
    %c0_i32_1 = arith.constant 0 : i32
    return %c0_i32, %c0_i32_0 : i32, i32
  }
  func.func @transform_2(%arg0: i32) -> (i32, i32) {
    %c0_i32 = arith.constant 0 : i32
    %c0_i32_0 = arith.constant 0 : i32
    %c0_i32_1 = arith.constant 0 : i32
    return %c0_i32, %c0_i32_0 : i32, i32
  }
  func.func @transform_3(%arg0: i32) -> (i32, i32) {
    %c0_i32 = arith.constant 0 : i32
    %c0_i32_0 = arith.constant 0 : i32
    return %arg0, %c0_i32 : i32, i32
  }
}

module attributes {stable_mosaic.version = 11 : i64} {
  func.func @_conv3_fc_kernel(%arg0: i32, %arg1: memref<32x2048xbf16, #tpu.memory_space<vmem>>, %arg2: memref<2048x256xbf16, #tpu.memory_space<vmem>>, %arg3: memref<1x256xf32, #tpu.memory_space<vmem>>, %arg4: memref<32x256xf32, #tpu.memory_space<vmem>>, %arg5: memref<2x32xf32, #tpu.memory_space<vmem>>, %arg6: memref<1x1xf32, #tpu.memory_space<smem>>, %arg7: memref<2x1xf32, #tpu.memory_space<vmem>>) attributes {dimension_semantics = [#tpu.dimension_semantics<arbitrary>], iteration_bounds = array<i64: 1>, scalar_prefetch = 0 : i64, scratch_operands = 0 : i64, tpu.core_type = #tpu.core_type<tc>, window_params = [{pipeline_mode = #tpu.pipeline_mode<synchronous>, transform_indices = @transform_0, window_bounds = array<i64: 32, 2048>}, {pipeline_mode = #tpu.pipeline_mode<synchronous>, transform_indices = @transform_1, window_bounds = array<i64: 2048, 256>}, {pipeline_mode = #tpu.pipeline_mode<synchronous>, transform_indices = @transform_2, window_bounds = array<i64: 1, 256>}, {pipeline_mode = #tpu.pipeline_mode<synchronous>, transform_indices = @transform_3, window_bounds = array<i64: 32, 256>}, {pipeline_mode = #tpu.pipeline_mode<synchronous>, transform_indices = @transform_4, window_bounds = array<i64: 2, 32>}, {transform_indices = @transform_5, window_bounds = array<i64: 1, 1>}, {pipeline_mode = #tpu.pipeline_mode<synchronous>, transform_indices = @transform_6, window_bounds = array<i64: 2, 1>}]} {
    %c0 = arith.constant 0 : index
    %c0_0 = arith.constant 0 : index
    %0 = vector.load %arg1[%c0, %c0_0] : memref<32x2048xbf16, #tpu.memory_space<vmem>>, vector<32x2048xbf16>
    %c0_1 = arith.constant 0 : index
    %c0_2 = arith.constant 0 : index
    %1 = vector.load %arg2[%c0_1, %c0_2] : memref<2048x256xbf16, #tpu.memory_space<vmem>>, vector<2048x256xbf16>
    %cst = arith.constant dense<0.000000e+00> : vector<32x256xf32>
    %2 = tpu.matmul %0, %1, %cst {dimension_numbers = #tpu.dot_dimension_numbers<[1], [0], [0], [1], [0, 0, 1, 1], [], []>} : vector<32x2048xbf16>, vector<2048x256xbf16>, vector<32x256xf32> -> vector<32x256xf32>
    %c0_3 = arith.constant 0 : index
    %c0_4 = arith.constant 0 : index
    %3 = vector.load %arg3[%c0_3, %c0_4] : memref<1x256xf32, #tpu.memory_space<vmem>>, vector<1x256xf32>
    %4 = vector.broadcast %3 : vector<1x256xf32> to vector<32x256xf32>
    %5 = arith.addf %2, %4 : vector<32x256xf32>
    %cst_5 = arith.constant 0.000000e+00 : f32
    %6 = vector.broadcast %cst_5 : f32 to vector<32x256xf32>
    %7 = arith.cmpf ogt, %5, %6 : vector<32x256xf32>
    %cst_6 = arith.constant 2.000000e-01 : f32
    %8 = vector.broadcast %cst_6 : f32 to vector<32x256xf32>
    %9 = arith.mulf %8, %5 : vector<32x256xf32>
    %10 = arith.select %7, %5, %9 : vector<32x256xi1>, vector<32x256xf32>
    %c0_7 = arith.constant 0 : index
    %c0_8 = arith.constant 0 : index
    %11 = vector.load %arg4[%c0_7, %c0_8] : memref<32x256xf32, #tpu.memory_space<vmem>>, vector<32x256xf32>
    %12 = arith.mulf %10, %11 : vector<32x256xf32>
    %c0_9 = arith.constant 0 : index
    %c0_10 = arith.constant 0 : index
    %13 = vector.load %arg5[%c0_9, %c0_10] : memref<2x32xf32, #tpu.memory_space<vmem>>, vector<2x32xf32>
    %cst_11 = arith.constant dense<0.000000e+00> : vector<2x256xf32>
    %14 = tpu.matmul %13, %12, %cst_11 {dimension_numbers = #tpu.dot_dimension_numbers<[1], [0], [0], [1], [0, 0, 1, 1], [], []>} : vector<2x32xf32>, vector<32x256xf32>, vector<2x256xf32> -> vector<2x256xf32>
    %cst_12 = arith.constant dense<0.000000e+00> : vector<2xf32>
    %15 = vector.multi_reduction <add>, %14, %cst_12 [1] : vector<2x256xf32> to vector<2xf32>
    %16 = vector.shape_cast %15 : vector<2xf32> to vector<2x1xf32>
    %c0_13 = arith.constant 0 : index
    %c0_14 = arith.constant 0 : index
    %17 = memref.load %arg6[%c0_13, %c0_14] : memref<1x1xf32, #tpu.memory_space<smem>>
    %18 = vector.broadcast %17 : f32 to vector<2x1xf32>
    %19 = arith.addf %16, %18 : vector<2x1xf32>
    %20 = math.absf %19 : vector<2x1xf32>
    %cst_15 = arith.constant 0.000000e+00 : f32
    %21 = vector.broadcast %cst_15 : f32 to vector<2x1xf32>
    %22 = arith.subf %21, %20 : vector<2x1xf32>
    %23 = math.exp %22 : vector<2x1xf32>
    %cst_16 = arith.constant 0.000000e+00 : f32
    %24 = vector.broadcast %cst_16 : f32 to vector<2x1xf32>
    %25 = arith.cmpf oge, %19, %24 : vector<2x1xf32>
    %cst_17 = arith.constant 1.000000e+00 : f32
    %26 = vector.broadcast %cst_17 : f32 to vector<2x1xf32>
    %27 = arith.addf %26, %23 : vector<2x1xf32>
    %cst_18 = arith.constant 1.000000e+00 : f32
    %28 = vector.broadcast %cst_18 : f32 to vector<2x1xf32>
    %29 = arith.divf %28, %27 : vector<2x1xf32>
    %cst_19 = arith.constant 1.000000e+00 : f32
    %30 = vector.broadcast %cst_19 : f32 to vector<2x1xf32>
    %31 = arith.addf %30, %23 : vector<2x1xf32>
    %32 = arith.divf %23, %31 : vector<2x1xf32>
    %33 = arith.select %25, %29, %32 : vector<2x1xi1>, vector<2x1xf32>
    %c0_20 = arith.constant 0 : index
    %c0_21 = arith.constant 0 : index
    %34 = vector.load %arg7[%c0_20, %c0_21] : memref<2x1xf32, #tpu.memory_space<vmem>>, vector<2x1xf32>
    tpu.vector_store %arg7[%c0_20, %c0_21], %33 {strides = array<i32>} : memref<2x1xf32, #tpu.memory_space<vmem>>, vector<2x1xf32>,
    return
  }
  func.func @transform_0(%arg0: i32) -> (i32, i32) {
    %c0_i32 = arith.constant 0 : i32
    %c0_i32_0 = arith.constant 0 : i32
    %c0_i32_1 = arith.constant 0 : i32
    return %c0_i32, %c0_i32_0 : i32, i32
  }
  func.func @transform_1(%arg0: i32) -> (i32, i32) {
    %c0_i32 = arith.constant 0 : i32
    %c0_i32_0 = arith.constant 0 : i32
    %c0_i32_1 = arith.constant 0 : i32
    return %c0_i32, %c0_i32_0 : i32, i32
  }
  func.func @transform_2(%arg0: i32) -> (i32, i32) {
    %c0_i32 = arith.constant 0 : i32
    %c0_i32_0 = arith.constant 0 : i32
    %c0_i32_1 = arith.constant 0 : i32
    return %c0_i32, %c0_i32_0 : i32, i32
  }
  func.func @transform_3(%arg0: i32) -> (i32, i32) {
    %c0_i32 = arith.constant 0 : i32
    %c0_i32_0 = arith.constant 0 : i32
    %c0_i32_1 = arith.constant 0 : i32
    return %c0_i32, %c0_i32_0 : i32, i32
  }
  func.func @transform_4(%arg0: i32) -> (i32, i32) {
    %c0_i32 = arith.constant 0 : i32
    %c0_i32_0 = arith.constant 0 : i32
    %c0_i32_1 = arith.constant 0 : i32
    return %c0_i32, %c0_i32_0 : i32, i32
  }
  func.func @transform_5(%arg0: i32) -> (i32, i32) {
    %c0_i32 = arith.constant 0 : i32
    %c0_i32_0 = arith.constant 0 : i32
    %c0_i32_1 = arith.constant 0 : i32
    return %c0_i32, %c0_i32_0 : i32, i32
  }
  func.func @transform_6(%arg0: i32) -> (i32, i32) {
    %c0_i32 = arith.constant 0 : i32
    %c0_i32_0 = arith.constant 0 : i32
    %c0_i32_1 = arith.constant 0 : i32
    return %c0_i32, %c0_i32_0 : i32, i32
  }
}

</mosaic_0001>

<bundles_post_ra>
// kernel: discriminator_forward.3
= control target key start
LH: loop header
LB: loop body
LE: loop exit
PB: predicated region body
PF: predicated region fallthrough
CT: control target
= control target key end

     0   :  { %s854_s12 = smov 0   ;;  %s1027_s0 = inlined_call_operand.vmem [shape: bf16[512,64], index: 0, kind: input, shape index: {}]   ;;  %s1028_s1 = inlined_call_operand.vmem [shape: bf16[64,64], index: 1, kind: input, shape index: {}]   ;;  %s1029_s2 = inlined_call_operand.vmem [shape: f32[1,64], index: 2, kind: input, shape index: {}]   ;;  %s1030_s3 = inlined_call_operand.vmem [shape: bf16[512,64], index: 3, kind: output, shape index: {}]  }
   0x1 LB: > { %s678_s13 = sadd.s32 4294967295, %s832_s12   ;;  %p682_p0 = scmp.ge.s32.totalorder %s832_s12, 1  ;;  %s832_s12 = sphi %s854_s12, %s13_s12  }
   0x2   : > { %p138_p1 = scmp.lt.s32.totalorder %s832_s12, 3 }
   0x4   : > { %p139_p2 = pnand %p682_p0, %p138_p1 }
   0x5   : > { %s683_s16 = sshll.u32 (!%p139_p2), %s678_s13, 5 }
   0x6   : > { %142 = sbr.rel (%p139_p2) target bundleno = 225 (0xe1), region = 32  ;;  %p163_p3 = scmp.lt.s32.totalorder (!%p139_p2), %s683_s16, 63 }
   0xb   : > { %v804_v0 = vld [vmem:[%s1028_s1 + $0x18] sm:$0xff]  ;;  %v803_v1 = vld [vmem:[%s1028_s1 + $0x10] sm:$0xff]  ;;  %s1032_s16 = smov (!%p163_p3, %s683_s16), 63  ;;  %v802_v2 = vld [vmem:[%s1028_s1 + $0x8] sm:$0xff]  ;;  %vm323_vm0 = vcmask 523264   ;;  %vm589_vm3 = vcmask 519168  }
   0xc   : > { %376 = vmatpush.bf16.msra.mxu0 %v804_v0  ;;  %805 = vmatpush.bf16.msra.mxu1 %v804_v0  ;;  %s684_s21 = sshll.u32 %s1032_s16, 2  ;;  %v801_v3 = vld [vmem:[%s1028_s1] sm:$0xff] }
   0xd   : > { %806 = vmatpush.bf16.msra.mxu2 %v804_v0  ;;  %807 = vmatpush.bf16.msra.mxu3 %v804_v0  ;;  %s882_s26 = scalar_lea.vmem %s1027_s0, %s684_s21  ;;  %v919_v20 = vld [vmem:[%s1029_s2] ss:$0 sm:$0xff]  ;;  %s928_s4 = scalar_lea.vmem %s1030_s3, %s684_s21 }
   0xe   : > { %v785_v4 = vld [vmem:[%s882_s26] sm:$0xff]  ;;  %v786_v8 = vld [vmem:[%s882_s26 + $0x8] sm:$0xff]  ;;  %v787_v12 = vld [vmem:[%s882_s26 + $0x10] sm:$0xff] }
   0xf   : > { %v789_v5 = vld [vmem:[%s882_s26 + $0x20] sm:$0xff]  ;;  %v790_v9 = vld [vmem:[%s882_s26 + $0x28] sm:$0xff]  ;;  %v791_v13 = vld [vmem:[%s882_s26 + $0x30] sm:$0xff] }
  0x10   : > { %377 = vmatpush.bf16.msra.mxu0 %v803_v1  ;;  %808 = vmatpush.bf16.msra.mxu1 %v803_v1  ;;  %v793_v6 = vld [vmem:[%s882_s26 + $0x40] sm:$0xff]  ;;  %v794_v10 = vld [vmem:[%s882_s26 + $0x48] sm:$0xff]  ;;  %v795_v14 = vld [vmem:[%s882_s26 + $0x50] sm:$0xff] }
  0x11   : > { %809 = vmatpush.bf16.msra.mxu2 %v803_v1  ;;  %810 = vmatpush.bf16.msra.mxu3 %v803_v1  ;;  %v797_v7 = vld [vmem:[%s882_s26 + $0x60] sm:$0xff]  ;;  %v798_v11 = vld [vmem:[%s882_s26 + $0x68] sm:$0xff]  ;;  %v799_v15 = vld [vmem:[%s882_s26 + $0x70] sm:$0xff] }
  0x12   : > { %v788_v16 = vld [vmem:[%s882_s26 + $0x18] sm:$0xff] }
  0x13   : > { %v792_v17 = vld [vmem:[%s882_s26 + $0x38] sm:$0xff] }
  0x14   : > { %378 = vmatpush.bf16.msra.mxu0 %v802_v2  ;;  %811 = vmatpush.bf16.msra.mxu1 %v802_v2  ;;  %v796_v18 = vld [vmem:[%s882_s26 + $0x58] sm:$0xff] }
  0x15   : > { %812 = vmatpush.bf16.msra.mxu2 %v802_v2  ;;  %813 = vmatpush.bf16.msra.mxu3 %v802_v2  ;;  %v800_v19 = vld [vmem:[%s882_s26 + $0x78] sm:$0xff] }
  0x18   : > { %379 = vmatpush.bf16.msra.mxu0 %v801_v3  ;;  %814 = vmatpush.bf16.msra.mxu1 %v801_v3 }
  0x19   : > { %815 = vmatpush.bf16.msra.mxu2 %v801_v3  ;;  %816 = vmatpush.bf16.msra.mxu3 %v801_v3 }
  0x1b   : > { %767 = vmatmul.msk.bf16.vlgmr.msra.gmra.mxu0 %vm323_vm0, %v785_v4  ;;  %771 = vmatmul.msk.bf16.vlgmr.msra.gmra.mxu1 %vm323_vm0, %v789_v5 }
  0x1c   : > { %775 = vmatmul.msk.bf16.vlgmr.msra.gmra.mxu2 %vm323_vm0, %v793_v6  ;;  %779 = vmatmul.msk.bf16.vlgmr.msra.gmra.mxu3 %vm323_vm0, %v797_v7 }
  0x2b   : > { %768 = vmatmul.msk.bf16.gmra.mxu0 %vm323_vm0, %v786_v8  ;;  %772 = vmatmul.msk.bf16.gmra.mxu1 %vm323_vm0, %v790_v9 }
  0x2c   : > { %776 = vmatmul.msk.bf16.gmra.mxu2 %vm323_vm0, %v794_v10  ;;  %780 = vmatmul.msk.bf16.gmra.mxu3 %vm323_vm0, %v798_v11 }
  0x3b   : > { %769 = vmatmul.msk.bf16.gmra.mxu0 %vm323_vm0, %v787_v12  ;;  %773 = vmatmul.msk.bf16.gmra.mxu1 %vm323_vm0, %v791_v13 }
  0x3c   : > { %777 = vmatmul.msk.bf16.gmra.mxu2 %vm323_vm0, %v795_v14  ;;  %781 = vmatmul.msk.bf16.gmra.mxu3 %vm323_vm0, %v799_v15 }
  0x4b   : > { %770 = vmatmul.msk.bf16.gmra.mxu0 %vm323_vm0, %v788_v16  ;;  %774 = vmatmul.msk.bf16.gmra.mxu1 %vm323_vm0, %v792_v17 }
  0x4c   : > { %778 = vmatmul.msk.bf16.gmra.mxu2 %vm323_vm0, %v796_v18  ;;  %782 = vmatmul.msk.bf16.gmra.mxu3 %vm323_vm0, %v800_v19 }
  0x98   : > { %v381_v21 = vpop.f32.mrf.mxu0  ;;  %v401_v22 = vpop.f32.mrf.mxu1 }
  0x99   : > { %v382_v23 = vadd.f32 %v919_v20, %v381_v21  ;;  %v402_v24 = vadd.f32 %v919_v20, %v401_v22 }
  0x9b   : > { %vm461_vm1 = vcmp.gt.f32.partialorder %v382_v23, 0.0  ;;  %v493_v25 = vmul.f32 0.2, %v382_v23  ;;  %vm469_vm2 = vcmp.gt.f32.partialorder %v402_v24, 0.0  ;;  %v501_v26 = vmul.f32 0.2, %v402_v24 }
  0x9d   : > { %v525_v27 = vsel %vm461_vm1, %v382_v23, %v493_v25  ;;  %v533_v28 = vsel %vm469_vm2, %v402_v24, %v501_v26 }
  0x9e   : > { %v557_v29 = vpack.c.bf16 %v525_v27, %v525_v27  ;;  %v565_v30 = vpack.c.bf16 %v533_v28, %v533_v28 }
  0x9f   : > { %v421_v31 = vpop.f32.mrf.mxu2  ;;  %v441_v32 = vpop.f32.mrf.mxu3 }
  0xa0   : > { %590 = vst.msk [vmem:[%s928_s4] sm:$0xf] %vm589_vm3, %v557_v29  ;;  %v422_v33 = vadd.f32 %v919_v20, %v421_v31  ;;  %v442_v34 = vadd.f32 %v919_v20, %v441_v32  ;;  %v383_v35 = vpop.f32.mrf.mxu0  ;;  %v403_v36 = vpop.f32.mrf.mxu1 }
  0xa1   : > { %598 = vst.msk [vmem:[%s928_s4 + $0x20] sm:$0xf] %vm589_vm3, %v565_v30  ;;  %v384_v37 = vadd.f32 %v919_v20, %v383_v35  ;;  %v404_v38 = vadd.f32 %v919_v20, %v403_v36 }
  0xa2   : > { %vm477_vm4 = vcmp.gt.f32.partialorder %v422_v33, 0.0  ;;  %v509_v39 = vmul.f32 0.2, %v422_v33  ;;  %vm485_vm5 = vcmp.gt.f32.partialorder %v442_v34, 0.0  ;;  %v517_v40 = vmul.f32 0.2, %v442_v34 }
  0xa3   : > { %vm462_vm6 = vcmp.gt.f32.partialorder %v384_v37, 0.0  ;;  %v494_v41 = vmul.f32 0.2, %v384_v37  ;;  %vm470_vm7 = vcmp.gt.f32.partialorder %v404_v38, 0.0  ;;  %v502_v42 = vmul.f32 0.2, %v404_v38 }
  0xa4   : > { %v541_v43 = vsel %vm477_vm4, %v422_v33, %v509_v39  ;;  %v549_v44 = vsel %vm485_vm5, %v442_v34, %v517_v40 }
  0xa5   : > { %v573_v45 = vpack.c.bf16 %v541_v43, %v541_v43  ;;  %v581_v46 = vpack.c.bf16 %v549_v44, %v549_v44  ;;  %v526_v47 = vsel %vm462_vm6, %v384_v37, %v494_v41  ;;  %v534_v48 = vsel %vm470_vm7, %v404_v38, %v502_v42 }
  0xa6   : > { %v558_v49 = vpack.c.bf16 %v526_v47, %v526_v47  ;;  %v566_v50 = vpack.c.bf16 %v534_v48, %v534_v48 }
  0xa7   : > { %606 = vst.msk [vmem:[%s928_s4 + $0x40] sm:$0xf] %vm589_vm3, %v573_v45  ;;  %v423_v51 = vpop.f32.mrf.mxu2  ;;  %v443_v52 = vpop.f32.mrf.mxu3 }
  0xa8   : > { %614 = vst.msk [vmem:[%s928_s4 + $0x60] sm:$0xf] %vm589_vm3, %v581_v46  ;;  %v424_v53 = vadd.f32 %v919_v20, %v423_v51  ;;  %v444_v54 = vadd.f32 %v919_v20, %v443_v52  ;;  %v386_v55 = vpop.f32.mrf.mxu0  ;;  %v406_v56 = vpop.f32.mrf.mxu1 }
  0xa9   : > { %591 = vst.msk [vmem:[%s928_s4 + $0x4] sm:$0xf] %vm589_vm3, %v558_v49  ;;  %v387_v57 = vadd.f32 %v919_v20, %v386_v55  ;;  %v407_v58 = vadd.f32 %v919_v20, %v406_v56 }
  0xaa   : > { %599 = vst.msk [vmem:[%s928_s4 + $0x24] sm:$0xf] %vm589_vm3, %v566_v50  ;;  %vm478_vm8 = vcmp.gt.f32.partialorder %v424_v53, 0.0  ;;  %v510_v59 = vmul.f32 0.2, %v424_v53  ;;  %vm486_vm9 = vcmp.gt.f32.partialorder %v444_v54, 0.0 }
  0xab   : > { %v518_v60 = vmul.f32 0.2, %v444_v54  ;;  %vm463_vm10 = vcmp.gt.f32.partialorder %v387_v57, 0.0  ;;  %v495_v61 = vmul.f32 0.2, %v387_v57  ;;  %vm471_vm11 = vcmp.gt.f32.partialorder %v407_v58, 0.0 }
  0xac   : > { %v542_v62 = vsel %vm478_vm8, %v424_v53, %v510_v59  ;;  %v503_v63 = vmul.f32 0.2, %v407_v58 }
  0xad   : > { %v574_v0 = vpack.c.bf16 %v542_v62, %v542_v62  ;;  %v550_v1 = vsel %vm486_vm9, %v444_v54, %v518_v60  ;;  %v527_v2 = vsel %vm463_vm10, %v387_v57, %v495_v61 }
  0xae   : > { %v582_v3 = vpack.c.bf16 %v550_v1, %v550_v1  ;;  %v559_v4 = vpack.c.bf16 %v527_v2, %v527_v2  ;;  %v535_v5 = vsel %vm471_vm11, %v407_v58, %v503_v63 }
  0xaf   : > { %607 = vst.msk [vmem:[%s928_s4 + $0x44] sm:$0xf] %vm589_vm3, %v574_v0  ;;  %v567_v6 = vpack.c.bf16 %v535_v5, %v535_v5  ;;  %v426_v7 = vpop.f32.mrf.mxu2  ;;  %v446_v8 = vpop.f32.mrf.mxu3 }
  0xb0   : > { %615 = vst.msk [vmem:[%s928_s4 + $0x64] sm:$0xf] %vm589_vm3, %v582_v3  ;;  %v427_v9 = vadd.f32 %v919_v20, %v426_v7  ;;  %v447_v10 = vadd.f32 %v919_v20, %v446_v8  ;;  %v388_v11 = vpop.f32.mrf.mxu0  ;;  %v408_v12 = vpop.f32.mrf.mxu1 }
  0xb1   : > { %592 = vst.msk [vmem:[%s928_s4 + $0x8] sm:$0xf] %vm589_vm3, %v559_v4  ;;  %v389_v13 = vadd.f32 %v919_v20, %v388_v11  ;;  %v409_v14 = vadd.f32 %v919_v20, %v408_v12 }
  0xb2   : > { %600 = vst.msk [vmem:[%s928_s4 + $0x28] sm:$0xf] %vm589_vm3, %v567_v6  ;;  %vm479_vm12 = vcmp.gt.f32.partialorder %v427_v9, 0.0  ;;  %v511_v15 = vmul.f32 0.2, %v427_v9  ;;  %vm487_vm13 = vcmp.gt.f32.partialorder %v447_v10, 0.0 }
  0xb3   : > { %v519_v16 = vmul.f32 0.2, %v447_v10  ;;  %vm464_vm14 = vcmp.gt.f32.partialorder %v389_v13, 0.0  ;;  %v496_v17 = vmul.f32 0.2, %v389_v13  ;;  %vm472_vm15 = vcmp.gt.f32.partialorder %v409_v14, 0.0 }
  0xb4   : > { %v543_v18 = vsel %vm479_vm12, %v427_v9, %v511_v15  ;;  %v504_v19 = vmul.f32 0.2, %v409_v14 }
  0xb5   : > { %v575_v21 = vpack.c.bf16 %v543_v18, %v543_v18  ;;  %v551_v22 = vsel %vm487_vm13, %v447_v10, %v519_v16  ;;  %v528_v23 = vsel %vm464_vm14, %v389_v13, %v496_v17 }
  0xb6   : > { %v583_v24 = vpack.c.bf16 %v551_v22, %v551_v22  ;;  %v560_v25 = vpack.c.bf16 %v528_v23, %v528_v23  ;;  %v536_v26 = vsel %vm472_vm15, %v409_v14, %v504_v19 }
  0xb7   : > { %608 = vst.msk [vmem:[%s928_s4 + $0x48] sm:$0xf] %vm589_vm3, %v575_v21  ;;  %v568_v27 = vpack.c.bf16 %v536_v26, %v536_v26  ;;  %v428_v28 = vpop.f32.mrf.mxu2  ;;  %v448_v29 = vpop.f32.mrf.mxu3 }
  0xb8   : > { %616 = vst.msk [vmem:[%s928_s4 + $0x68] sm:$0xf] %vm589_vm3, %v583_v24  ;;  %v429_v30 = vadd.f32 %v919_v20, %v428_v28  ;;  %v449_v31 = vadd.f32 %v919_v20, %v448_v29  ;;  %v391_v32 = vpop.f32.mrf.mxu0  ;;  %v411_v33 = vpop.f32.mrf.mxu1 }
  0xb9   : > { %593 = vst.msk [vmem:[%s928_s4 + $0xc] sm:$0xf] %vm589_vm3, %v560_v25  ;;  %v392_v34 = vadd.f32 %v919_v20, %v391_v32  ;;  %v412_v35 = vadd.f32 %v919_v20, %v411_v33 }
  0xba   : > { %601 = vst.msk [vmem:[%s928_s4 + $0x2c] sm:$0xf] %vm589_vm3, %v568_v27  ;;  %vm480_vm0 = vcmp.gt.f32.partialorder %v429_v30, 0.0  ;;  %v512_v36 = vmul.f32 0.2, %v429_v30  ;;  %vm488_vm1 = vcmp.gt.f32.partialorder %v449_v31, 0.0 }
  0xbb   : > { %v520_v37 = vmul.f32 0.2, %v449_v31  ;;  %vm465_vm2 = vcmp.gt.f32.partialorder %v392_v34, 0.0  ;;  %v497_v38 = vmul.f32 0.2, %v392_v34  ;;  %vm473_vm4 = vcmp.gt.f32.partialorder %v412_v35, 0.0 }
  0xbc   : > { %v544_v39 = vsel %vm480_vm0, %v429_v30, %v512_v36  ;;  %v505_v40 = vmul.f32 0.2, %v412_v35 }
  0xbd   : > { %v576_v41 = vpack.c.bf16 %v544_v39, %v544_v39  ;;  %v552_v42 = vsel %vm488_vm1, %v449_v31, %v520_v37  ;;  %v529_v43 = vsel %vm465_vm2, %v392_v34, %v497_v38 }
  0xbe   : > { %v584_v44 = vpack.c.bf16 %v552_v42, %v552_v42  ;;  %v561_v45 = vpack.c.bf16 %v529_v43, %v529_v43  ;;  %v537_v46 = vsel %vm473_vm4, %v412_v35, %v505_v40 }
  0xbf   : > { %609 = vst.msk [vmem:[%s928_s4 + $0x4c] sm:$0xf] %vm589_vm3, %v576_v41  ;;  %v569_v47 = vpack.c.bf16 %v537_v46, %v537_v46  ;;  %v431_v48 = vpop.f32.mrf.mxu2  ;;  %v451_v49 = vpop.f32.mrf.mxu3 }
  0xc0   : > { %617 = vst.msk [vmem:[%s928_s4 + $0x6c] sm:$0xf] %vm589_vm3, %v584_v44  ;;  %v432_v50 = vadd.f32 %v919_v20, %v431_v48  ;;  %v452_v51 = vadd.f32 %v919_v20, %v451_v49  ;;  %v393_v52 = vpop.f32.mrf.mxu0  ;;  %v413_v53 = vpop.f32.mrf.mxu1 }
  0xc1   : > { %594 = vst.msk [vmem:[%s928_s4 + $0x10] sm:$0xf] %vm589_vm3, %v561_v45  ;;  %v394_v54 = vadd.f32 %v919_v20, %v393_v52  ;;  %v414_v55 = vadd.f32 %v919_v20, %v413_v53 }
  0xc2   : > { %602 = vst.msk [vmem:[%s928_s4 + $0x30] sm:$0xf] %vm589_vm3, %v569_v47  ;;  %vm481_vm5 = vcmp.gt.f32.partialorder %v432_v50, 0.0  ;;  %v513_v56 = vmul.f32 0.2, %v432_v50  ;;  %vm489_vm6 = vcmp.gt.f32.partialorder %v452_v51, 0.0 }
  0xc3   : > { %v521_v57 = vmul.f32 0.2, %v452_v51  ;;  %vm466_vm7 = vcmp.gt.f32.partialorder %v394_v54, 0.0  ;;  %v498_v58 = vmul.f32 0.2, %v394_v54  ;;  %vm474_vm8 = vcmp.gt.f32.partialorder %v414_v55, 0.0 }
  0xc4   : > { %v545_v59 = vsel %vm481_vm5, %v432_v50, %v513_v56  ;;  %v506_v60 = vmul.f32 0.2, %v414_v55 }
  0xc5   : > { %v577_v61 = vpack.c.bf16 %v545_v59, %v545_v59  ;;  %v553_v62 = vsel %vm489_vm6, %v452_v51, %v521_v57  ;;  %v530_v63 = vsel %vm466_vm7, %v394_v54, %v498_v58 }
  0xc6   : > { %v585_v0 = vpack.c.bf16 %v553_v62, %v553_v62  ;;  %v562_v1 = vpack.c.bf16 %v530_v63, %v530_v63  ;;  %v538_v2 = vsel %vm474_vm8, %v414_v55, %v506_v60 }
  0xc7   : > { %610 = vst.msk [vmem:[%s928_s4 + $0x50] sm:$0xf] %vm589_vm3, %v577_v61  ;;  %v570_v3 = vpack.c.bf16 %v538_v2, %v538_v2  ;;  %v433_v4 = vpop.f32.mrf.mxu2  ;;  %v453_v5 = vpop.f32.mrf.mxu3 }
  0xc8   : > { %618 = vst.msk [vmem:[%s928_s4 + $0x70] sm:$0xf] %vm589_vm3, %v585_v0  ;;  %v434_v6 = vadd.f32 %v919_v20, %v433_v4  ;;  %v454_v7 = vadd.f32 %v919_v20, %v453_v5  ;;  %v396_v8 = vpop.f32.mrf.mxu0  ;;  %v416_v9 = vpop.f32.mrf.mxu1 }
  0xc9   : > { %595 = vst.msk [vmem:[%s928_s4 + $0x14] sm:$0xf] %vm589_vm3, %v562_v1  ;;  %v397_v10 = vadd.f32 %v919_v20, %v396_v8  ;;  %v417_v11 = vadd.f32 %v919_v20, %v416_v9 }
  0xca   : > { %603 = vst.msk [vmem:[%s928_s4 + $0x34] sm:$0xf] %vm589_vm3, %v570_v3  ;;  %vm482_vm9 = vcmp.gt.f32.partialorder %v434_v6, 0.0  ;;  %v514_v12 = vmul.f32 0.2, %v434_v6  ;;  %vm490_vm10 = vcmp.gt.f32.partialorder %v454_v7, 0.0 }
  0xcb   : > { %v522_v13 = vmul.f32 0.2, %v454_v7  ;;  %vm467_vm11 = vcmp.gt.f32.partialorder %v397_v10, 0.0  ;;  %v499_v14 = vmul.f32 0.2, %v397_v10  ;;  %vm475_vm12 = vcmp.gt.f32.partialorder %v417_v11, 0.0 }
  0xcc   : > { %v546_v15 = vsel %vm482_vm9, %v434_v6, %v514_v12  ;;  %v507_v16 = vmul.f32 0.2, %v417_v11 }
  0xcd   : > { %v578_v17 = vpack.c.bf16 %v546_v15, %v546_v15  ;;  %v554_v18 = vsel %vm490_vm10, %v454_v7, %v522_v13  ;;  %v531_v19 = vsel %vm467_vm11, %v397_v10, %v499_v14 }
  0xce   : > { %v586_v21 = vpack.c.bf16 %v554_v18, %v554_v18  ;;  %v563_v22 = vpack.c.bf16 %v531_v19, %v531_v19  ;;  %v539_v23 = vsel %vm475_vm12, %v417_v11, %v507_v16 }
  0xcf   : > { %611 = vst.msk [vmem:[%s928_s4 + $0x54] sm:$0xf] %vm589_vm3, %v578_v17  ;;  %v571_v24 = vpack.c.bf16 %v539_v23, %v539_v23  ;;  %v436_v25 = vpop.f32.mrf.mxu2  ;;  %v456_v26 = vpop.f32.mrf.mxu3 }
  0xd0   : > { %619 = vst.msk [vmem:[%s928_s4 + $0x74] sm:$0xf] %vm589_vm3, %v586_v21  ;;  %v437_v27 = vadd.f32 %v919_v20, %v436_v25  ;;  %v457_v28 = vadd.f32 %v919_v20, %v456_v26  ;;  %v398_v29 = vpop.f32.mrf.mxu0  ;;  %v418_v30 = vpop.f32.mrf.mxu1 }
  0xd1   : > { %596 = vst.msk [vmem:[%s928_s4 + $0x18] sm:$0xf] %vm589_vm3, %v563_v22  ;;  %v399_v31 = vadd.f32 %v919_v20, %v398_v29  ;;  %v419_v32 = vadd.f32 %v919_v20, %v418_v30 }
  0xd2   : > { %604 = vst.msk [vmem:[%s928_s4 + $0x38] sm:$0xf] %vm589_vm3, %v571_v24  ;;  %vm483_vm13 = vcmp.gt.f32.partialorder %v437_v27, 0.0  ;;  %v515_v33 = vmul.f32 0.2, %v437_v27  ;;  %vm491_vm14 = vcmp.gt.f32.partialorder %v457_v28, 0.0 }
  0xd3   : > { %v523_v34 = vmul.f32 0.2, %v457_v28  ;;  %vm468_vm15 = vcmp.gt.f32.partialorder %v399_v31, 0.0  ;;  %v500_v35 = vmul.f32 0.2, %v399_v31  ;;  %vm476_vm0 = vcmp.gt.f32.partialorder %v419_v32, 0.0 }
  0xd4   : > { %v547_v36 = vsel %vm483_vm13, %v437_v27, %v515_v33  ;;  %v508_v37 = vmul.f32 0.2, %v419_v32 }
  0xd5   : > { %v579_v38 = vpack.c.bf16 %v547_v36, %v547_v36  ;;  %v555_v39 = vsel %vm491_vm14, %v457_v28, %v523_v34  ;;  %v532_v40 = vsel %vm468_vm15, %v399_v31, %v500_v35 }
  0xd6   : > { %v587_v41 = vpack.c.bf16 %v555_v39, %v555_v39  ;;  %v564_v42 = vpack.c.bf16 %v532_v40, %v532_v40  ;;  %v540_v43 = vsel %vm476_vm0, %v419_v32, %v508_v37 }
  0xd7   : > { %612 = vst.msk [vmem:[%s928_s4 + $0x58] sm:$0xf] %vm589_vm3, %v579_v38  ;;  %v572_v44 = vpack.c.bf16 %v540_v43, %v540_v43  ;;  %v438_v45 = vpop.f32.mrf.mxu2  ;;  %v458_v46 = vpop.f32.mrf.mxu3 }
  0xd8   : > { %620 = vst.msk [vmem:[%s928_s4 + $0x78] sm:$0xf] %vm589_vm3, %v587_v41  ;;  %v439_v47 = vadd.f32 %v919_v20, %v438_v45  ;;  %v459_v48 = vadd.f32 %v919_v20, %v458_v46 }
  0xd9   : > { %597 = vst.msk [vmem:[%s928_s4 + $0x1c] sm:$0xf] %vm589_vm3, %v564_v42 }
  0xda   : > { %605 = vst.msk [vmem:[%s928_s4 + $0x3c] sm:$0xf] %vm589_vm3, %v572_v44  ;;  %vm484_vm1 = vcmp.gt.f32.partialorder %v439_v47, 0.0  ;;  %v516_v49 = vmul.f32 0.2, %v439_v47  ;;  %vm492_vm2 = vcmp.gt.f32.partialorder %v459_v48, 0.0 }
  0xdb   : > { %v524_v50 = vmul.f32 0.2, %v459_v48 }
  0xdc   : > { %v548_v51 = vsel %vm484_vm1, %v439_v47, %v516_v49 }
  0xdd   : > { %v580_v52 = vpack.c.bf16 %v548_v51, %v548_v51  ;;  %v556_v53 = vsel %vm492_vm2, %v459_v48, %v524_v50 }
  0xde   : > { %v588_v54 = vpack.c.bf16 %v556_v53, %v556_v53 }
  0xdf   : > { %613 = vst.msk [vmem:[%s928_s4 + $0x5c] sm:$0xf] %vm589_vm3, %v580_v52 }
  0xe0   : > { %621 = vst.msk [vmem:[%s928_s4 + $0x7c] sm:$0xf] %vm589_vm3, %v588_v54 }
  0xe1 PF: > { %s13_s12 = sadd.s32 1, %s832_s12  }
  0xe2   : > { %p10_p4 = scmp.ge.s32.totalorder %s13_s12, 4  }
  0xe4   :  { %12 = sbr.rel (!%p10_p4) target bundleno = 1 (0x1), region = 62 }

// kernel: discriminator_forward.4
= control target key start
LH: loop header
LB: loop body
LE: loop exit
PB: predicated region body
PF: predicated region fallthrough
CT: control target
= control target key end

     0   :  { %s1766_s12 = smov 0   ;;  %s2091_s0 = inlined_call_operand.vmem [shape: bf16[128,1024], index: 0, kind: input, shape index: {}]   ;;  %s2092_s1 = inlined_call_operand.vmem [shape: bf16[1024,128], index: 1, kind: input, shape index: {}]   ;;  %s2093_s2 = inlined_call_operand.vmem [shape: f32[1,128], index: 2, kind: input, shape index: {}]   ;;  %s2094_s3 = inlined_call_operand.vmem [shape: bf16[128,128], index: 3, kind: output, shape index: {}]  }
   0x1 LB: > { %s1213_s13 = sadd.s32 4294967295, %s1744_s12   ;;  %p1217_p0 = scmp.ge.s32.totalorder %s1744_s12, 1  ;;  %s1744_s12 = sphi %s1766_s12, %s13_s12  }
   0x2   : > { %p139_p1 = scmp.lt.s32.totalorder %s1744_s12, 3 }
   0x4   : > { %p140_p2 = pnand %p1217_p0, %p139_p1 }
   0x5   : > { %s1218_s11 = sshll.u32 (!%p140_p2), %s1213_s13, 3 }
   0x6   : > { %143 = sbr.rel (%p140_p2) target bundleno = 307 (0x133), region = 32  ;;  %p165_p3 = scmp.lt.s32.totalorder (!%p140_p2), %s1218_s11, 15 }
   0xb   : > { %v1649_v0 = vld [vmem:[%s2092_s1 + $0x38] sm:$0xff]  ;;  %v1648_v4 = vld [vmem:[%s2092_s1 + $0x30] sm:$0xff]  ;;  %v1647_v8 = vld [vmem:[%s2092_s1 + $0x28] sm:$0xff]  ;;  %s2096_s11 = smov (!%p165_p3, %s1218_s11), 15 }
   0xc   : > { %v1657_v1 = vld [vmem:[%s2092_s1 + $0x78] sm:$0xff]  ;;  %885 = vmatpush.bf16.msra.mxu0 %v1649_v0  ;;  %v1656_v5 = vld [vmem:[%s2092_s1 + $0x70] sm:$0xff]  ;;  %v1655_v9 = vld [vmem:[%s2092_s1 + $0x68] sm:$0xff]  ;;  %s1609_s10 = sshll.u32 %s2096_s11, 5 }
   0xd   : > { %v1665_v2 = vld [vmem:[%s2092_s1 + $0xb8] sm:$0xff]  ;;  %914 = vmatpush.bf16.msra.mxu1 %v1657_v1  ;;  %v1664_v6 = vld [vmem:[%s2092_s1 + $0xb0] sm:$0xff]  ;;  %v1663_v10 = vld [vmem:[%s2092_s1 + $0xa8] sm:$0xff]  ;;  %s1858_s20 = scalar_lea.vmem %s2091_s0, %s1609_s10 }
   0xe   : > { %v1673_v3 = vld [vmem:[%s2092_s1 + $0xf8] sm:$0xff]  ;;  %943 = vmatpush.bf16.msra.mxu2 %v1665_v2  ;;  %v1672_v7 = vld [vmem:[%s2092_s1 + $0xf0] sm:$0xff]  ;;  %v1671_v11 = vld [vmem:[%s2092_s1 + $0xe8] sm:$0xff] }
   0xf   : > { %972 = vmatpush.bf16.msra.mxu3 %v1673_v3  ;;  %v1646_v12 = vld [vmem:[%s2092_s1 + $0x20] sm:$0xff]  ;;  %v1645_v16 = vld [vmem:[%s2092_s1 + $0x18] sm:$0xff]  ;;  %v1644_v20 = vld [vmem:[%s2092_s1 + $0x10] sm:$0xff] }
  0x10   : > { %886 = vmatpush.bf16.msra.mxu0 %v1648_v4  ;;  %v1654_v13 = vld [vmem:[%s2092_s1 + $0x60] sm:$0xff]  ;;  %v1653_v17 = vld [vmem:[%s2092_s1 + $0x58] sm:$0xff]  ;;  %v1652_v21 = vld [vmem:[%s2092_s1 + $0x50] sm:$0xff] }
  0x11   : > { %915 = vmatpush.bf16.msra.mxu1 %v1656_v5  ;;  %v1662_v14 = vld [vmem:[%s2092_s1 + $0xa0] sm:$0xff]  ;;  %v1661_v18 = vld [vmem:[%s2092_s1 + $0x98] sm:$0xff]  ;;  %v1660_v22 = vld [vmem:[%s2092_s1 + $0x90] sm:$0xff] }
  0x12   : > { %944 = vmatpush.bf16.msra.mxu2 %v1664_v6  ;;  %v1670_v15 = vld [vmem:[%s2092_s1 + $0xe0] sm:$0xff]  ;;  %v1669_v19 = vld [vmem:[%s2092_s1 + $0xd8] sm:$0xff]  ;;  %v1668_v23 = vld [vmem:[%s2092_s1 + $0xd0] sm:$0xff] }
  0x13   : > { %973 = vmatpush.bf16.msra.mxu3 %v1672_v7  ;;  %v1643_v24 = vld [vmem:[%s2092_s1 + $0x8] sm:$0xff]  ;;  %v1642_v28 = vld [vmem:[%s2092_s1] sm:$0xff]  ;;  %v1697_v40 = vld [vmem:[%s2092_s1 + $0x1b8] sm:$0xff] }
  0x14   : > { %887 = vmatpush.bf16.msra.mxu0 %v1647_v8  ;;  %v1651_v25 = vld [vmem:[%s2092_s1 + $0x48] sm:$0xff]  ;;  %v1650_v29 = vld [vmem:[%s2092_s1 + $0x40] sm:$0xff]  ;;  %v1681_v41 = vld [vmem:[%s2092_s1 + $0x138] sm:$0xff] }
  0x15   : > { %916 = vmatpush.bf16.msra.mxu1 %v1655_v9  ;;  %v1659_v26 = vld [vmem:[%s2092_s1 + $0x88] sm:$0xff]  ;;  %v1658_v30 = vld [vmem:[%s2092_s1 + $0x80] sm:$0xff]  ;;  %v1705_v46 = vld [vmem:[%s2092_s1 + $0x1f8] sm:$0xff] }
  0x16   : > { %945 = vmatpush.bf16.msra.mxu2 %v1663_v10  ;;  %v1667_v27 = vld [vmem:[%s2092_s1 + $0xc8] sm:$0xff]  ;;  %v1666_v31 = vld [vmem:[%s2092_s1 + $0xc0] sm:$0xff]  ;;  %v1689_v47 = vld [vmem:[%s2092_s1 + $0x178] sm:$0xff] }
  0x17   : > { %974 = vmatpush.bf16.msra.mxu3 %v1671_v11  ;;  %v1225_v32 = vld [vmem:[%s1858_s20] sm:$0xf]  ;;  %v1610_v34 = vld [vmem:[%s1858_s20 + $0x4] sm:$0xf]  ;;  %v1233_v36 = vld [vmem:[%s1858_s20 + $0x8] sm:$0xf] }
  0x18   : > { %888 = vmatpush.bf16.msra.mxu0 %v1646_v12  ;;  %v1614_v33 = vld [vmem:[%s1858_s20 + $0x1c] sm:$0xf0]  ;;  %v1227_v35 = vld [vmem:[%s1858_s20 + $0x20] sm:$0xf0]  ;;  %v1615_v37 = vld [vmem:[%s1858_s20 + $0x24] sm:$0xf0] }
  0x19   : > { %917 = vmatpush.bf16.msra.mxu1 %v1654_v13  ;;  %v1611_v38 = vld [vmem:[%s1858_s20 + $0xc] sm:$0xf]  ;;  %v1226_v42 = vor.u32 %v1614_v33, %v1225_v32  ;;  %v1230_v43 = vor.u32 %v1610_v34, %v1227_v35  ;;  %v1234_v44 = vor.u32 %v1615_v37, %v1233_v36  ;;  %v1696_v48 = vld [vmem:[%s2092_s1 + $0x1b0] sm:$0xff]  ;;  %v1257_v56 = vld [vmem:[%s1858_s20 + $0x40] sm:$0xf] }
  0x1a   : > { %946 = vmatpush.bf16.msra.mxu2 %v1662_v14  ;;  %v1235_v39 = vld [vmem:[%s1858_s20 + $0x28] sm:$0xf0]  ;;  %v1680_v49 = vld [vmem:[%s2092_s1 + $0x130] sm:$0xff]  ;;  %v1694_v57 = vld [vmem:[%s2092_s1 + $0x1a0] sm:$0xff] }
  0x1b   : > { %975 = vmatpush.bf16.msra.mxu3 %v1670_v15  ;;  %v1238_v45 = vor.u32 %v1611_v38, %v1235_v39  ;;  %v1704_v50 = vld [vmem:[%s2092_s1 + $0x1f0] sm:$0xff]  ;;  %v1695_v52 = vld [vmem:[%s2092_s1 + $0x1a8] sm:$0xff]  ;;  %v1678_v58 = vld [vmem:[%s2092_s1 + $0x120] sm:$0xff] }
  0x1c   : > { %889 = vmatpush.bf16.msra.mxu0 %v1645_v16  ;;  %v1688_v51 = vld [vmem:[%s2092_s1 + $0x170] sm:$0xff]  ;;  %v1679_v53 = vld [vmem:[%s2092_s1 + $0x128] sm:$0xff]  ;;  %v1622_v59 = vld [vmem:[%s1858_s20 + $0x5c] sm:$0xf0] }
  0x1d   : > { %918 = vmatpush.bf16.msra.mxu1 %v1653_v17  ;;  %v1703_v54 = vld [vmem:[%s2092_s1 + $0x1e8] sm:$0xff]  ;;  %v1618_v60 = vld [vmem:[%s1858_s20 + $0x44] sm:$0xf]  ;;  %v1693_v4 = vld [vmem:[%s2092_s1 + $0x198] sm:$0xff]  ;;  %v1258_v6 = vor.u32 %v1622_v59, %v1257_v56 }
  0x1e   : > { %947 = vmatpush.bf16.msra.mxu2 %v1661_v18  ;;  %v1687_v55 = vld [vmem:[%s2092_s1 + $0x168] sm:$0xff]  ;;  %v1259_v61 = vld [vmem:[%s1858_s20 + $0x60] sm:$0xf0]  ;;  %v1677_v5 = vld [vmem:[%s2092_s1 + $0x118] sm:$0xff] }
  0x1f   : > { %976 = vmatpush.bf16.msra.mxu3 %v1669_v19  ;;  %v1265_v62 = vld [vmem:[%s1858_s20 + $0x48] sm:$0xf]  ;;  %v1619_v0 = vld [vmem:[%s1858_s20 + $0x4c] sm:$0xf]  ;;  %v1702_v2 = vld [vmem:[%s2092_s1 + $0x1e0] sm:$0xff]  ;;  %v1262_v7 = vor.u32 %v1618_v60, %v1259_v61 }
  0x20   : > { %890 = vmatpush.bf16.msra.mxu0 %v1644_v20  ;;  %v1623_v63 = vld [vmem:[%s1858_s20 + $0x64] sm:$0xf0]  ;;  %v1267_v1 = vld [vmem:[%s1858_s20 + $0x68] sm:$0xf0]  ;;  %v1686_v3 = vld [vmem:[%s2092_s1 + $0x160] sm:$0xff] }
  0x21   : > { %919 = vmatpush.bf16.msra.mxu1 %v1652_v21  ;;  %v1266_v8 = vor.u32 %v1623_v63, %v1265_v62  ;;  %v1270_v9 = vor.u32 %v1619_v0, %v1267_v1  ;;  %v1701_v10 = vld [vmem:[%s2092_s1 + $0x1d8] sm:$0xff]  ;;  %v1692_v12 = vld [vmem:[%s2092_s1 + $0x190] sm:$0xff]  ;;  %v1691_v16 = vld [vmem:[%s2092_s1 + $0x188] sm:$0xff] }
  0x22   : > { %948 = vmatpush.bf16.msra.mxu2 %v1660_v22  ;;  %v1685_v11 = vld [vmem:[%s2092_s1 + $0x158] sm:$0xff]  ;;  %v1676_v13 = vld [vmem:[%s2092_s1 + $0x110] sm:$0xff]  ;;  %v1675_v17 = vld [vmem:[%s2092_s1 + $0x108] sm:$0xff] }
  0x23   : > { %977 = vmatpush.bf16.msra.mxu3 %v1668_v23  ;;  %v1700_v14 = vld [vmem:[%s2092_s1 + $0x1d0] sm:$0xff]  ;;  %v1699_v18 = vld [vmem:[%s2092_s1 + $0x1c8] sm:$0xff]  ;;  %v1289_v20 = vld [vmem:[%s1858_s20 + $0x80] sm:$0xf] }
  0x24   : > { %891 = vmatpush.bf16.msra.mxu0 %v1643_v24  ;;  %v1684_v15 = vld [vmem:[%s2092_s1 + $0x150] sm:$0xff]  ;;  %v1683_v19 = vld [vmem:[%s2092_s1 + $0x148] sm:$0xff]  ;;  %v1690_v21 = vld [vmem:[%s2092_s1 + $0x180] sm:$0xff] }
  0x25   : > { %920 = vmatpush.bf16.msra.mxu1 %v1651_v25  ;;  %v1674_v22 = vld [vmem:[%s2092_s1 + $0x100] sm:$0xff]  ;;  %v1273_v60 = vld [vmem:[%s1858_s20 + $0x50] sm:$0xf]  ;;  %v1620_v62 = vld [vmem:[%s1858_s20 + $0x54] sm:$0xf] }
  0x26   : > { %949 = vmatpush.bf16.msra.mxu2 %v1659_v26  ;;  %v1630_v23 = vld [vmem:[%s1858_s20 + $0x9c] sm:$0xf0]  ;;  %v1626_v24 = vld [vmem:[%s1858_s20 + $0x84] sm:$0xf]  ;;  %v1297_v26 = vld [vmem:[%s1858_s20 + $0x88] sm:$0xf] }
  0x27   : > { %978 = vmatpush.bf16.msra.mxu3 %v1667_v27  ;;  %v1291_v25 = vld [vmem:[%s1858_s20 + $0xa0] sm:$0xf0]  ;;  %v1631_v27 = vld [vmem:[%s1858_s20 + $0xa4] sm:$0xf0]  ;;  %v1290_v32 = vor.u32 %v1630_v23, %v1289_v20  ;;  %v1321_v36 = vld [vmem:[%s1858_s20 + $0xc0] sm:$0xf] }
  0x28   : > { %892 = vmatpush.bf16.msra.mxu0 %v1642_v28  ;;  %v1627_v28 = vld [vmem:[%s1858_s20 + $0x8c] sm:$0xf]  ;;  %v1294_v33 = vor.u32 %v1626_v24, %v1291_v25  ;;  %v1298_v34 = vor.u32 %v1631_v27, %v1297_v26  ;;  %v1638_v37 = vld [vmem:[%s1858_s20 + $0xdc] sm:$0xf0]  ;;  %v1634_v38 = vld [vmem:[%s1858_s20 + $0xc4] sm:$0xf] }
  0x29   : > { %921 = vmatpush.bf16.msra.mxu1 %v1650_v29  ;;  %v1299_v29 = vld [vmem:[%s1858_s20 + $0xa8] sm:$0xf0]  ;;  %v1323_v39 = vld [vmem:[%s1858_s20 + $0xe0] sm:$0xf0]  ;;  %v1624_v61 = vld [vmem:[%s1858_s20 + $0x6c] sm:$0xf0] }
  0x2a   : > { %950 = vmatpush.bf16.msra.mxu2 %v1658_v30  ;;  %v1698_v30 = vld [vmem:[%s2092_s1 + $0x1c0] sm:$0xff]  ;;  %v1302_v35 = vor.u32 %v1627_v28, %v1299_v29  ;;  %v1275_v63 = vld [vmem:[%s1858_s20 + $0x70] sm:$0xf0]  ;;  %v1281_v0 = vld [vmem:[%s1858_s20 + $0x58] sm:$0xf] }
  0x2b   : > { %979 = vmatpush.bf16.msra.mxu3 %v1666_v31  ;;  %893 = vmatmul.bf16.vlgmr.msra.gmra.mxu0 %v1226_v42  ;;  %v1682_v31 = vld [vmem:[%s2092_s1 + $0x140] sm:$0xff]  ;;  %v1635_v42 = vld [vmem:[%s1858_s20 + $0xcc] sm:$0xf]  ;;  %v1625_v1 = vld [vmem:[%s1858_s20 + $0x74] sm:$0xf0] }
  0x2c   : > { %1001 = vmatpush.bf16.msrb.mxu0 %v1681_v41  ;;  %922 = vmatmul.bf16.vlgmr.msra.gmra.mxu1 %v1230_v43  ;;  %v1639_v41 = vld [vmem:[%s1858_s20 + $0xe4] sm:$0xf0]  ;;  %v1331_v43 = vld [vmem:[%s1858_s20 + $0xe8] sm:$0xf0]  ;;  %v1337_v20 = vld [vmem:[%s1858_s20 + $0xd0] sm:$0xf] }
  0x2d   : > { %951 = vmatmul.bf16.vlgmr.msra.gmra.mxu2 %v1234_v44  ;;  %1030 = vmatpush.bf16.msrb.mxu1 %v1689_v47  ;;  %v1322_v44 = vor.u32 %v1638_v37, %v1321_v36  ;;  %v1334_v47 = vor.u32 %v1635_v42, %v1331_v43  ;;  %v1339_v23 = vld [vmem:[%s1858_s20 + $0xf0] sm:$0xf0]  ;;  %v1345_v24 = vld [vmem:[%s1858_s20 + $0xd8] sm:$0xf]  ;;  %v1637_v26 = vld [vmem:[%s1858_s20 + $0xdc] sm:$0xf] }
  0x2e   : > { %1059 = vmatpush.bf16.msrb.mxu2 %v1697_v40  ;;  %980 = vmatmul.bf16.vlgmr.msra.gmra.mxu3 %v1238_v45  ;;  %v1329_v40 = vld [vmem:[%s1858_s20 + $0xc8] sm:$0xf]  ;;  %v1326_v45 = vor.u32 %v1634_v38, %v1323_v39  ;;  %v1641_v25 = vld [vmem:[%s1858_s20 + $0xf4] sm:$0xf0]  ;;  %v1347_v27 = vld [vmem:[%s1858_s20 + $0xf8] sm:$0xf0] }
  0x2f   : > { %1088 = vmatpush.bf16.msrb.mxu3 %v1705_v46  ;;  %v1330_v46 = vor.u32 %v1639_v41, %v1329_v40 }
  0x30   : > { %1002 = vmatpush.bf16.msrb.mxu0 %v1680_v49  ;;  %v1616_v49 = vld [vmem:[%s1858_s20 + $0x2c] sm:$0xf0] }
  0x31   : > { %1031 = vmatpush.bf16.msrb.mxu1 %v1688_v51  ;;  %v1243_v51 = vld [vmem:[%s1858_s20 + $0x30] sm:$0xf0] }
  0x32   : > { %1060 = vmatpush.bf16.msrb.mxu2 %v1696_v48  ;;  %v1241_v48 = vld [vmem:[%s1858_s20 + $0x10] sm:$0xf] }
  0x33   : > { %1089 = vmatpush.bf16.msrb.mxu3 %v1704_v50  ;;  %v1612_v50 = vld [vmem:[%s1858_s20 + $0x14] sm:$0xf]  ;;  %v1242_v56 = vor.u32 %v1616_v49, %v1241_v48 }
  0x34   : > { %1003 = vmatpush.bf16.msrb.mxu0 %v1679_v53  ;;  %v1617_v53 = vld [vmem:[%s1858_s20 + $0x34] sm:$0xf0] }
  0x35   : > { %1032 = vmatpush.bf16.msrb.mxu1 %v1687_v55  ;;  %v1251_v55 = vld [vmem:[%s1858_s20 + $0x38] sm:$0xf0] }
  0x36   : > { %1061 = vmatpush.bf16.msrb.mxu2 %v1695_v52  ;;  %v1249_v52 = vld [vmem:[%s1858_s20 + $0x18] sm:$0xf] }
  0x37   : > { %1090 = vmatpush.bf16.msrb.mxu3 %v1703_v54  ;;  %v1613_v54 = vld [vmem:[%s1858_s20 + $0x1c] sm:$0xf] }
  0x38   : > { %1004 = vmatpush.bf16.msrb.mxu0 %v1678_v58  ;;  %v1250_v58 = vor.u32 %v1617_v53, %v1249_v52  ;;  %v1254_v59 = vor.u32 %v1613_v54, %v1251_v55 }
  0x39   : > { %1033 = vmatpush.bf16.msrb.mxu1 %v1686_v3  ;;  %v1283_v3 = vld [vmem:[%s1858_s20 + $0x78] sm:$0xf0] }
  0x3a   : > { %1062 = vmatpush.bf16.msrb.mxu2 %v1694_v57  ;;  %v1246_v57 = vor.u32 %v1612_v50, %v1243_v51 }
  0x3b   : > { %1091 = vmatpush.bf16.msrb.mxu3 %v1702_v2  ;;  %898 = vmatmul.bf16.gmra.mxu0 %v1258_v6  ;;  %v1621_v2 = vld [vmem:[%s1858_s20 + $0x5c] sm:$0xf]  ;;  %v1282_v6 = vor.u32 %v1625_v1, %v1281_v0 }
  0x3c   : > { %1005 = vmatpush.bf16.msrb.mxu0 %v1677_v5  ;;  %927 = vmatmul.bf16.gmra.mxu1 %v1262_v7  ;;  %v1278_v5 = vor.u32 %v1620_v62, %v1275_v63  ;;  %v1286_v7 = vor.u32 %v1621_v2, %v1283_v3 }
  0x3d   : > { %956 = vmatmul.bf16.gmra.mxu2 %v1266_v8  ;;  %1034 = vmatpush.bf16.msrb.mxu1 %v1685_v11  ;;  %v1305_v8 = vld [vmem:[%s1858_s20 + $0x90] sm:$0xf]  ;;  %v1307_v11 = vld [vmem:[%s1858_s20 + $0xb0] sm:$0xf0] }
  0x3e   : > { %1063 = vmatpush.bf16.msrb.mxu2 %v1693_v4  ;;  %985 = vmatmul.bf16.gmra.mxu3 %v1270_v9  ;;  %v1274_v4 = vor.u32 %v1624_v61, %v1273_v60  ;;  %v1632_v9 = vld [vmem:[%s1858_s20 + $0xac] sm:$0xf0] }
  0x3f   : > { %1092 = vmatpush.bf16.msrb.mxu3 %v1701_v10  ;;  %v1628_v10 = vld [vmem:[%s1858_s20 + $0x94] sm:$0xf] }
  0x40   : > { %1006 = vmatpush.bf16.msrb.mxu0 %v1676_v13  ;;  %v1633_v13 = vld [vmem:[%s1858_s20 + $0xb4] sm:$0xf0] }
  0x41   : > { %1035 = vmatpush.bf16.msrb.mxu1 %v1684_v15  ;;  %v1315_v15 = vld [vmem:[%s1858_s20 + $0xb8] sm:$0xf0] }
  0x42   : > { %1064 = vmatpush.bf16.msrb.mxu2 %v1692_v12  ;;  %v1313_v12 = vld [vmem:[%s1858_s20 + $0x98] sm:$0xf] }
  0x43   : > { %1093 = vmatpush.bf16.msrb.mxu3 %v1700_v14  ;;  %v1629_v14 = vld [vmem:[%s1858_s20 + $0x9c] sm:$0xf] }
  0x44   : > { %1007 = vmatpush.bf16.msrb.mxu0 %v1675_v17  ;;  %v1310_v17 = vor.u32 %v1628_v10, %v1307_v11 }
  0x45   : > { %1036 = vmatpush.bf16.msrb.mxu1 %v1683_v19  ;;  %v1318_v19 = vor.u32 %v1629_v14, %v1315_v15 }
  0x46   : > { %1065 = vmatpush.bf16.msrb.mxu2 %v1691_v16  ;;  %v1306_v16 = vor.u32 %v1632_v9, %v1305_v8 }
  0x47   : > { %1094 = vmatpush.bf16.msrb.mxu3 %v1699_v18  ;;  %v1314_v18 = vor.u32 %v1633_v13, %v1313_v12 }
  0x48   : > { %1008 = vmatpush.bf16.msrb.mxu0 %v1674_v22  ;;  %v1636_v22 = vld [vmem:[%s1858_s20 + $0xd4] sm:$0xf] }
  0x49   : > { %1037 = vmatpush.bf16.msrb.mxu1 %v1682_v31  ;;  %v1342_v29 = vor.u32 %v1636_v22, %v1339_v23  ;;  %v1350_v31 = vor.u32 %v1637_v26, %v1347_v27 }
  0x4a   : > { %1066 = vmatpush.bf16.msrb.mxu2 %v1690_v21  ;;  %v1640_v21 = vld [vmem:[%s1858_s20 + $0xec] sm:$0xf0]  ;;  %s1222_s20 = sshll.u32 %s2096_s11, 2 }
  0x4b   : > { %1095 = vmatpush.bf16.msrb.mxu3 %v1698_v30  ;;  %903 = vmatmul.bf16.gmra.mxu0 %v1290_v32  ;;  %v1338_v28 = vor.u32 %v1640_v21, %v1337_v20  ;;  %v1346_v30 = vor.u32 %v1641_v25, %v1345_v24  ;;  %v2041_v32 = vld [vmem:[%s2093_s2] ss:$0 sm:$0xff]  ;;  %s2071_s28 = scalar_lea.vmem %s2094_s3, %s1222_s20 }
  0x4c   : > { %932 = vmatmul.bf16.gmra.mxu1 %v1294_v33 }
  0x4d   : > { %961 = vmatmul.bf16.gmra.mxu2 %v1298_v34 }
  0x4e   : > { %990 = vmatmul.bf16.gmra.mxu3 %v1302_v35 }
  0x5b   : > { %908 = vmatmul.bf16.gmra.mxu0 %v1322_v44 }
  0x5c   : > { %937 = vmatmul.bf16.gmra.mxu1 %v1326_v45 }
  0x5d   : > { %966 = vmatmul.bf16.gmra.mxu2 %v1330_v46 }
  0x5e   : > { %995 = vmatmul.bf16.gmra.mxu3 %v1334_v47 }
  0x6b   : > { %1009 = vmatmul.bf16.vlgmr.msrb.gmra.mxu0 %v1242_v56 }
  0x6c   : > { %1038 = vmatmul.bf16.vlgmr.msrb.gmra.mxu1 %v1246_v57 }
  0x6d   : > { %1067 = vmatmul.bf16.vlgmr.msrb.gmra.mxu2 %v1250_v58 }
  0x6e   : > { %1096 = vmatmul.bf16.vlgmr.msrb.gmra.mxu3 %v1254_v59 }
  0x7b   : > { %1014 = vmatmul.bf16.gmra.mxu0 %v1274_v4 }
  0x7c   : > { %1043 = vmatmul.bf16.gmra.mxu1 %v1278_v5 }
  0x7d   : > { %1072 = vmatmul.bf16.gmra.mxu2 %v1282_v6 }
  0x7e   : > { %1101 = vmatmul.bf16.gmra.mxu3 %v1286_v7 }
  0x8b   : > { %1019 = vmatmul.bf16.gmra.mxu0 %v1306_v16 }
  0x8c   : > { %1048 = vmatmul.bf16.gmra.mxu1 %v1310_v17 }
  0x8d   : > { %1077 = vmatmul.bf16.gmra.mxu2 %v1314_v18 }
  0x8e   : > { %1106 = vmatmul.bf16.gmra.mxu3 %v1318_v19 }
  0x9b   : > { %1024 = vmatmul.bf16.gmra.mxu0 %v1338_v28 }
  0x9c   : > { %1053 = vmatmul.bf16.gmra.mxu1 %v1342_v29 }
  0x9d   : > { %1082 = vmatmul.bf16.gmra.mxu2 %v1346_v30 }
  0x9e   : > { %1111 = vmatmul.bf16.gmra.mxu3 %v1350_v31 }
  0xa8   : > { %v894_v33 = vpop.f32.mrf.mxu0 }
  0xa9   : > { %v923_v34 = vpop.f32.mrf.mxu1  ;;  %v895_v35 = vadd.f32 %v2041_v32, %v894_v33 }
  0xab   : > { %v924_v36 = vadd.f32 %v923_v34, %v895_v35 }
  0xb0   : > { %v952_v37 = vpop.f32.mrf.mxu2  ;;  %v896_v40 = vpop.f32.mrf.mxu0 }
  0xb1   : > { %v981_v38 = vpop.f32.mrf.mxu3  ;;  %v953_v39 = vadd.f32 %v952_v37, %v924_v36  ;;  %v925_v41 = vpop.f32.mrf.mxu1  ;;  %v897_v15 = vadd.f32 %v2041_v32, %v896_v40 }
  0xb3   : > { %v982_v42 = vadd.f32 %v981_v38, %v953_v39  ;;  %v926_v20 = vadd.f32 %v925_v41, %v897_v15 }
  0xb8   : > { %v954_v43 = vpop.f32.mrf.mxu2  ;;  %v899_v45 = vpop.f32.mrf.mxu0 }
  0xb9   : > { %v983_v44 = vpop.f32.mrf.mxu3  ;;  %v928_v46 = vpop.f32.mrf.mxu1  ;;  %v900_v47 = vadd.f32 %v2041_v32, %v899_v45  ;;  %v955_v21 = vadd.f32 %v954_v43, %v926_v20 }
  0xbb   : > { %v929_v48 = vadd.f32 %v928_v46, %v900_v47  ;;  %v984_v25 = vadd.f32 %v983_v44, %v955_v21 }
  0xc0   : > { %v957_v49 = vpop.f32.mrf.mxu2  ;;  %v901_v52 = vpop.f32.mrf.mxu0 }
  0xc1   : > { %v986_v50 = vpop.f32.mrf.mxu3  ;;  %v958_v51 = vadd.f32 %v957_v49, %v929_v48  ;;  %v930_v53 = vpop.f32.mrf.mxu1  ;;  %v902_v31 = vadd.f32 %v2041_v32, %v901_v52 }
  0xc3   : > { %v987_v54 = vadd.f32 %v986_v50, %v958_v51  ;;  %v931_v40 = vadd.f32 %v930_v53, %v902_v31 }
  0xc8   : > { %v959_v55 = vpop.f32.mrf.mxu2  ;;  %v904_v57 = vpop.f32.mrf.mxu0 }
  0xc9   : > { %v988_v56 = vpop.f32.mrf.mxu3  ;;  %v933_v58 = vpop.f32.mrf.mxu1  ;;  %v905_v59 = vadd.f32 %v2041_v32, %v904_v57  ;;  %v960_v43 = vadd.f32 %v959_v55, %v931_v40 }
  0xcb   : > { %v934_v60 = vadd.f32 %v933_v58, %v905_v59  ;;  %v989_v51 = vadd.f32 %v988_v56, %v960_v43 }
  0xd0   : > { %v962_v61 = vpop.f32.mrf.mxu2  ;;  %v906_v0 = vpop.f32.mrf.mxu0 }
  0xd1   : > { %v991_v62 = vpop.f32.mrf.mxu3  ;;  %v963_v63 = vadd.f32 %v962_v61, %v934_v60  ;;  %v2046_v1 = vpop.f32.mrf.mxu1 }
  0xd3   : > { %v2048_v2 = vadd.f32 %v991_v62, %v963_v63 }
  0xd8   : > { %v2050_v3 = vpop.f32.mrf.mxu2  ;;  %v909_v5 = vpop.f32.mrf.mxu0 }
  0xd9   : > { %v2052_v4 = vpop.f32.mrf.mxu3  ;;  %v938_v6 = vpop.f32.mrf.mxu1  ;;  %v910_v7 = vadd.f32 %v2041_v32, %v909_v5 }
  0xdb   : > { %v939_v8 = vadd.f32 %v938_v6, %v910_v7 }
  0xe0   : > { %v967_v9 = vpop.f32.mrf.mxu2  ;;  %v2055_v12 = vpop.f32.mrf.mxu0 }
  0xe1   : > { %v996_v10 = vpop.f32.mrf.mxu3  ;;  %v968_v11 = vadd.f32 %v967_v9, %v939_v8  ;;  %v2057_v13 = vpop.f32.mrf.mxu1 }
  0xe3   : > { %v2059_v14 = vadd.f32 %v996_v10, %v968_v11 }
  0xe8   : > { %v2062_v16 = vpop.f32.mrf.mxu2  ;;  %v1010_v18 = vpop.f32.mrf.mxu0 }
  0xe9   : > { %v2064_v17 = vpop.f32.mrf.mxu3  ;;  %v1039_v19 = vpop.f32.mrf.mxu1  ;;  %v1011_v22 = vadd.f32 %v1010_v18, %v982_v42 }
  0xeb   : > { %v1040_v26 = vadd.f32 %v1039_v19, %v1011_v22 }
  0xf0   : > { %v1068_v23 = vpop.f32.mrf.mxu2  ;;  %v1012_v27 = vpop.f32.mrf.mxu0 }
  0xf1   : > { %v1097_v24 = vpop.f32.mrf.mxu3  ;;  %v1041_v28 = vpop.f32.mrf.mxu1  ;;  %v1069_v29 = vadd.f32 %v1068_v23, %v1040_v26  ;;  %v1013_v30 = vadd.f32 %v1012_v27, %v984_v25 }
  0xf3   : > { %v1098_v33 = vadd.f32 %v1097_v24, %v1069_v29  ;;  %v1042_v34 = vadd.f32 %v1041_v28, %v1013_v30 }
  0xf5   : > { %v1125_v41 = vmul.f32 0.2, %v1098_v33  ;;  %vm1117_vm0 = vcmp.gt.f32.partialorder %v1098_v33, 0.0 }
  0xf7   : > { %v1133_v46 = vsel %vm1117_vm0, %v1098_v33, %v1125_v41 }
  0xf8   : > { %v1070_v35 = vpop.f32.mrf.mxu2  ;;  %v1015_v38 = vpop.f32.mrf.mxu0 }
  0xf9   : > { %v1099_v36 = vpop.f32.mrf.mxu3  ;;  %v1071_v37 = vadd.f32 %v1070_v35, %v1042_v34  ;;  %v1044_v39 = vpop.f32.mrf.mxu1  ;;  %v1016_v45 = vadd.f32 %v1015_v38, %v987_v54  ;;  %v907_v54 = vadd.f32 %v2041_v32, %v906_v0 }
  0xfb   : > { %v1100_v42 = vadd.f32 %v1099_v36, %v1071_v37  ;;  %v1045_v52 = vadd.f32 %v1044_v39, %v1016_v45  ;;  %v936_v7 = vadd.f32 %v2046_v1, %v907_v54 }
  0xfd   : > { %vm1118_vm1 = vcmp.gt.f32.partialorder %v1100_v42, 0.0  ;;  %v1126_v44 = vmul.f32 0.2, %v1100_v42  ;;  %v965_v9 = vadd.f32 %v2050_v3, %v936_v7  ;;  %v912_v3 = vadd.f32 %v2041_v32, %v2055_v12 }
  0xff   : > { %v1134_v47 = vsel %vm1118_vm1, %v1100_v42, %v1126_v44  ;;  %v994_v21 = vadd.f32 %v2052_v4, %v965_v9  ;;  %v941_v31 = vadd.f32 %v2057_v13, %v912_v3 }
 0x100   : > { %v1709_v48 = vpack.c.bf16 %v1134_v47, %v1133_v46  ;;  %v1073_v49 = vpop.f32.mrf.mxu2  ;;  %v1017_v53 = vpop.f32.mrf.mxu0 }
 0x101   : > { %v1102_v50 = vpop.f32.mrf.mxu3  ;;  %v1046_v57 = vpop.f32.mrf.mxu1  ;;  %v1074_v55 = vadd.f32 %v1073_v49, %v1045_v52  ;;  %v1018_v58 = vadd.f32 %v1017_v53, %v989_v51  ;;  %v970_v35 = vadd.f32 %v2062_v16, %v941_v31 }
 0x102   : > { %1710 = vst [vmem:[%s2071_s28] sm:$0xff] %v1709_v48  }
 0x103   : > { %v1103_v59 = vadd.f32 %v1102_v50, %v1074_v55  ;;  %v1047_v60 = vadd.f32 %v1046_v57, %v1018_v58  ;;  %v999_v41 = vadd.f32 %v2064_v17, %v970_v35 }
 0x105   : > { %v1127_v8 = vmul.f32 0.2, %v1103_v59  ;;  %vm1119_vm2 = vcmp.gt.f32.partialorder %v1103_v59, 0.0 }
 0x107   : > { %v1135_v0 = vsel %vm1119_vm2, %v1103_v59, %v1127_v8 }
 0x108   : > { %v1075_v61 = vpop.f32.mrf.mxu2  ;;  %v1020_v5 = vpop.f32.mrf.mxu0 }
 0x109   : > { %v1104_v62 = vpop.f32.mrf.mxu3  ;;  %v1076_v63 = vadd.f32 %v1075_v61, %v1047_v60  ;;  %v1049_v6 = vpop.f32.mrf.mxu1  ;;  %v1021_v11 = vadd.f32 %v1020_v5, %v2048_v2 }
 0x10b   : > { %v1105_v56 = vadd.f32 %v1104_v62, %v1076_v63  ;;  %v1050_v22 = vadd.f32 %v1049_v6, %v1021_v11 }
 0x10d   : > { %vm1120_vm3 = vcmp.gt.f32.partialorder %v1105_v56, 0.0  ;;  %v1128_v10 = vmul.f32 0.2, %v1105_v56 }
 0x10f   : > { %v1136_v15 = vsel %vm1120_vm3, %v1105_v56, %v1128_v10 }
 0x110   : > { %v1714_v18 = vpack.c.bf16 %v1136_v15, %v1135_v0  ;;  %v1078_v19 = vpop.f32.mrf.mxu2  ;;  %v1022_v23 = vpop.f32.mrf.mxu0 }
 0x111   : > { %v1107_v20 = vpop.f32.mrf.mxu3  ;;  %v1051_v1 = vpop.f32.mrf.mxu1  ;;  %v1079_v24 = vadd.f32 %v1078_v19, %v1050_v22  ;;  %v1023_v25 = vadd.f32 %v1022_v23, %v994_v21 }
 0x112   : > { %1726 = vst [vmem:[%s2071_s28 + $0x8] sm:$0xff] %v1714_v18  }
 0x113   : > { %v1108_v26 = vadd.f32 %v1107_v20, %v1079_v24  ;;  %v1052_v27 = vadd.f32 %v1051_v1, %v1023_v25 }
 0x115   : > { %v1129_v33 = vmul.f32 0.2, %v1108_v26  ;;  %vm1121_vm4 = vcmp.gt.f32.partialorder %v1108_v26, 0.0 }
 0x117   : > { %v1137_v32 = vsel %vm1121_vm4, %v1108_v26, %v1129_v33 }
 0x118   : > { %v1080_v28 = vpop.f32.mrf.mxu2  ;;  %v1025_v30 = vpop.f32.mrf.mxu0 }
 0x119   : > { %v1109_v2 = vpop.f32.mrf.mxu3  ;;  %v1081_v29 = vadd.f32 %v1080_v28, %v1052_v27  ;;  %v1054_v34 = vpop.f32.mrf.mxu1  ;;  %v1026_v37 = vadd.f32 %v1025_v30, %v2059_v14 }
 0x11b   : > { %v1110_v4 = vadd.f32 %v1109_v2, %v1081_v29  ;;  %v1055_v42 = vadd.f32 %v1054_v34, %v1026_v37 }
 0x11d   : > { %vm1122_vm5 = vcmp.gt.f32.partialorder %v1110_v4, 0.0  ;;  %v1130_v36 = vmul.f32 0.2, %v1110_v4 }
 0x11f   : > { %v1138_v12 = vsel %vm1122_vm5, %v1110_v4, %v1130_v36 }
 0x120   : > { %v1719_v38 = vpack.c.bf16 %v1138_v12, %v1137_v32  ;;  %v1083_v39 = vpop.f32.mrf.mxu2  ;;  %v1027_v13 = vpop.f32.mrf.mxu0 }
 0x121   : > { %v1112_v40 = vpop.f32.mrf.mxu3  ;;  %v1084_v43 = vadd.f32 %v1083_v39, %v1055_v42  ;;  %v1028_v44 = vadd.f32 %v1027_v13, %v999_v41  ;;  %v1056_v45 = vpop.f32.mrf.mxu1 }
 0x122   : > { %1727 = vst [vmem:[%s2071_s28 + $0x10] sm:$0xff] %v1719_v38  }
 0x123   : > { %v1113_v46 = vadd.f32 %v1112_v40, %v1084_v43  ;;  %v1057_v16 = vadd.f32 %v1056_v45, %v1028_v44 }
 0x125   : > { %v1131_v14 = vmul.f32 0.2, %v1113_v46  ;;  %vm1123_vm6 = vcmp.gt.f32.partialorder %v1113_v46, 0.0 }
 0x127   : > { %v1139_v52 = vsel %vm1123_vm6, %v1113_v46, %v1131_v14 }
 0x128   : > { %v1085_v47 = vpop.f32.mrf.mxu2 }
 0x129   : > { %v1086_v48 = vadd.f32 %v1085_v47, %v1057_v16  ;;  %v1114_v49 = vpop.f32.mrf.mxu3 }
 0x12b   : > { %v1115_v50 = vadd.f32 %v1114_v49, %v1086_v48 }
 0x12d   : > { %vm1124_vm7 = vcmp.gt.f32.partialorder %v1115_v50, 0.0  ;;  %v1132_v51 = vmul.f32 0.2, %v1115_v50 }
 0x12f   : > { %v1140_v53 = vsel %vm1124_vm7, %v1115_v50, %v1132_v51 }
 0x130   : > { %v1724_v17 = vpack.c.bf16 %v1140_v53, %v1139_v52 }
 0x132   : > { %1728 = vst [vmem:[%s2071_s28 + $0x18] sm:$0xff] %v1724_v17  }
 0x133 PF: > { %s13_s12 = sadd.s32 1, %s1744_s12  }
 0x134   : > { %p10_p4 = scmp.ge.s32.totalorder %s13_s12, 4  }
 0x136   :  { %12 = sbr.rel (!%p10_p4) target bundleno = 1 (0x1), region = 62 }

// kernel: discriminator_forward.5
= control target key start
LH: loop header
LB: loop body
LE: loop exit
PB: predicated region body
PF: predicated region fallthrough
CT: control target
= control target key end

     0   :  { %vm2407_vm4 = vcmask 261120   ;;  %vm2451_vm9 = vcmask 1041408   ;;  %vm2483_vm14 = vcmask 1024   ;;  %s5946_s1 = inlined_call_operand.vmem [shape: bf16[2048,256], index: 1, kind: input, shape index: {}]   ;;  %s5947_s0 = inlined_call_operand.vmem [shape: bf16[32,2048], index: 0, kind: input, shape index: {}]   ;;  %s5948_s2 = inlined_call_operand.vmem [shape: f32[1,256], index: 2, kind: input, shape index: {}]   ;;  %s5949_s3 = inlined_call_operand.vmem [shape: f32[32,256], index: 3, kind: input, shape index: {}]   ;;  %s5950_s4 = inlined_call_operand.vmem [shape: f32[2,32], index: 4, kind: input, shape index: {}]   ;;  %s5951_s5 = inlined_call_operand.<no memory space> [shape: f32[1,1], index: 5, kind: input, shape index: {}]   ;;  %s5952_s6 = inlined_call_operand.vmem [shape: f32[2,1], index: 6, kind: output, shape index: {}]  }
   0x1   :  { %v2675_v0 = vld [vmem:[%s5946_s1 + $0x70] sm:$0xf]  ;;  %v3690_v1 = vld [vmem:[%s5946_s1 + $0x74] sm:$0xf0]  ;;  %v2667_v11 = vld [vmem:[%s5946_s1 + $0x60] sm:$0xf] }
   0x2   :  { %v2739_v2 = vld [vmem:[%s5946_s1 + $0xf0] sm:$0xf]  ;;  %v2676_v3 = vor.u32 %v3690_v1, %v2675_v0  ;;  %v3706_v4 = vld [vmem:[%s5946_s1 + $0xf4] sm:$0xf0]  ;;  %v3688_v13 = vld [vmem:[%s5946_s1 + $0x64] sm:$0xf0] }
   0x3   :  { %v2803_v5 = vld [vmem:[%s5946_s1 + $0x170] sm:$0xf]  ;;  %v3722_v6 = vld [vmem:[%s5946_s1 + $0x174] sm:$0xf0]  ;;  %v2740_v7 = vor.u32 %v3706_v4, %v2739_v2  ;;  %v2731_v14 = vld [vmem:[%s5946_s1 + $0xe0] sm:$0xf]  ;;  %v2668_v16 = vor.u32 %v3688_v13, %v2667_v11 }
   0x4   :  { %v2804_v8 = vor.u32 %v3722_v6, %v2803_v5  ;;  %v2867_v9 = vld [vmem:[%s5946_s1 + $0x1f0] sm:$0xf]  ;;  %v3738_v10 = vld [vmem:[%s5946_s1 + $0x1f4] sm:$0xf0]  ;;  %1758 = vmatpush.bf16.msra.mxu0 %v2676_v3  ;;  %v3704_v15 = vld [vmem:[%s5946_s1 + $0xe4] sm:$0xf0] }
   0x5   :  { %v2868_v12 = vor.u32 %v3738_v10, %v2867_v9  ;;  %1777 = vmatpush.bf16.msra.mxu1 %v2740_v7  ;;  %v2732_v17 = vor.u32 %v3704_v15, %v2731_v14  ;;  %v2795_v18 = vld [vmem:[%s5946_s1 + $0x160] sm:$0xf]  ;;  %v3720_v19 = vld [vmem:[%s5946_s1 + $0x164] sm:$0xf0]  ;;  %v2659_v23 = vld [vmem:[%s5946_s1 + $0x50] sm:$0xf] }
   0x6   :  { %1796 = vmatpush.bf16.msra.mxu2 %v2804_v8  ;;  %v2859_v20 = vld [vmem:[%s5946_s1 + $0x1e0] sm:$0xf]  ;;  %v2796_v21 = vor.u32 %v3720_v19, %v2795_v18  ;;  %v3736_v22 = vld [vmem:[%s5946_s1 + $0x1e4] sm:$0xf0]  ;;  %v3686_v24 = vld [vmem:[%s5946_s1 + $0x54] sm:$0xf0] }
   0x7   :  { %1815 = vmatpush.bf16.msra.mxu3 %v2868_v12  ;;  %v2860_v25 = vor.u32 %v3736_v22, %v2859_v20  ;;  %v2723_v26 = vld [vmem:[%s5946_s1 + $0xd0] sm:$0xf]  ;;  %v3702_v27 = vld [vmem:[%s5946_s1 + $0xd4] sm:$0xf0]  ;;  %v2660_v29 = vor.u32 %v3686_v24, %v2659_v23  ;;  %v2651_v35 = vld [vmem:[%s5946_s1 + $0x40] sm:$0xf] }
   0x8   :  { %v2787_v28 = vld [vmem:[%s5946_s1 + $0x150] sm:$0xf]  ;;  %1759 = vmatpush.bf16.msra.mxu0 %v2668_v16  ;;  %v3718_v30 = vld [vmem:[%s5946_s1 + $0x154] sm:$0xf0]  ;;  %v2724_v33 = vor.u32 %v3702_v27, %v2723_v26  ;;  %v3684_v36 = vld [vmem:[%s5946_s1 + $0x44] sm:$0xf0] }
   0x9   :  { %v2851_v31 = vld [vmem:[%s5946_s1 + $0x1d0] sm:$0xf]  ;;  %v3734_v32 = vld [vmem:[%s5946_s1 + $0x1d4] sm:$0xf0]  ;;  %1778 = vmatpush.bf16.msra.mxu1 %v2732_v17  ;;  %v2788_v34 = vor.u32 %v3718_v30, %v2787_v28  ;;  %v2715_v37 = vld [vmem:[%s5946_s1 + $0xc0] sm:$0xf]  ;;  %v2652_v44 = vor.u32 %v3684_v36, %v2651_v35 }
   0xa   :  { %1797 = vmatpush.bf16.msra.mxu2 %v2796_v21  ;;  %v2852_v38 = vor.u32 %v3734_v32, %v2851_v31  ;;  %v3700_v39 = vld [vmem:[%s5946_s1 + $0xc4] sm:$0xf0]  ;;  %v2779_v40 = vld [vmem:[%s5946_s1 + $0x140] sm:$0xf]  ;;  %v2643_v47 = vld [vmem:[%s5946_s1 + $0x30] sm:$0xf] }
   0xb   :  { %1816 = vmatpush.bf16.msra.mxu3 %v2860_v25  ;;  %v3716_v41 = vld [vmem:[%s5946_s1 + $0x144] sm:$0xf0]  ;;  %v2843_v42 = vld [vmem:[%s5946_s1 + $0x1c0] sm:$0xf]  ;;  %v2716_v45 = vor.u32 %v3700_v39, %v2715_v37  ;;  %v3682_v48 = vld [vmem:[%s5946_s1 + $0x34] sm:$0xf0] }
   0xc   :  { %v3732_v43 = vld [vmem:[%s5946_s1 + $0x1c4] sm:$0xf0]  ;;  %1760 = vmatpush.bf16.msra.mxu0 %v2660_v29  ;;  %v2780_v46 = vor.u32 %v3716_v41, %v2779_v40  ;;  %v2707_v49 = vld [vmem:[%s5946_s1 + $0xb0] sm:$0xf]  ;;  %v3698_v51 = vld [vmem:[%s5946_s1 + $0xb4] sm:$0xf0]  ;;  %v2644_v56 = vor.u32 %v3682_v48, %v2643_v47 }
   0xd   :  { %1779 = vmatpush.bf16.msra.mxu1 %v2724_v33  ;;  %v2844_v50 = vor.u32 %v3732_v43, %v2843_v42  ;;  %v2771_v52 = vld [vmem:[%s5946_s1 + $0x130] sm:$0xf]  ;;  %v3714_v53 = vld [vmem:[%s5946_s1 + $0x134] sm:$0xf0]  ;;  %v2708_v57 = vor.u32 %v3698_v51, %v2707_v49  ;;  %v2635_v59 = vld [vmem:[%s5946_s1 + $0x20] sm:$0xf] }
   0xe   :  { %1798 = vmatpush.bf16.msra.mxu2 %v2788_v34  ;;  %v2835_v54 = vld [vmem:[%s5946_s1 + $0x1b0] sm:$0xf]  ;;  %v3730_v55 = vld [vmem:[%s5946_s1 + $0x1b4] sm:$0xf0]  ;;  %v2772_v58 = vor.u32 %v3714_v53, %v2771_v52  ;;  %v3680_v60 = vld [vmem:[%s5946_s1 + $0x24] sm:$0xf0] }
   0xf   :  { %1817 = vmatpush.bf16.msra.mxu3 %v2852_v38  ;;  %v2699_v61 = vld [vmem:[%s5946_s1 + $0xa0] sm:$0xf]  ;;  %v2836_v62 = vor.u32 %v3730_v55, %v2835_v54  ;;  %v3696_v63 = vld [vmem:[%s5946_s1 + $0xa4] sm:$0xf0]  ;;  %v2636_v4 = vor.u32 %v3680_v60, %v2635_v59  ;;  %v2627_v7 = vld [vmem:[%s5946_s1 + $0x10] sm:$0xf] }
  0x10   :  { %1761 = vmatpush.bf16.msra.mxu0 %v2652_v44  ;;  %v2763_v0 = vld [vmem:[%s5946_s1 + $0x120] sm:$0xf]  ;;  %v3712_v1 = vld [vmem:[%s5946_s1 + $0x124] sm:$0xf0]  ;;  %v2700_v5 = vor.u32 %v3696_v63, %v2699_v61  ;;  %v3678_v8 = vld [vmem:[%s5946_s1 + $0x14] sm:$0xf0] }
  0x11   :  { %1780 = vmatpush.bf16.msra.mxu1 %v2716_v45  ;;  %v2827_v2 = vld [vmem:[%s5946_s1 + $0x1a0] sm:$0xf]  ;;  %v3728_v3 = vld [vmem:[%s5946_s1 + $0x1a4] sm:$0xf0]  ;;  %v2764_v6 = vor.u32 %v3712_v1, %v2763_v0  ;;  %v2691_v9 = vld [vmem:[%s5946_s1 + $0x90] sm:$0xf]  ;;  %v2628_v17 = vor.u32 %v3678_v8, %v2627_v7 }
  0x12   :  { %1799 = vmatpush.bf16.msra.mxu2 %v2780_v46  ;;  %v2828_v10 = vor.u32 %v3728_v3, %v2827_v2  ;;  %v3694_v11 = vld [vmem:[%s5946_s1 + $0x94] sm:$0xf0]  ;;  %v2755_v12 = vld [vmem:[%s5946_s1 + $0x110] sm:$0xf]  ;;  %v2619_v16 = vld [vmem:[%s5946_s1] sm:$0xf] }
  0x13   :  { %1818 = vmatpush.bf16.msra.mxu3 %v2844_v50  ;;  %v3710_v13 = vld [vmem:[%s5946_s1 + $0x114] sm:$0xf0]  ;;  %v2819_v14 = vld [vmem:[%s5946_s1 + $0x190] sm:$0xf]  ;;  %v3676_v18 = vld [vmem:[%s5946_s1 + $0x4] sm:$0xf0]  ;;  %v2692_v21 = vor.u32 %v3694_v11, %v2691_v9 }
  0x14   :  { %1762 = vmatpush.bf16.msra.mxu0 %v2644_v56  ;;  %v3726_v15 = vld [vmem:[%s5946_s1 + $0x194] sm:$0xf0]  ;;  %v2683_v19 = vld [vmem:[%s5946_s1 + $0x80] sm:$0xf]  ;;  %v3692_v20 = vld [vmem:[%s5946_s1 + $0x84] sm:$0xf0]  ;;  %v2756_v22 = vor.u32 %v3710_v13, %v2755_v12  ;;  %v2620_v34 = vor.u32 %v3676_v18, %v2619_v16 }
  0x15   :  { %1781 = vmatpush.bf16.msra.mxu1 %v2708_v57  ;;  %v2747_v23 = vld [vmem:[%s5946_s1 + $0x100] sm:$0xf]  ;;  %v3708_v24 = vld [vmem:[%s5946_s1 + $0x104] sm:$0xf0]  ;;  %v2820_v26 = vor.u32 %v3726_v15, %v2819_v14  ;;  %v3643_v30 = vld [vmem:[%s5947_s0 + $0x4] sm:$0xf]  ;;  %v2684_v38 = vor.u32 %v3692_v20, %v2683_v19 }
  0x16   :  { %1800 = vmatpush.bf16.msra.mxu2 %v2772_v58  ;;  %v2811_v25 = vld [vmem:[%s5946_s1 + $0x180] sm:$0xf]  ;;  %v3724_v27 = vld [vmem:[%s5946_s1 + $0x184] sm:$0xf0]  ;;  %v2493_v31 = vld [vmem:[%s5947_s0 + $0x40] sm:$0xf0]  ;;  %v2748_v39 = vor.u32 %v3708_v24, %v2747_v23 }
  0x17   :  { %1819 = vmatpush.bf16.msra.mxu3 %v2836_v62  ;;  %v2491_v28 = vld [vmem:[%s5947_s0] sm:$0xf]  ;;  %v2931_v32 = vld [vmem:[%s5946_s1 + $0x270] sm:$0xf]  ;;  %v3754_v33 = vld [vmem:[%s5946_s1 + $0x274] sm:$0xf0]  ;;  %v2812_v43 = vor.u32 %v3724_v27, %v2811_v25  ;;  %v4219_v53 = vor.u32 %v3643_v30, %v2493_v31 }
  0x18   :  { %1763 = vmatpush.bf16.msra.mxu0 %v2636_v4  ;;  %v3651_v29 = vld [vmem:[%s5947_s0 + $0x3c] sm:$0xf0]  ;;  %v2499_v35 = vld [vmem:[%s5947_s0 + $0x8] sm:$0xf]  ;;  %v2995_v36 = vld [vmem:[%s5946_s1 + $0x2f0] sm:$0xf]  ;;  %v2932_v44 = vor.u32 %v3754_v33, %v2931_v32 }
  0x19   :  { %1782 = vmatpush.bf16.msra.mxu1 %v2700_v5  ;;  %v3770_v37 = vld [vmem:[%s5946_s1 + $0x2f4] sm:$0xf0]  ;;  %v3652_v40 = vld [vmem:[%s5947_s0 + $0x44] sm:$0xf0]  ;;  %v3644_v41 = vld [vmem:[%s5947_s0 + $0xc] sm:$0xf]  ;;  %v4208_v48 = vor.u32 %v3651_v29, %v2491_v28 }
  0x1a   :  { %1801 = vmatpush.bf16.msra.mxu2 %v2764_v6  ;;  %v2501_v42 = vld [vmem:[%s5947_s0 + $0x48] sm:$0xf0]  ;;  %v3059_v45 = vld [vmem:[%s5946_s1 + $0x370] sm:$0xf]  ;;  %v3786_v46 = vld [vmem:[%s5946_s1 + $0x374] sm:$0xf0]  ;;  %v2996_v49 = vor.u32 %v3770_v37, %v2995_v36  ;;  %v4221_v54 = vor.u32 %v3652_v40, %v2499_v35 }
  0x1b   :  { %1820 = vmatpush.bf16.msra.mxu3 %v2828_v10  ;;  %v3123_v47 = vld [vmem:[%s5946_s1 + $0x3f0] sm:$0xf]  ;;  %v3802_v50 = vld [vmem:[%s5946_s1 + $0x3f4] sm:$0xf0]  ;;  %v2923_v51 = vld [vmem:[%s5946_s1 + $0x260] sm:$0xf]  ;;  %v4229_v57 = vor.u32 %v3644_v41, %v2501_v42  ;;  %v3060_v58 = vor.u32 %v3786_v46, %v3059_v45 }
  0x1c   :  { %1764 = vmatpush.bf16.msra.mxu0 %v2628_v17  ;;  %v3752_v52 = vld [vmem:[%s5946_s1 + $0x264] sm:$0xf0]  ;;  %v2987_v55 = vld [vmem:[%s5946_s1 + $0x2e0] sm:$0xf]  ;;  %v3124_v59 = vor.u32 %v3802_v50, %v3123_v47  ;;  %v2915_v2 = vld [vmem:[%s5946_s1 + $0x250] sm:$0xf] }
  0x1d   :  { %1783 = vmatpush.bf16.msra.mxu1 %v2692_v21  ;;  %v3768_v56 = vld [vmem:[%s5946_s1 + $0x2e4] sm:$0xf0]  ;;  %v2924_v60 = vor.u32 %v3752_v52, %v2923_v51  ;;  %v3051_v61 = vld [vmem:[%s5946_s1 + $0x360] sm:$0xf]  ;;  %v3750_v3 = vld [vmem:[%s5946_s1 + $0x254] sm:$0xf0] }
  0x1e   :  { %1802 = vmatpush.bf16.msra.mxu2 %v2756_v22  ;;  %v3784_v62 = vld [vmem:[%s5946_s1 + $0x364] sm:$0xf0]  ;;  %v3115_v63 = vld [vmem:[%s5946_s1 + $0x3e0] sm:$0xf]  ;;  %v2988_v0 = vor.u32 %v3768_v56, %v2987_v55  ;;  %v2979_v4 = vld [vmem:[%s5946_s1 + $0x2d0] sm:$0xf]  ;;  %v2916_v8 = vor.u32 %v3750_v3, %v2915_v2 }
  0x1f   :  { %1821 = vmatpush.bf16.msra.mxu3 %v2820_v26  ;;  %v3800_v1 = vld [vmem:[%s5946_s1 + $0x3e4] sm:$0xf0]  ;;  %v3766_v5 = vld [vmem:[%s5946_s1 + $0x2d4] sm:$0xf0]  ;;  %v3052_v6 = vor.u32 %v3784_v62, %v3051_v61  ;;  %v3043_v9 = vld [vmem:[%s5946_s1 + $0x350] sm:$0xf] }
  0x20   :  { %1765 = vmatpush.bf16.msra.mxu0 %v2620_v34  ;;  %v3116_v7 = vor.u32 %v3800_v1, %v3115_v63  ;;  %v3782_v10 = vld [vmem:[%s5946_s1 + $0x354] sm:$0xf0]  ;;  %v3107_v11 = vld [vmem:[%s5946_s1 + $0x3d0] sm:$0xf]  ;;  %v2980_v12 = vor.u32 %v3766_v5, %v2979_v4  ;;  %v2907_v14 = vld [vmem:[%s5946_s1 + $0x240] sm:$0xf] }
  0x21   :  { %1784 = vmatpush.bf16.msra.mxu1 %v2684_v38  ;;  %v3798_v13 = vld [vmem:[%s5946_s1 + $0x3d4] sm:$0xf0]  ;;  %v3748_v15 = vld [vmem:[%s5946_s1 + $0x244] sm:$0xf0]  ;;  %v2971_v16 = vld [vmem:[%s5946_s1 + $0x2c0] sm:$0xf]  ;;  %v3044_v18 = vor.u32 %v3782_v10, %v3043_v9 }
  0x22   :  { %1803 = vmatpush.bf16.msra.mxu2 %v2748_v39  ;;  %v3764_v17 = vld [vmem:[%s5946_s1 + $0x2c4] sm:$0xf0]  ;;  %v3035_v19 = vld [vmem:[%s5946_s1 + $0x340] sm:$0xf]  ;;  %v3108_v22 = vor.u32 %v3798_v13, %v3107_v11  ;;  %v2908_v23 = vor.u32 %v3748_v15, %v2907_v14  ;;  %v3659_v28 = vld [vmem:[%s5947_s0 + $0x84] sm:$0xf] }
  0x23   :  { %1822 = vmatpush.bf16.msra.mxu3 %v2812_v43  ;;  %1766 = vmatmul.bf16.vlgmr.msra.gmra.mxu0 %v4208_v48  ;;  %v3780_v20 = vld [vmem:[%s5946_s1 + $0x344] sm:$0xf0]  ;;  %v3099_v21 = vld [vmem:[%s5946_s1 + $0x3c0] sm:$0xf]  ;;  %v2972_v27 = vor.u32 %v3764_v17, %v2971_v16  ;;  %v2557_v29 = vld [vmem:[%s5947_s0 + $0xc0] sm:$0xf0] }
  0x24   :  { %1834 = vmatpush.bf16.msrb.mxu0 %v2932_v44  ;;  %1785 = vmatmul.bf16.vlgmr.msra.gmra.mxu1 %v4219_v53  ;;  %v3796_v24 = vld [vmem:[%s5946_s1 + $0x3c4] sm:$0xf0]  ;;  %v2555_v25 = vld [vmem:[%s5947_s0 + $0x80] sm:$0xf]  ;;  %v2899_v30 = vld [vmem:[%s5946_s1 + $0x230] sm:$0xf]  ;;  %v3036_v35 = vor.u32 %v3780_v20, %v3035_v19  ;;  %v4351_v50 = vor.u32 %v3659_v28, %v2557_v29 }
  0x25   :  { %1853 = vmatpush.bf16.msrb.mxu1 %v2996_v49  ;;  %1804 = vmatmul.bf16.vlgmr.msra.gmra.mxu2 %v4221_v54  ;;  %v3667_v26 = vld [vmem:[%s5947_s0 + $0xbc] sm:$0xf0]  ;;  %v3746_v31 = vld [vmem:[%s5946_s1 + $0x234] sm:$0xf0]  ;;  %v2563_v32 = vld [vmem:[%s5947_s0 + $0x88] sm:$0xf]  ;;  %v3100_v39 = vor.u32 %v3796_v24, %v3099_v21 }
  0x26   :  { %1823 = vmatmul.bf16.vlgmr.msra.gmra.mxu3 %v4229_v57  ;;  %1872 = vmatpush.bf16.msrb.mxu2 %v3060_v58  ;;  %v2963_v33 = vld [vmem:[%s5946_s1 + $0x2b0] sm:$0xf]  ;;  %v3762_v34 = vld [vmem:[%s5946_s1 + $0x2b4] sm:$0xf0]  ;;  %v3668_v36 = vld [vmem:[%s5947_s0 + $0xc4] sm:$0xf0]  ;;  %v2900_v40 = vor.u32 %v3746_v31, %v2899_v30  ;;  %v4340_v44 = vor.u32 %v3667_v26, %v2555_v25 }
  0x27   :  { %1891 = vmatpush.bf16.msrb.mxu3 %v3124_v59  ;;  %v3660_v37 = vld [vmem:[%s5947_s0 + $0x8c] sm:$0xf]  ;;  %v3027_v41 = vld [vmem:[%s5946_s1 + $0x330] sm:$0xf]  ;;  %v3778_v42 = vld [vmem:[%s5946_s1 + $0x334] sm:$0xf0]  ;;  %v2964_v45 = vor.u32 %v3762_v34, %v2963_v33  ;;  %v4353_v51 = vor.u32 %v3668_v36, %v2563_v32 }
  0x28   :  { %1835 = vmatpush.bf16.msrb.mxu0 %v2924_v60  ;;  %v2565_v38 = vld [vmem:[%s5947_s0 + $0xc8] sm:$0xf0]  ;;  %v3091_v43 = vld [vmem:[%s5946_s1 + $0x3b0] sm:$0xf]  ;;  %v3794_v46 = vld [vmem:[%s5946_s1 + $0x3b4] sm:$0xf0]  ;;  %v3028_v58 = vor.u32 %v3778_v42, %v3027_v41 }
  0x29   :  { %1854 = vmatpush.bf16.msrb.mxu1 %v2988_v0  ;;  %v2891_v47 = vld [vmem:[%s5946_s1 + $0x220] sm:$0xf]  ;;  %v3744_v49 = vld [vmem:[%s5946_s1 + $0x224] sm:$0xf0]  ;;  %v4361_v56 = vor.u32 %v3660_v37, %v2565_v38  ;;  %v3092_v59 = vor.u32 %v3794_v46, %v3091_v43  ;;  %v2883_v2 = vld [vmem:[%s5946_s1 + $0x210] sm:$0xf] }
  0x2a   :  { %1873 = vmatpush.bf16.msrb.mxu2 %v3052_v6  ;;  %v2955_v52 = vld [vmem:[%s5946_s1 + $0x2a0] sm:$0xf]  ;;  %v3760_v55 = vld [vmem:[%s5946_s1 + $0x2a4] sm:$0xf0]  ;;  %v2892_v60 = vor.u32 %v3744_v49, %v2891_v47  ;;  %v3742_v3 = vld [vmem:[%s5946_s1 + $0x214] sm:$0xf0] }
  0x2b   :  { %1892 = vmatpush.bf16.msrb.mxu3 %v3116_v7  ;;  %v3019_v61 = vld [vmem:[%s5946_s1 + $0x320] sm:$0xf]  ;;  %v3776_v62 = vld [vmem:[%s5946_s1 + $0x324] sm:$0xf0]  ;;  %v2956_v0 = vor.u32 %v3760_v55, %v2955_v52  ;;  %v2947_v4 = vld [vmem:[%s5946_s1 + $0x290] sm:$0xf]  ;;  %v2884_v10 = vor.u32 %v3742_v3, %v2883_v2 }
  0x2c   :  { %1836 = vmatpush.bf16.msrb.mxu0 %v2916_v8  ;;  %v3083_v63 = vld [vmem:[%s5946_s1 + $0x3a0] sm:$0xf]  ;;  %v3792_v1 = vld [vmem:[%s5946_s1 + $0x3a4] sm:$0xf0]  ;;  %v3758_v5 = vld [vmem:[%s5946_s1 + $0x294] sm:$0xf0]  ;;  %v3020_v6 = vor.u32 %v3776_v62, %v3019_v61 }
  0x2d   :  { %1855 = vmatpush.bf16.msrb.mxu1 %v2980_v12  ;;  %v3011_v7 = vld [vmem:[%s5946_s1 + $0x310] sm:$0xf]  ;;  %v3774_v8 = vld [vmem:[%s5946_s1 + $0x314] sm:$0xf0]  ;;  %v3084_v9 = vor.u32 %v3792_v1, %v3083_v63  ;;  %v2875_v13 = vld [vmem:[%s5946_s1 + $0x200] sm:$0xf]  ;;  %v2948_v14 = vor.u32 %v3758_v5, %v2947_v4 }
  0x2e   :  { %1874 = vmatpush.bf16.msrb.mxu2 %v3044_v18  ;;  %v3075_v11 = vld [vmem:[%s5946_s1 + $0x390] sm:$0xf]  ;;  %v3790_v12 = vld [vmem:[%s5946_s1 + $0x394] sm:$0xf0]  ;;  %v3740_v15 = vld [vmem:[%s5946_s1 + $0x204] sm:$0xf0] }
  0x2f   :  { %1893 = vmatpush.bf16.msrb.mxu3 %v3108_v22  ;;  %v2939_v16 = vld [vmem:[%s5946_s1 + $0x280] sm:$0xf]  ;;  %v3756_v17 = vld [vmem:[%s5946_s1 + $0x284] sm:$0xf0]  ;;  %v3187_v20 = vld [vmem:[%s5946_s1 + $0x470] sm:$0xf]  ;;  %v3012_v22 = vor.u32 %v3774_v8, %v3011_v7  ;;  %v3076_v26 = vor.u32 %v3790_v12, %v3075_v11 }
  0x30   :  { %1837 = vmatpush.bf16.msrb.mxu0 %v2908_v23  ;;  %v3003_v18 = vld [vmem:[%s5946_s1 + $0x300] sm:$0xf]  ;;  %v3772_v19 = vld [vmem:[%s5946_s1 + $0x304] sm:$0xf0]  ;;  %v3818_v21 = vld [vmem:[%s5946_s1 + $0x474] sm:$0xf0]  ;;  %v2940_v31 = vor.u32 %v3756_v17, %v2939_v16 }
  0x31   :  { %1856 = vmatpush.bf16.msrb.mxu1 %v2972_v27  ;;  %v3067_v23 = vld [vmem:[%s5946_s1 + $0x380] sm:$0xf]  ;;  %v3251_v24 = vld [vmem:[%s5946_s1 + $0x4f0] sm:$0xf]  ;;  %v3834_v25 = vld [vmem:[%s5946_s1 + $0x4f4] sm:$0xf0]  ;;  %v2876_v27 = vor.u32 %v3740_v15, %v2875_v13  ;;  %v3188_v34 = vor.u32 %v3818_v21, %v3187_v20  ;;  %v3004_v41 = vor.u32 %v3772_v19, %v3003_v18 }
  0x32   :  { %1875 = vmatpush.bf16.msrb.mxu2 %v3036_v35  ;;  %v3788_v28 = vld [vmem:[%s5946_s1 + $0x384] sm:$0xf0]  ;;  %v2507_v29 = vld [vmem:[%s5947_s0 + $0x10] sm:$0xf]  ;;  %v3645_v32 = vld [vmem:[%s5947_s0 + $0x14] sm:$0xf]  ;;  %v3252_v38 = vor.u32 %v3834_v25, %v3251_v24 }
  0x33   :  { %1894 = vmatpush.bf16.msrb.mxu3 %v3100_v39  ;;  %1771 = vmatmul.bf16.gmra.mxu0 %v4340_v44  ;;  %v3653_v30 = vld [vmem:[%s5947_s0 + $0x4c] sm:$0xf0]  ;;  %v2509_v33 = vld [vmem:[%s5947_s0 + $0x50] sm:$0xf0]  ;;  %v3850_v36 = vld [vmem:[%s5946_s1 + $0x574] sm:$0xf0]  ;;  %v3068_v46 = vor.u32 %v3788_v28, %v3067_v23 }
  0x34   :  { %1838 = vmatpush.bf16.msrb.mxu0 %v2900_v40  ;;  %1790 = vmatmul.bf16.gmra.mxu1 %v4351_v50  ;;  %v3315_v35 = vld [vmem:[%s5946_s1 + $0x570] sm:$0xf]  ;;  %v2515_v37 = vld [vmem:[%s5947_s0 + $0x18] sm:$0xf]  ;;  %v3646_v43 = vld [vmem:[%s5947_s0 + $0x1c] sm:$0xf]  ;;  %v4495_v63 = vor.u32 %v3645_v32, %v2509_v33 }
  0x35   :  { %1857 = vmatpush.bf16.msrb.mxu1 %v2964_v45  ;;  %1809 = vmatmul.bf16.gmra.mxu2 %v4353_v51  ;;  %v3379_v39 = vld [vmem:[%s5946_s1 + $0x5f0] sm:$0xf]  ;;  %v3866_v40 = vld [vmem:[%s5946_s1 + $0x5f4] sm:$0xf0]  ;;  %v2517_v45 = vld [vmem:[%s5947_s0 + $0x58] sm:$0xf0]  ;;  %v3316_v47 = vor.u32 %v3850_v36, %v3315_v35 }
  0x36   :  { %1828 = vmatmul.bf16.gmra.mxu3 %v4361_v56  ;;  %1876 = vmatpush.bf16.msrb.mxu2 %v3028_v58  ;;  %v3654_v42 = vld [vmem:[%s5947_s0 + $0x54] sm:$0xf0]  ;;  %v3179_v49 = vld [vmem:[%s5946_s1 + $0x460] sm:$0xf]  ;;  %v3816_v52 = vld [vmem:[%s5946_s1 + $0x464] sm:$0xf0]  ;;  %v4484_v58 = vor.u32 %v3653_v30, %v2507_v29  ;;  %v4505_v3 = vor.u32 %v3646_v43, %v2517_v45 }
  0x37   :  { %1895 = vmatpush.bf16.msrb.mxu3 %v3092_v59  ;;  %v3243_v55 = vld [vmem:[%s5946_s1 + $0x4e0] sm:$0xf]  ;;  %v3380_v59 = vor.u32 %v3866_v40, %v3379_v39  ;;  %v3848_v62 = vld [vmem:[%s5946_s1 + $0x564] sm:$0xf0]  ;;  %v3180_v4 = vor.u32 %v3816_v52, %v3179_v49  ;;  %v3171_v7 = vld [vmem:[%s5946_s1 + $0x450] sm:$0xf] }
  0x38   :  { %1839 = vmatpush.bf16.msrb.mxu0 %v2892_v60  ;;  %v3832_v60 = vld [vmem:[%s5946_s1 + $0x4e4] sm:$0xf0]  ;;  %v3307_v61 = vld [vmem:[%s5946_s1 + $0x560] sm:$0xf]  ;;  %v3814_v8 = vld [vmem:[%s5946_s1 + $0x454] sm:$0xf0] }
  0x39   :  { %1858 = vmatpush.bf16.msrb.mxu1 %v2956_v0  ;;  %v4497_v0 = vor.u32 %v3654_v42, %v2515_v37  ;;  %v3371_v1 = vld [vmem:[%s5946_s1 + $0x5e0] sm:$0xf]  ;;  %v3864_v2 = vld [vmem:[%s5946_s1 + $0x5e4] sm:$0xf0]  ;;  %v3244_v5 = vor.u32 %v3832_v60, %v3243_v55  ;;  %v3830_v11 = vld [vmem:[%s5946_s1 + $0x4d4] sm:$0xf0]  ;;  %v3172_v16 = vor.u32 %v3814_v8, %v3171_v7 }
  0x3a   :  { %1877 = vmatpush.bf16.msrb.mxu2 %v3020_v6  ;;  %v3308_v6 = vor.u32 %v3848_v62, %v3307_v61  ;;  %v3299_v12 = vld [vmem:[%s5946_s1 + $0x550] sm:$0xf]  ;;  %v3846_v13 = vld [vmem:[%s5946_s1 + $0x554] sm:$0xf0]  ;;  %v3163_v19 = vld [vmem:[%s5946_s1 + $0x440] sm:$0xf] }
  0x3b   :  { %1896 = vmatpush.bf16.msrb.mxu3 %v3084_v9  ;;  %v3235_v9 = vld [vmem:[%s5946_s1 + $0x4d0] sm:$0xf]  ;;  %v3862_v15 = vld [vmem:[%s5946_s1 + $0x5d4] sm:$0xf0]  ;;  %v3300_v18 = vor.u32 %v3846_v13, %v3299_v12  ;;  %v3812_v20 = vld [vmem:[%s5946_s1 + $0x444] sm:$0xf0] }
  0x3c   :  { %1840 = vmatpush.bf16.msrb.mxu0 %v2884_v10  ;;  %v3372_v10 = vor.u32 %v3864_v2, %v3371_v1  ;;  %v3236_v17 = vor.u32 %v3830_v11, %v3235_v9  ;;  %v3227_v21 = vld [vmem:[%s5946_s1 + $0x4c0] sm:$0xf]  ;;  %v3828_v23 = vld [vmem:[%s5946_s1 + $0x4c4] sm:$0xf0]  ;;  %v3164_v28 = vor.u32 %v3812_v20, %v3163_v19  ;;  %v3669_v32 = vld [vmem:[%s5947_s0 + $0xcc] sm:$0xf0] }
  0x3d   :  { %1859 = vmatpush.bf16.msrb.mxu1 %v2948_v14  ;;  %v3363_v14 = vld [vmem:[%s5946_s1 + $0x5d0] sm:$0xf]  ;;  %v3291_v24 = vld [vmem:[%s5946_s1 + $0x540] sm:$0xf]  ;;  %v3844_v25 = vld [vmem:[%s5946_s1 + $0x544] sm:$0xf0]  ;;  %v3228_v29 = vor.u32 %v3828_v23, %v3227_v21 }
  0x3e   :  { %1878 = vmatpush.bf16.msrb.mxu2 %v3012_v22  ;;  %v3364_v22 = vor.u32 %v3862_v15, %v3363_v14  ;;  %v3292_v30 = vor.u32 %v3844_v25, %v3291_v24  ;;  %v3155_v33 = vld [vmem:[%s5946_s1 + $0x430] sm:$0xf]  ;;  %v3661_v37 = vld [vmem:[%s5947_s0 + $0x94] sm:$0xf]  ;;  %v3826_v39 = vld [vmem:[%s5946_s1 + $0x4b4] sm:$0xf0] }
  0x3f   :  { %1897 = vmatpush.bf16.msrb.mxu3 %v3076_v26  ;;  %v3355_v26 = vld [vmem:[%s5946_s1 + $0x5c0] sm:$0xf]  ;;  %v3219_v35 = vld [vmem:[%s5946_s1 + $0x4b0] sm:$0xf]  ;;  %v2579_v42 = vld [vmem:[%s5947_s0 + $0x98] sm:$0xf] }
  0x40   :  { %1841 = vmatpush.bf16.msrb.mxu0 %v2876_v27  ;;  %v3860_v27 = vld [vmem:[%s5946_s1 + $0x5c4] sm:$0xf0]  ;;  %v3283_v40 = vld [vmem:[%s5946_s1 + $0x530] sm:$0xf]  ;;  %v3858_v45 = vld [vmem:[%s5946_s1 + $0x5b4] sm:$0xf0]  ;;  %v3220_v55 = vor.u32 %v3826_v39, %v3219_v35 }
  0x41   :  { %1860 = vmatpush.bf16.msrb.mxu1 %v2940_v31  ;;  %v2571_v31 = vld [vmem:[%s5947_s0 + $0x90] sm:$0xf]  ;;  %v3356_v36 = vor.u32 %v3860_v27, %v3355_v26  ;;  %v2581_v49 = vld [vmem:[%s5947_s0 + $0xd8] sm:$0xf0]  ;;  %v3147_v60 = vld [vmem:[%s5946_s1 + $0x420] sm:$0xf] }
  0x42   :  { %1879 = vmatpush.bf16.msrb.mxu2 %v3004_v41  ;;  %v3842_v41 = vld [vmem:[%s5946_s1 + $0x534] sm:$0xf0]  ;;  %v3347_v43 = vld [vmem:[%s5946_s1 + $0x5b0] sm:$0xf]  ;;  %v3808_v61 = vld [vmem:[%s5946_s1 + $0x424] sm:$0xf0]  ;;  %v4616_v1 = vor.u32 %v3669_v32, %v2571_v31 }
  0x43   :  { %1898 = vmatpush.bf16.msrb.mxu3 %v3068_v46  ;;  %1842 = vmatmul.bf16.vlgmr.msrb.gmra.mxu0 %v4484_v58  ;;  %v3670_v46 = vld [vmem:[%s5947_s0 + $0xd4] sm:$0xf0]  ;;  %v3211_v62 = vld [vmem:[%s5946_s1 + $0x4a0] sm:$0xf]  ;;  %v3348_v2 = vor.u32 %v3858_v45, %v3347_v43  ;;  %v3148_v12 = vor.u32 %v3808_v61, %v3147_v60  ;;  %v3139_v15 = vld [vmem:[%s5946_s1 + $0x410] sm:$0xf] }
  0x44   :  { %1910 = vmatpush.bf16.msra.mxu0 %v3188_v34  ;;  %1861 = vmatmul.bf16.vlgmr.msrb.gmra.mxu1 %v4495_v63  ;;  %v3810_v34 = vld [vmem:[%s5946_s1 + $0x434] sm:$0xf0]  ;;  %v4629_v8 = vor.u32 %v3670_v46, %v2579_v42  ;;  %v3339_v9 = vld [vmem:[%s5946_s1 + $0x5a0] sm:$0xf]  ;;  %v3267_v20 = vld [vmem:[%s5946_s1 + $0x510] sm:$0xf] }
  0x45   :  { %1929 = vmatpush.bf16.msra.mxu1 %v3252_v38  ;;  %1880 = vmatmul.bf16.vlgmr.msrb.gmra.mxu2 %v4497_v0  ;;  %v2573_v38 = vld [vmem:[%s5947_s0 + $0xd0] sm:$0xf0]  ;;  %v3156_v52 = vor.u32 %v3810_v34, %v3155_v33  ;;  %v3822_v19 = vld [vmem:[%s5946_s1 + $0x494] sm:$0xf0]  ;;  %v3131_v25 = vld [vmem:[%s5946_s1 + $0x400] sm:$0xf] }
  0x46   :  { %1948 = vmatpush.bf16.msra.mxu2 %v3316_v47  ;;  %1899 = vmatmul.bf16.vlgmr.msrb.gmra.mxu3 %v4505_v3  ;;  %v3662_v47 = vld [vmem:[%s5947_s0 + $0x9c] sm:$0xf]  ;;  %v4627_v7 = vor.u32 %v3661_v37, %v2573_v38  ;;  %v3838_v21 = vld [vmem:[%s5946_s1 + $0x514] sm:$0xf0]  ;;  %v3804_v26 = vld [vmem:[%s5946_s1 + $0x404] sm:$0xf0] }
  0x47   :  { %1967 = vmatpush.bf16.msra.mxu3 %v3380_v59  ;;  %v3284_v59 = vor.u32 %v3842_v41, %v3283_v40  ;;  %v4637_v11 = vor.u32 %v3662_v47, %v2581_v49  ;;  %v3854_v23 = vld [vmem:[%s5946_s1 + $0x594] sm:$0xf0]  ;;  %v3259_v31 = vld [vmem:[%s5946_s1 + $0x500] sm:$0xf]  ;;  %v3836_v33 = vld [vmem:[%s5946_s1 + $0x504] sm:$0xf0]  ;;  %v3132_v39 = vor.u32 %v3804_v26, %v3131_v25 }
  0x48   :  { %1911 = vmatpush.bf16.msra.mxu0 %v3180_v4  ;;  %v3824_v4 = vld [vmem:[%s5946_s1 + $0x4a4] sm:$0xf0]  ;;  %v3323_v34 = vld [vmem:[%s5946_s1 + $0x580] sm:$0xf]  ;;  %v3882_v37 = vld [vmem:[%s5946_s1 + $0x674] sm:$0xf0]  ;;  %v3260_v45 = vor.u32 %v3836_v33, %v3259_v31 }
  0x49   :  { %1930 = vmatpush.bf16.msra.mxu1 %v3244_v5  ;;  %v3275_v5 = vld [vmem:[%s5946_s1 + $0x520] sm:$0xf]  ;;  %v3212_v13 = vor.u32 %v3824_v4, %v3211_v62  ;;  %v3852_v35 = vld [vmem:[%s5946_s1 + $0x584] sm:$0xf0]  ;;  %v3507_v38 = vld [vmem:[%s5946_s1 + $0x6f0] sm:$0xf] }
  0x4a   :  { %1949 = vmatpush.bf16.msra.mxu2 %v3308_v6  ;;  %v3840_v6 = vld [vmem:[%s5946_s1 + $0x524] sm:$0xf0]  ;;  %v3898_v40 = vld [vmem:[%s5946_s1 + $0x6f4] sm:$0xf0]  ;;  %v3571_v41 = vld [vmem:[%s5946_s1 + $0x770] sm:$0xf]  ;;  %v3324_v49 = vor.u32 %v3852_v35, %v3323_v34 }
  0x4b   :  { %1968 = vmatpush.bf16.msra.mxu3 %v3372_v10  ;;  %v3856_v10 = vld [vmem:[%s5946_s1 + $0x5a4] sm:$0xf0]  ;;  %v3276_v14 = vor.u32 %v3840_v6, %v3275_v5  ;;  %v3914_v42 = vld [vmem:[%s5946_s1 + $0x774] sm:$0xf0]  ;;  %v3635_v46 = vld [vmem:[%s5946_s1 + $0x7f0] sm:$0xf] }
  0x4c   :  { %1912 = vmatpush.bf16.msra.mxu0 %v3172_v16  ;;  %v3806_v16 = vld [vmem:[%s5946_s1 + $0x414] sm:$0xf0]  ;;  %v3647_v60 = vld [vmem:[%s5947_s0 + $0x24] sm:$0xf]  ;;  %v2531_v62 = vld [vmem:[%s5947_s0 + $0x28] sm:$0xf]  ;;  %v3572_v4 = vor.u32 %v3914_v42, %v3571_v41 }
  0x4d   :  { %1931 = vmatpush.bf16.msra.mxu1 %v3236_v17  ;;  %v3203_v17 = vld [vmem:[%s5946_s1 + $0x490] sm:$0xf]  ;;  %v3140_v24 = vor.u32 %v3806_v16, %v3139_v15  ;;  %v3930_v47 = vld [vmem:[%s5946_s1 + $0x7f4] sm:$0xf0]  ;;  %v2525_v61 = vld [vmem:[%s5947_s0 + $0x60] sm:$0xf0] }
  0x4e   :  { %1950 = vmatpush.bf16.msra.mxu2 %v3300_v18  ;;  %v3340_v18 = vor.u32 %v3856_v10, %v3339_v9  ;;  %v3204_v27 = vor.u32 %v3822_v19, %v3203_v17  ;;  %v3656_v5 = vld [vmem:[%s5947_s0 + $0x64] sm:$0xf0]  ;;  %v3648_v6 = vld [vmem:[%s5947_s0 + $0x2c] sm:$0xf]  ;;  %v3636_v10 = vor.u32 %v3930_v47, %v3635_v46  ;;  %v3563_v17 = vld [vmem:[%s5946_s1 + $0x760] sm:$0xf]  ;;  %v4759_v19 = vor.u32 %v3647_v60, %v2525_v61 }
  0x4f   :  { %1969 = vmatpush.bf16.msra.mxu3 %v3364_v22  ;;  %v3331_v22 = vld [vmem:[%s5946_s1 + $0x590] sm:$0xf]  ;;  %v2533_v9 = vld [vmem:[%s5947_s0 + $0x68] sm:$0xf0]  ;;  %v3896_v16 = vld [vmem:[%s5946_s1 + $0x6e4] sm:$0xf0] }
  0x50   :  { %1913 = vmatpush.bf16.msra.mxu0 %v3164_v28  ;;  %v3268_v28 = vor.u32 %v3838_v21, %v3267_v20  ;;  %v3332_v32 = vor.u32 %v3854_v23, %v3331_v22  ;;  %v4761_v20 = vor.u32 %v3656_v5, %v2531_v62  ;;  %v3627_v21 = vld [vmem:[%s5946_s1 + $0x7e0] sm:$0xf]  ;;  %v3928_v22 = vld [vmem:[%s5946_s1 + $0x7e4] sm:$0xf0]  ;;  %v4769_v23 = vor.u32 %v3648_v6, %v2533_v9  ;;  %v3894_v31 = vld [vmem:[%s5946_s1 + $0x6d4] sm:$0xf0] }
  0x51   :  { %1932 = vmatpush.bf16.msra.mxu1 %v3228_v29  ;;  %v3195_v29 = vld [vmem:[%s5946_s1 + $0x480] sm:$0xf]  ;;  %v3910_v33 = vld [vmem:[%s5946_s1 + $0x754] sm:$0xf0]  ;;  %v3619_v34 = vld [vmem:[%s5946_s1 + $0x7d0] sm:$0xf] }
  0x52   :  { %1951 = vmatpush.bf16.msra.mxu2 %v3292_v30  ;;  %v3820_v30 = vld [vmem:[%s5946_s1 + $0x484] sm:$0xf0]  ;;  %v3926_v35 = vld [vmem:[%s5946_s1 + $0x7d4] sm:$0xf0]  ;;  %v3483_v41 = vld [vmem:[%s5946_s1 + $0x6c0] sm:$0xf] }
  0x53   :  { %1970 = vmatpush.bf16.msra.mxu3 %v3356_v36  ;;  %1847 = vmatmul.bf16.gmra.mxu0 %v4616_v1  ;;  %v3443_v36 = vld [vmem:[%s5946_s1 + $0x670] sm:$0xf]  ;;  %v3196_v43 = vor.u32 %v3820_v30, %v3195_v29  ;;  %v3628_v30 = vor.u32 %v3928_v22, %v3627_v21  ;;  %v3620_v42 = vor.u32 %v3926_v35, %v3619_v34  ;;  %v3908_v46 = vld [vmem:[%s5946_s1 + $0x744] sm:$0xf0]  ;;  %v3611_v47 = vld [vmem:[%s5946_s1 + $0x7c0] sm:$0xf] }
  0x54   :  { %1914 = vmatpush.bf16.msra.mxu0 %v3156_v52  ;;  %1866 = vmatmul.bf16.gmra.mxu1 %v4627_v7  ;;  %v2523_v52 = vld [vmem:[%s5947_s0 + $0x20] sm:$0xf]  ;;  %v3491_v29 = vld [vmem:[%s5946_s1 + $0x6d0] sm:$0xf]  ;;  %v3663_v6 = vld [vmem:[%s5947_s0 + $0xa4] sm:$0xf] }
  0x55   :  { %1933 = vmatpush.bf16.msra.mxu1 %v3220_v55  ;;  %1885 = vmatmul.bf16.gmra.mxu2 %v4629_v8  ;;  %v3655_v55 = vld [vmem:[%s5947_s0 + $0x5c] sm:$0xf0]  ;;  %v3411_v62 = vld [vmem:[%s5946_s1 + $0x630] sm:$0xf]  ;;  %v2589_v9 = vld [vmem:[%s5947_s0 + $0xe0] sm:$0xf0] }
  0x56   :  { %1952 = vmatpush.bf16.msra.mxu2 %v3284_v59  ;;  %1904 = vmatmul.bf16.gmra.mxu3 %v4637_v11  ;;  %v3444_v59 = vor.u32 %v3882_v37, %v3443_v36  ;;  %v4748_v15 = vor.u32 %v3655_v55, %v2523_v52  ;;  %v3492_v37 = vor.u32 %v3894_v31, %v3491_v29  ;;  %v2587_v60 = vld [vmem:[%s5947_s0 + $0xa0] sm:$0xf]  ;;  %v3664_v21 = vld [vmem:[%s5947_s0 + $0xac] sm:$0xf]  ;;  %v3904_v34 = vld [vmem:[%s5946_s1 + $0x724] sm:$0xf0] }
  0x57   :  { %1971 = vmatpush.bf16.msra.mxu3 %v3348_v2  ;;  %v3508_v2 = vor.u32 %v3898_v40, %v3507_v38  ;;  %v3876_v40 = vld [vmem:[%s5946_s1 + $0x644] sm:$0xf0]  ;;  %v3671_v61 = vld [vmem:[%s5947_s0 + $0xdc] sm:$0xf0]  ;;  %v2597_v22 = vld [vmem:[%s5947_s0 + $0xe8] sm:$0xf0]  ;;  %v4891_v35 = vor.u32 %v3663_v6, %v2589_v9 }
  0x58   :  { %1915 = vmatpush.bf16.msra.mxu0 %v3148_v12  ;;  %v3435_v12 = vld [vmem:[%s5946_s1 + $0x660] sm:$0xf]  ;;  %v3884_v9 = vld [vmem:[%s5946_s1 + $0x684] sm:$0xf0] }
  0x59   :  { %1934 = vmatpush.bf16.msra.mxu1 %v3212_v13  ;;  %v3880_v13 = vld [vmem:[%s5946_s1 + $0x664] sm:$0xf0]  ;;  %v3467_v29 = vld [vmem:[%s5946_s1 + $0x6a0] sm:$0xf] }
  0x5a   :  { %1953 = vmatpush.bf16.msra.mxu2 %v3276_v14  ;;  %v3499_v14 = vld [vmem:[%s5946_s1 + $0x6e0] sm:$0xf] }
  0x5b   :  { %1972 = vmatpush.bf16.msra.mxu3 %v3340_v18  ;;  %v3912_v18 = vld [vmem:[%s5946_s1 + $0x764] sm:$0xf0]  ;;  %v3500_v25 = vor.u32 %v3896_v16, %v3499_v14  ;;  %v3603_v16 = vld [vmem:[%s5946_s1 + $0x7b0] sm:$0xf]  ;;  %v3451_v6 = vld [vmem:[%s5946_s1 + $0x680] sm:$0xf] }
  0x5c   :  { %1916 = vmatpush.bf16.msra.mxu0 %v3140_v24  ;;  %v3436_v24 = vor.u32 %v3880_v13, %v3435_v12  ;;  %v3564_v26 = vor.u32 %v3912_v18, %v3563_v17  ;;  %v3539_v12 = vld [vmem:[%s5946_s1 + $0x730] sm:$0xf]  ;;  %v3906_v13 = vld [vmem:[%s5946_s1 + $0x734] sm:$0xf0]  ;;  %v2595_v14 = vld [vmem:[%s5947_s0 + $0xa8] sm:$0xf] }
  0x5d   :  { %1935 = vmatpush.bf16.msra.mxu1 %v3204_v27  ;;  %v3427_v27 = vld [vmem:[%s5946_s1 + $0x650] sm:$0xf]  ;;  %v3922_v17 = vld [vmem:[%s5946_s1 + $0x7b4] sm:$0xf0]  ;;  %v3672_v18 = vld [vmem:[%s5947_s0 + $0xe4] sm:$0xf0] }
  0x5e   :  { %1954 = vmatpush.bf16.msra.mxu2 %v3268_v28  ;;  %v3878_v28 = vld [vmem:[%s5946_s1 + $0x654] sm:$0xf0]  ;;  %v3604_v31 = vor.u32 %v3922_v17, %v3603_v16  ;;  %v3916_v16 = vld [vmem:[%s5946_s1 + $0x784] sm:$0xf0]  ;;  %v3689_v17 = vld [vmem:[%s5946_s1 + $0x74] sm:$0xf] }
  0x5f   :  { %1973 = vmatpush.bf16.msra.mxu3 %v3332_v32  ;;  %v3555_v32 = vld [vmem:[%s5946_s1 + $0x750] sm:$0xf]  ;;  %v3428_v36 = vor.u32 %v3878_v28, %v3427_v27  ;;  %v3403_v27 = vld [vmem:[%s5946_s1 + $0x620] sm:$0xf]  ;;  %v3872_v28 = vld [vmem:[%s5946_s1 + $0x624] sm:$0xf0] }
  0x60   :  { %1917 = vmatpush.bf16.msra.mxu0 %v3132_v39  ;;  %v3556_v38 = vor.u32 %v3910_v33, %v3555_v32  ;;  %v3419_v39 = vld [vmem:[%s5946_s1 + $0x640] sm:$0xf]  ;;  %v3888_v32 = vld [vmem:[%s5946_s1 + $0x6a4] sm:$0xf0] }
  0x61   :  { %1936 = vmatpush.bf16.msra.mxu1 %v3196_v43  ;;  %v3892_v43 = vld [vmem:[%s5946_s1 + $0x6c4] sm:$0xf0]  ;;  %v3420_v52 = vor.u32 %v3876_v40, %v3419_v39  ;;  %v3531_v33 = vld [vmem:[%s5946_s1 + $0x720] sm:$0xf]  ;;  %v4901_v39 = vor.u32 %v3664_v21, %v2597_v22  ;;  %v3404_v40 = vor.u32 %v3872_v28, %v3403_v27  ;;  %v3705_v21 = vld [vmem:[%s5946_s1 + $0xf4] sm:$0xf]  ;;  %v3452_v27 = vor.u32 %v3884_v9, %v3451_v6 }
  0x62   :  { %1955 = vmatpush.bf16.msra.mxu2 %v3260_v45  ;;  %v3547_v45 = vld [vmem:[%s5946_s1 + $0x740] sm:$0xf]  ;;  %v3484_v55 = vor.u32 %v3892_v43, %v3483_v41  ;;  %v3468_v41 = vor.u32 %v3888_v32, %v3467_v29  ;;  %v3395_v43 = vld [vmem:[%s5946_s1 + $0x610] sm:$0xf]  ;;  %v3737_v29 = vld [vmem:[%s5946_s1 + $0x1f4] sm:$0xf] }
  0x63   :  { %1974 = vmatpush.bf16.msra.mxu3 %v3324_v49  ;;  %1918 = vmatmul.bf16.vlgmr.msra.gmra.mxu0 %v4748_v15  ;;  %v3924_v49 = vld [vmem:[%s5946_s1 + $0x7c4] sm:$0xf0]  ;;  %v3735_v6 = vld [vmem:[%s5946_s1 + $0x1e4] sm:$0xf]  ;;  %v2861_v9 = vld [vmem:[%s5946_s1 + $0x1e8] sm:$0xf0] }
  0x64   :  { %1986 = vmatpush.bf16.msrb.mxu0 %v3444_v59  ;;  %1937 = vmatmul.bf16.vlgmr.msra.gmra.mxu1 %v4759_v19  ;;  %v3548_v59 = vor.u32 %v3908_v46, %v3547_v45  ;;  %v3612_v5 = vor.u32 %v3924_v49, %v3611_v47  ;;  %v3870_v45 = vld [vmem:[%s5946_s1 + $0x614] sm:$0xf0]  ;;  %v3459_v46 = vld [vmem:[%s5946_s1 + $0x690] sm:$0xf] }
  0x65   :  { %2005 = vmatpush.bf16.msrb.mxu1 %v3508_v2  ;;  %1956 = vmatmul.bf16.vlgmr.msra.gmra.mxu2 %v4761_v20  ;;  %v3874_v2 = vld [vmem:[%s5946_s1 + $0x634] sm:$0xf0] }
  0x66   :  { %2024 = vmatpush.bf16.msrb.mxu2 %v3572_v4  ;;  %1975 = vmatmul.bf16.vlgmr.msra.gmra.mxu3 %v4769_v23  ;;  %v3475_v4 = vld [vmem:[%s5946_s1 + $0x6b0] sm:$0xf]  ;;  %v3886_v49 = vld [vmem:[%s5946_s1 + $0x694] sm:$0xf0] }
  0x67   :  { %2043 = vmatpush.bf16.msrb.mxu3 %v3636_v10  ;;  %v3890_v10 = vld [vmem:[%s5946_s1 + $0x6b4] sm:$0xf0] }
  0x68   :  { %1987 = vmatpush.bf16.msrb.mxu0 %v3436_v24  ;;  %v3412_v24 = vor.u32 %v3874_v2, %v3411_v62  ;;  %v3387_v62 = vld [vmem:[%s5946_s1 + $0x600] sm:$0xf]  ;;  %v3868_v2 = vld [vmem:[%s5946_s1 + $0x604] sm:$0xf0] }
  0x69   :  { %2006 = vmatpush.bf16.msrb.mxu1 %v3500_v25  ;;  %v3476_v25 = vor.u32 %v3890_v10, %v3475_v4  ;;  %v3460_v4 = vor.u32 %v3886_v49, %v3459_v46  ;;  %v3515_v10 = vld [vmem:[%s5946_s1 + $0x700] sm:$0xf]  ;;  %v3388_v22 = vor.u32 %v3868_v2, %v3387_v62  ;;  %v3650_v46 = vld [vmem:[%s5947_s0 + $0x3c] sm:$0xf]  ;;  %v3719_v62 = vld [vmem:[%s5946_s1 + $0x164] sm:$0xf] }
  0x6a   :  { %2025 = vmatpush.bf16.msrb.mxu2 %v3564_v26  ;;  %v3540_v26 = vor.u32 %v3906_v13, %v3539_v12  ;;  %v3900_v13 = vld [vmem:[%s5946_s1 + $0x704] sm:$0xf0]  ;;  %v2797_v2 = vld [vmem:[%s5946_s1 + $0x168] sm:$0xf0] }
  0x6b   :  { %2044 = vmatpush.bf16.msrb.mxu3 %v3628_v30  ;;  %v4880_v30 = vor.u32 %v3671_v61, %v2587_v60  ;;  %v3918_v60 = vld [vmem:[%s5946_s1 + $0x794] sm:$0xf0]  ;;  %v3396_v61 = vor.u32 %v3870_v45, %v3395_v43  ;;  %v3516_v28 = vor.u32 %v3900_v13, %v3515_v10 }
  0x6c   :  { %1988 = vmatpush.bf16.msrb.mxu0 %v3428_v36  ;;  %v4893_v36 = vor.u32 %v3672_v18, %v2595_v14  ;;  %v3579_v14 = vld [vmem:[%s5946_s1 + $0x780] sm:$0xf]  ;;  %v2677_v18 = vld [vmem:[%s5946_s1 + $0x78] sm:$0xf0]  ;;  %v3658_v45 = vld [vmem:[%s5947_s0 + $0x74] sm:$0xf0] }
  0x6d   :  { %2007 = vmatpush.bf16.msrb.mxu1 %v3492_v37  ;;  %v3595_v37 = vld [vmem:[%s5946_s1 + $0x7a0] sm:$0xf]  ;;  %v3580_v32 = vor.u32 %v3916_v16, %v3579_v14  ;;  %v2800_v14 = vor.u32 %v3719_v62, %v2797_v2  ;;  %v3685_v16 = vld [vmem:[%s5946_s1 + $0x54] sm:$0xf] }
  0x6e   :  { %2026 = vmatpush.bf16.msrb.mxu2 %v3556_v38  ;;  %v3920_v38 = vld [vmem:[%s5946_s1 + $0x7a4] sm:$0xf0]  ;;  %v3665_v2 = vld [vmem:[%s5947_s0 + $0xb4] sm:$0xf] }
  0x6f   :  { %2045 = vmatpush.bf16.msrb.mxu3 %v3620_v42  ;;  %v3532_v42 = vor.u32 %v3904_v34, %v3531_v33  ;;  %v3596_v47 = vor.u32 %v3920_v38, %v3595_v37  ;;  %v2539_v33 = vld [vmem:[%s5947_s0 + $0x30] sm:$0xf]  ;;  %v2680_v37 = vor.u32 %v3689_v17, %v2677_v18  ;;  %v3649_v38 = vld [vmem:[%s5947_s0 + $0x34] sm:$0xf]  ;;  %v2661_v17 = vld [vmem:[%s5946_s1 + $0x58] sm:$0xf0] }
  0x70   :  { %1989 = vmatpush.bf16.msrb.mxu0 %v3420_v52  ;;  %v3523_v52 = vld [vmem:[%s5946_s1 + $0x710] sm:$0xf]  ;;  %v3701_v18 = vld [vmem:[%s5946_s1 + $0xd4] sm:$0xf] }
  0x71   :  { %2008 = vmatpush.bf16.msrb.mxu1 %v3484_v55  ;;  %v3902_v55 = vld [vmem:[%s5946_s1 + $0x714] sm:$0xf0]  ;;  %v3657_v34 = vld [vmem:[%s5947_s0 + $0x6c] sm:$0xf0] }
  0x72   :  { %2027 = vmatpush.bf16.msrb.mxu2 %v3548_v59  ;;  %v3587_v59 = vld [vmem:[%s5946_s1 + $0x790] sm:$0xf] }
  0x73   :  { %2046 = vmatpush.bf16.msrb.mxu3 %v3612_v5  ;;  %1923 = vmatmul.bf16.gmra.mxu0 %v4880_v30  ;;  %v3524_v5 = vor.u32 %v3902_v55, %v3523_v52  ;;  %v3588_v12 = vor.u32 %v3918_v60, %v3587_v59  ;;  %v3687_v52 = vld [vmem:[%s5946_s1 + $0x64] sm:$0xf]  ;;  %v2669_v55 = vld [vmem:[%s5946_s1 + $0x68] sm:$0xf0]  ;;  %v5012_v60 = vor.u32 %v3657_v34, %v2539_v33 }
  0x74   :  { %1990 = vmatpush.bf16.msrb.mxu0 %v3412_v24  ;;  %1942 = vmatmul.bf16.gmra.mxu1 %v4891_v35  ;;  %v2741_v24 = vld [vmem:[%s5946_s1 + $0xf8] sm:$0xf0]  ;;  %v3703_v59 = vld [vmem:[%s5946_s1 + $0xe4] sm:$0xf]  ;;  %v2653_v33 = vld [vmem:[%s5946_s1 + $0x48] sm:$0xf0] }
  0x75   :  { %2009 = vmatpush.bf16.msrb.mxu1 %v3476_v25  ;;  %1961 = vmatmul.bf16.gmra.mxu2 %v4893_v36  ;;  %v3721_v25 = vld [vmem:[%s5946_s1 + $0x174] sm:$0xf]  ;;  %v3699_v34 = vld [vmem:[%s5946_s1 + $0xc4] sm:$0xf] }
  0x76   :  { %2028 = vmatpush.bf16.msrb.mxu2 %v3540_v26  ;;  %1980 = vmatmul.bf16.gmra.mxu3 %v4901_v39  ;;  %v2805_v26 = vld [vmem:[%s5946_s1 + $0x178] sm:$0xf0] }
  0x77   :  { %2047 = vmatpush.bf16.msrb.mxu3 %v3604_v31  ;;  %v2869_v31 = vld [vmem:[%s5946_s1 + $0x1f8] sm:$0xf0]  ;;  %v2808_v43 = vor.u32 %v3721_v25, %v2805_v26  ;;  %v3733_v26 = vld [vmem:[%s5946_s1 + $0x1d4] sm:$0xf] }
  0x78   :  { %1991 = vmatpush.bf16.msrb.mxu0 %v3404_v40  ;;  %v2541_v40 = vld [vmem:[%s5947_s0 + $0x70] sm:$0xf0]  ;;  %v2872_v49 = vor.u32 %v3737_v29, %v2869_v31  ;;  %v2789_v25 = vld [vmem:[%s5946_s1 + $0x158] sm:$0xf0] }
  0x79   :  { %2010 = vmatpush.bf16.msrb.mxu1 %v3468_v41  ;;  %v2547_v41 = vld [vmem:[%s5947_s0 + $0x38] sm:$0xf] }
  0x7a   :  { %2029 = vmatpush.bf16.msrb.mxu2 %v3532_v42  ;;  %v2744_v42 = vor.u32 %v3705_v21, %v2741_v24  ;;  %v2864_v21 = vor.u32 %v3735_v6, %v2861_v9  ;;  %v3717_v24 = vld [vmem:[%s5946_s1 + $0x154] sm:$0xf]  ;;  %v2709_v9 = vld [vmem:[%s5946_s1 + $0xb8] sm:$0xf0] }
  0x7b   :  { %2048 = vmatpush.bf16.msrb.mxu3 %v3596_v47  ;;  %v2549_v47 = vld [vmem:[%s5947_s0 + $0x78] sm:$0xf0]  ;;  %v2792_v31 = vor.u32 %v3717_v24, %v2789_v25  ;;  %v2605_v6 = vld [vmem:[%s5947_s0 + $0xf0] sm:$0xf0] }
  0x7c   :  { %1992 = vmatpush.bf16.msrb.mxu0 %v3396_v61  ;;  %v2733_v61 = vld [vmem:[%s5946_s1 + $0xe8] sm:$0xf0]  ;;  %v5033_v10 = vor.u32 %v3650_v46, %v2549_v47 }
  0x7d   :  { %2011 = vmatpush.bf16.msrb.mxu1 %v3460_v4  ;;  %v5023_v4 = vor.u32 %v3649_v38, %v2541_v40  ;;  %v2736_v13 = vor.u32 %v3703_v59, %v2733_v61  ;;  %v2717_v38 = vld [vmem:[%s5946_s1 + $0xc8] sm:$0xf0]  ;;  %v3715_v40 = vld [vmem:[%s5946_s1 + $0x144] sm:$0xf]  ;;  %v2645_v59 = vld [vmem:[%s5946_s1 + $0x38] sm:$0xf0] }
  0x7e   :  { %2030 = vmatpush.bf16.msrb.mxu2 %v3524_v5  ;;  %v5025_v5 = vor.u32 %v3658_v45, %v2547_v41  ;;  %v2781_v41 = vld [vmem:[%s5946_s1 + $0x148] sm:$0xf0]  ;;  %v2720_v46 = vor.u32 %v3699_v34, %v2717_v38  ;;  %v3697_v61 = vld [vmem:[%s5946_s1 + $0xb4] sm:$0xf]  ;;  %v3711_v34 = vld [vmem:[%s5946_s1 + $0x124] sm:$0xf]  ;;  %v5155_v38 = vor.u32 %v3665_v2, %v2605_v6 }
  0x7f   :  { %2049 = vmatpush.bf16.msrb.mxu3 %v3588_v12  ;;  %v2672_v12 = vor.u32 %v3687_v52, %v2669_v55  ;;  %v2784_v47 = vor.u32 %v3715_v40, %v2781_v41  ;;  %v3673_v52 = vld [vmem:[%s5947_s0 + $0xec] sm:$0xf0]  ;;  %v3681_v55 = vld [vmem:[%s5946_s1 + $0x34] sm:$0xf]  ;;  %v2712_v25 = vor.u32 %v3697_v61, %v2709_v9  ;;  %v3727_v41 = vld [vmem:[%s5946_s1 + $0x1a4] sm:$0xf] }
  0x80   :  { %1993 = vmatpush.bf16.msrb.mxu0 %v3388_v22  ;;  %v2725_v22 = vld [vmem:[%s5946_s1 + $0xd8] sm:$0xf0]  ;;  %v2648_v24 = vor.u32 %v3681_v55, %v2645_v59  ;;  %v3693_v55 = vld [vmem:[%s5946_s1 + $0x94] sm:$0xf] }
  0x81   :  { %2012 = vmatpush.bf16.msrb.mxu1 %v3452_v27  ;;  %v2853_v27 = vld [vmem:[%s5946_s1 + $0x1d8] sm:$0xf0]  ;;  %v2728_v29 = vor.u32 %v3701_v18, %v2725_v22  ;;  %v3674_v18 = vld [vmem:[%s5947_s0 + $0xf4] sm:$0xf0]  ;;  %v3725_v6 = vld [vmem:[%s5946_s1 + $0x194] sm:$0xf] }
  0x82   :  { %2031 = vmatpush.bf16.msrb.mxu2 %v3516_v28  ;;  %v2664_v28 = vor.u32 %v3685_v16, %v2661_v17  ;;  %v3729_v16 = vld [vmem:[%s5946_s1 + $0x1b4] sm:$0xf]  ;;  %v2837_v17 = vld [vmem:[%s5946_s1 + $0x1b8] sm:$0xf0] }
  0x83   :  { %2050 = vmatpush.bf16.msrb.mxu3 %v3580_v32  ;;  %1994 = vmatmul.bf16.vlgmr.msrb.gmra.mxu0 %v5012_v60  ;;  %v3683_v32 = vld [vmem:[%s5946_s1 + $0x44] sm:$0xf]  ;;  %v2613_v22 = vld [vmem:[%s5947_s0 + $0xf8] sm:$0xf0] }
  0x84   :  { %2062 = vmatpush.bf16.msra.mxu0 %v2680_v37  ;;  %2013 = vmatmul.bf16.vlgmr.msrb.gmra.mxu1 %v5023_v4  ;;  %v2856_v37 = vor.u32 %v3733_v26, %v2853_v27  ;;  %v2656_v45 = vor.u32 %v3683_v32, %v2653_v33  ;;  %v3679_v27 = vld [vmem:[%s5946_s1 + $0x24] sm:$0xf]  ;;  %v2840_v32 = vor.u32 %v3729_v16, %v2837_v17  ;;  %v2701_v33 = vld [vmem:[%s5946_s1 + $0xa8] sm:$0xf0]  ;;  %v2693_v61 = vld [vmem:[%s5946_s1 + $0x98] sm:$0xf0] }
  0x85   :  { %2081 = vmatpush.bf16.msra.mxu1 %v2744_v42  ;;  %2032 = vmatmul.bf16.vlgmr.msrb.gmra.mxu2 %v5025_v5  ;;  %v3731_v42 = vld [vmem:[%s5946_s1 + $0x1c4] sm:$0xf]  ;;  %v2757_v2 = vld [vmem:[%s5946_s1 + $0x118] sm:$0xf0]  ;;  %v2696_v16 = vor.u32 %v3693_v55, %v2693_v61 }
  0x86   :  { %2100 = vmatpush.bf16.msra.mxu2 %v2808_v43  ;;  %2051 = vmatmul.bf16.vlgmr.msrb.gmra.mxu3 %v5033_v10  ;;  %v2845_v43 = vld [vmem:[%s5946_s1 + $0x1c8] sm:$0xf0]  ;;  %v2821_v9 = vld [vmem:[%s5946_s1 + $0x198] sm:$0xf0] }
  0x87   :  { %2119 = vmatpush.bf16.msra.mxu3 %v2872_v49  ;;  %v2603_v49 = vld [vmem:[%s5947_s0 + $0xb0] sm:$0xf]  ;;  %v2848_v62 = vor.u32 %v3731_v42, %v2845_v43  ;;  %v2829_v42 = vld [vmem:[%s5946_s1 + $0x1a8] sm:$0xf0] }
  0x88   :  { %2063 = vmatpush.bf16.msra.mxu0 %v2672_v12  ;;  %v3713_v12 = vld [vmem:[%s5946_s1 + $0x134] sm:$0xf]  ;;  %v2832_v59 = vor.u32 %v3727_v41, %v2829_v42  ;;  %v3061_v41 = vld [vmem:[%s5946_s1 + $0x378] sm:$0xf0]  ;;  %v312_v42 = vld [vmem:[%s5948_s2] sm:$0x3] }
  0x89   :  { %2082 = vmatpush.bf16.msra.mxu1 %v2736_v13  ;;  %v2773_v13 = vld [vmem:[%s5946_s1 + $0x138] sm:$0xf0] }
  0x8a   :  { %2101 = vmatpush.bf16.msra.mxu2 %v2800_v14  ;;  %v2611_v14 = vld [vmem:[%s5947_s0 + $0xb8] sm:$0xf]  ;;  %v2776_v26 = vor.u32 %v3713_v12, %v2773_v13  ;;  %v3675_v13 = vld [vmem:[%s5946_s1 + $0x4] sm:$0xf] }
  0x8b   :  { %2120 = vmatpush.bf16.msra.mxu3 %v2864_v21  ;;  %v3666_v21 = vld [vmem:[%s5947_s0 + $0xbc] sm:$0xf]  ;;  %v5157_v40 = vor.u32 %v3674_v18, %v2611_v14  ;;  %v2621_v14 = vld [vmem:[%s5946_s1 + $0x8] sm:$0xf0]  ;;  %v3691_v18 = vld [vmem:[%s5946_s1 + $0x84] sm:$0xf] }
  0x8c   :  { %2064 = vmatpush.bf16.msra.mxu0 %v2664_v28  ;;  %v2637_v28 = vld [vmem:[%s5946_s1 + $0x28] sm:$0xf0]  ;;  %v5165_v43 = vor.u32 %v3666_v21, %v2613_v22  ;;  %v3707_v22 = vld [vmem:[%s5946_s1 + $0x104] sm:$0xf] }
  0x8d   :  { %2083 = vmatpush.bf16.msra.mxu1 %v2728_v29  ;;  %v3695_v29 = vld [vmem:[%s5946_s1 + $0xa4] sm:$0xf]  ;;  %v2685_v21 = vld [vmem:[%s5946_s1 + $0x88] sm:$0xf0] }
  0x8e   :  { %2102 = vmatpush.bf16.msra.mxu2 %v2792_v31  ;;  %v5144_v31 = vor.u32 %v3673_v52, %v2603_v49  ;;  %v3677_v49 = vld [vmem:[%s5946_s1 + $0x14] sm:$0xf]  ;;  %v2629_v52 = vld [vmem:[%s5946_s1 + $0x18] sm:$0xf0] }
  0x8f   :  { %2121 = vmatpush.bf16.msra.mxu3 %v2856_v37  ;;  %v2765_v37 = vld [vmem:[%s5946_s1 + $0x128] sm:$0xf0]  ;;  %v2632_v12 = vor.u32 %v3677_v49, %v2629_v52  ;;  %v3125_v49 = vld [vmem:[%s5946_s1 + $0x3f8] sm:$0xf0] }
  0x90   :  { %2065 = vmatpush.bf16.msra.mxu0 %v2656_v45  ;;  %v2640_v45 = vor.u32 %v3679_v27, %v2637_v28  ;;  %v2813_v27 = vld [vmem:[%s5946_s1 + $0x188] sm:$0xf0]  ;;  %v3753_v28 = vld [vmem:[%s5946_s1 + $0x274] sm:$0xf] }
  0x91   :  { %2084 = vmatpush.bf16.msra.mxu1 %v2720_v46  ;;  %v2704_v46 = vor.u32 %v3695_v29, %v2701_v33  ;;  %v2933_v29 = vld [vmem:[%s5946_s1 + $0x278] sm:$0xf0]  ;;  %v2624_v33 = vor.u32 %v3675_v13, %v2621_v14  ;;  %v2989_v13 = vld [vmem:[%s5946_s1 + $0x2e8] sm:$0xf0]  ;;  %v3783_v14 = vld [vmem:[%s5946_s1 + $0x364] sm:$0xf] }
  0x92   :  { %2103 = vmatpush.bf16.msra.mxu2 %v2784_v47  ;;  %v2768_v47 = vor.u32 %v3711_v34, %v2765_v37  ;;  %v2997_v34 = vld [vmem:[%s5946_s1 + $0x2f8] sm:$0xf0]  ;;  %v3785_v37 = vld [vmem:[%s5946_s1 + $0x374] sm:$0xf]  ;;  %v2936_v55 = vor.u32 %v3753_v28, %v2933_v29 }
  0x93   :  { %2122 = vmatpush.bf16.msra.mxu3 %v2848_v62  ;;  %1999 = vmatmul.bf16.gmra.mxu0 %v5144_v31  ;;  %v3709_v62 = vld [vmem:[%s5946_s1 + $0x114] sm:$0xf]  ;;  %v3064_v61 = vor.u32 %v3785_v37, %v3061_v41  ;;  %v2917_v29 = vld [vmem:[%s5946_s1 + $0x258] sm:$0xf0] }
  0x94   :  { %2066 = vmatpush.bf16.msra.mxu0 %v2648_v24  ;;  %2018 = vmatmul.bf16.gmra.mxu1 %v5155_v38  ;;  %v2760_v17 = vor.u32 %v3709_v62, %v2757_v2  ;;  %v2824_v24 = vor.u32 %v3725_v6, %v2821_v9  ;;  %v5246_v62 = vperm.slane %v312_v42, 0  ;;  %v3751_v6 = vld [vmem:[%s5946_s1 + $0x264] sm:$0xf]  ;;  %v2925_v9 = vld [vmem:[%s5946_s1 + $0x268] sm:$0xf0] }
  0x95   :  { %2085 = vmatpush.bf16.msra.mxu1 %v2712_v25  ;;  %2037 = vmatmul.bf16.gmra.mxu2 %v5157_v40  ;;  %v2749_v25 = vld [vmem:[%s5946_s1 + $0x108] sm:$0xf0]  ;;  %v3749_v28 = vld [vmem:[%s5946_s1 + $0x254] sm:$0xf]  ;;  %v2981_v37 = vld [vmem:[%s5946_s1 + $0x2d8] sm:$0xf0] }
  0x96   :  { %2104 = vmatpush.bf16.msra.mxu2 %v2776_v26  ;;  %2056 = vmatmul.bf16.gmra.mxu3 %v5165_v43  ;;  %v3723_v26 = vld [vmem:[%s5946_s1 + $0x184] sm:$0xf]  ;;  %v3781_v41 = vld [vmem:[%s5946_s1 + $0x354] sm:$0xf]  ;;  %v3045_v42 = vld [vmem:[%s5946_s1 + $0x358] sm:$0xf0] }
  0x97   :  { %2123 = vmatpush.bf16.msra.mxu3 %v2840_v32  ;;  %v3769_v32 = vld [vmem:[%s5946_s1 + $0x2f4] sm:$0xf]  ;;  %v2816_v52 = vor.u32 %v3723_v26, %v2813_v27 }
  0x98   :  { %2067 = vmatpush.bf16.msra.mxu0 %v2640_v45  ;;  %v2688_v45 = vor.u32 %v3691_v18, %v2685_v21  ;;  %v3799_v18 = vld [vmem:[%s5946_s1 + $0x3e4] sm:$0xf]  ;;  %v3117_v21 = vld [vmem:[%s5946_s1 + $0x3e8] sm:$0xf0] }
  0x99   :  { %2086 = vmatpush.bf16.msra.mxu1 %v2704_v46  ;;  %v2752_v46 = vor.u32 %v3707_v22, %v2749_v25  ;;  %v2928_v25 = vor.u32 %v3751_v6, %v2925_v9 }
  0x9a   :  { %2105 = vmatpush.bf16.msra.mxu2 %v2768_v47  ;;  %v3801_v47 = vld [vmem:[%s5946_s1 + $0x3f4] sm:$0xf] }
  0x9b   :  { %2124 = vmatpush.bf16.msra.mxu3 %v2832_v59  ;;  %v3000_v59 = vor.u32 %v3769_v32, %v2997_v34  ;;  %v3128_v2 = vor.u32 %v3801_v47, %v3125_v49  ;;  %v3765_v32 = vld [vmem:[%s5946_s1 + $0x2d4] sm:$0xf]  ;;  %v3120_v34 = vor.u32 %v3799_v18, %v3117_v21  ;;  %v3048_v49 = vor.u32 %v3781_v41, %v3045_v42  ;;  %v3093_v41 = vld [vmem:[%s5946_s1 + $0x3b8] sm:$0xf0] }
  0x9c   :  { %2068 = vmatpush.bf16.msra.mxu0 %v2632_v12  ;;  %v3767_v12 = vld [vmem:[%s5946_s1 + $0x2e4] sm:$0xf]  ;;  %v2984_v47 = vor.u32 %v3765_v32, %v2981_v37  ;;  %v2965_v32 = vld [vmem:[%s5946_s1 + $0x2b8] sm:$0xf0]  ;;  %v3793_v37 = vld [vmem:[%s5946_s1 + $0x3b4] sm:$0xf] }
  0x9d   :  { %2087 = vmatpush.bf16.msra.mxu1 %v2696_v16  ;;  %v3053_v16 = vld [vmem:[%s5946_s1 + $0x368] sm:$0xf0]  ;;  %v2992_v26 = vor.u32 %v3767_v12, %v2989_v13  ;;  %v3795_v13 = vld [vmem:[%s5946_s1 + $0x3c4] sm:$0xf] }
  0x9e   :  { %2106 = vmatpush.bf16.msra.mxu2 %v2760_v17  ;;  %v3056_v27 = vor.u32 %v3783_v14, %v3053_v16  ;;  %v3101_v14 = vld [vmem:[%s5946_s1 + $0x3c8] sm:$0xf0] }
  0x9f   :  { %2125 = vmatpush.bf16.msra.mxu3 %v2824_v24 }
  0xa0   :  { %2069 = vmatpush.bf16.msra.mxu0 %v2624_v33  ;;  %v1767_v17 = vpop.f32.mrf.mxu0 }
  0xa1   :  { %2088 = vmatpush.bf16.msra.mxu1 %v2688_v45  ;;  %v1768_v22 = vadd.f32 %v1767_v17, %v5246_v62  ;;  %v1786_v24 = vpop.f32.mrf.mxu1  ;;  %v3109_v45 = vld [vmem:[%s5946_s1 + $0x3d8] sm:$0xf0] }
  0xa2   :  { %2107 = vmatpush.bf16.msra.mxu2 %v2752_v46  ;;  %v2920_v46 = vor.u32 %v3749_v28, %v2917_v29  ;;  %v3104_v29 = vor.u32 %v3795_v13, %v3101_v14 }
  0xa3   :  { %2126 = vmatpush.bf16.msra.mxu3 %v2816_v52  ;;  %v1787_v33 = vadd.f32 %v1786_v24, %v1768_v22  ;;  %2070 = vmatmul.bf16.vlgmr.msra.gmra.mxu0 %v4208_v48  ;;  %v3797_v48 = vld [vmem:[%s5946_s1 + $0x3d4] sm:$0xf]  ;;  %v3763_v52 = vld [vmem:[%s5946_s1 + $0x2c4] sm:$0xf] }
  0xa4   :  { %2138 = vmatpush.bf16.msrb.mxu0 %v2936_v55  ;;  %2089 = vmatmul.bf16.vlgmr.msra.gmra.mxu1 %v4219_v53  ;;  %v3747_v53 = vld [vmem:[%s5946_s1 + $0x244] sm:$0xf] }
  0xa5   :  { %2157 = vmatpush.bf16.msrb.mxu1 %v3000_v59  ;;  %2108 = vmatmul.bf16.vlgmr.msra.gmra.mxu2 %v4221_v54  ;;  %v2909_v54 = vld [vmem:[%s5946_s1 + $0x248] sm:$0xf0] }
  0xa6   :  { %2176 = vmatpush.bf16.msrb.mxu2 %v3064_v61  ;;  %2127 = vmatmul.bf16.vlgmr.msra.gmra.mxu3 %v4229_v57  ;;  %v3112_v57 = vor.u32 %v3797_v48, %v3109_v45  ;;  %v2973_v59 = vld [vmem:[%s5946_s1 + $0x2c8] sm:$0xf0]  ;;  %v3779_v61 = vld [vmem:[%s5946_s1 + $0x344] sm:$0xf]  ;;  %v2912_v18 = vor.u32 %v3747_v53, %v2909_v54  ;;  %v3096_v54 = vor.u32 %v3793_v37, %v3093_v41 }
  0xa7   :  { %2195 = vmatpush.bf16.msrb.mxu3 %v3128_v2  ;;  %v3037_v2 = vld [vmem:[%s5946_s1 + $0x348] sm:$0xf0]  ;;  %v2976_v22 = vor.u32 %v3763_v52, %v2973_v59  ;;  %v3739_v37 = vld [vmem:[%s5946_s1 + $0x204] sm:$0xf] }
  0xa8   :  { %2139 = vmatpush.bf16.msrb.mxu0 %v2928_v25  ;;  %v1805_v55 = vpop.f32.mrf.mxu2  ;;  %v1769_v12 = vpop.f32.mrf.mxu0  ;;  %v3040_v24 = vor.u32 %v3779_v61, %v3037_v2  ;;  %v3745_v25 = vld [vmem:[%s5946_s1 + $0x234] sm:$0xf]  ;;  %v2957_v52 = vld [vmem:[%s5946_s1 + $0x2a8] sm:$0xf0] }
  0xa9   :  { %2158 = vmatpush.bf16.msrb.mxu1 %v2992_v26  ;;  %v1806_v6 = vadd.f32 %v1805_v55, %v1787_v33  ;;  %v1824_v9 = vpop.f32.mrf.mxu3  ;;  %v1770_v16 = vadd.f32 %v1769_v12, %v5246_v62  ;;  %v1788_v17 = vpop.f32.mrf.mxu1  ;;  %v2901_v26 = vld [vmem:[%s5946_s1 + $0x238] sm:$0xf0]  ;;  %v3777_v33 = vld [vmem:[%s5946_s1 + $0x334] sm:$0xf]  ;;  %v3775_v55 = vld [vmem:[%s5946_s1 + $0x324] sm:$0xf] }
  0xaa   :  { %2177 = vmatpush.bf16.msrb.mxu2 %v3056_v27  ;;  %v3761_v27 = vld [vmem:[%s5946_s1 + $0x2b4] sm:$0xf]  ;;  %v2904_v42 = vor.u32 %v3745_v25, %v2901_v26 }
  0xab   :  { %2196 = vmatpush.bf16.msrb.mxu3 %v3120_v34  ;;  %v5326_v21 = vadd.f32 %v1824_v9, %v1806_v6  ;;  %v1789_v28 = vadd.f32 %v1788_v17, %v1770_v16  ;;  %v3029_v34 = vld [vmem:[%s5946_s1 + $0x338] sm:$0xf0]  ;;  %v2968_v48 = vor.u32 %v3761_v27, %v2965_v32  ;;  %v3791_v6 = vld [vmem:[%s5946_s1 + $0x3a4] sm:$0xf]  ;;  %v3085_v9 = vld [vmem:[%s5946_s1 + $0x3a8] sm:$0xf0] }
  0xac   :  { %2140 = vmatpush.bf16.msrb.mxu0 %v2920_v46  ;;  %v3032_v45 = vor.u32 %v3777_v33, %v3029_v34  ;;  %v3743_v46 = vld [vmem:[%s5946_s1 + $0x224] sm:$0xf]  ;;  %v3757_v25 = vld [vmem:[%s5946_s1 + $0x294] sm:$0xf]  ;;  %v3088_v27 = vor.u32 %v3791_v6, %v3085_v9  ;;  %v3013_v32 = vld [vmem:[%s5946_s1 + $0x318] sm:$0xf0] }
  0xad   :  { %2159 = vmatpush.bf16.msrb.mxu1 %v2984_v47  ;;  %v2893_v47 = vld [vmem:[%s5946_s1 + $0x228] sm:$0xf0]  ;;  %v3077_v33 = vld [vmem:[%s5946_s1 + $0x398] sm:$0xf0] }
  0xae   :  { %2178 = vmatpush.bf16.msrb.mxu2 %v3048_v49  ;;  %v3759_v49 = vld [vmem:[%s5946_s1 + $0x2a4] sm:$0xf]  ;;  %v2896_v14 = vor.u32 %v3743_v46, %v2893_v47  ;;  %v3005_v47 = vld [vmem:[%s5946_s1 + $0x308] sm:$0xf0] }
  0xaf   :  { %2197 = vmatpush.bf16.msrb.mxu3 %v3112_v57  ;;  %v3021_v57 = vld [vmem:[%s5946_s1 + $0x328] sm:$0xf0]  ;;  %v2960_v17 = vor.u32 %v3759_v49, %v2957_v52  ;;  %v3787_v49 = vld [vmem:[%s5946_s1 + $0x384] sm:$0xf] }
  0xb0   :  { %2141 = vmatpush.bf16.msrb.mxu0 %v2912_v18  ;;  %v1807_v53 = vpop.f32.mrf.mxu2  ;;  %v1772_v2 = vpop.f32.mrf.mxu0  ;;  %v3024_v18 = vor.u32 %v3775_v55, %v3021_v57  ;;  %v3817_v57 = vld [vmem:[%s5946_s1 + $0x474] sm:$0xf] }
  0xb1   :  { %2160 = vmatpush.bf16.msrb.mxu1 %v2976_v22  ;;  %v1808_v59 = vadd.f32 %v1807_v53, %v1789_v28  ;;  %v1826_v61 = vpop.f32.mrf.mxu3  ;;  %v1773_v12 = vadd.f32 %v1772_v2, %v5246_v62  ;;  %v1791_v13 = vpop.f32.mrf.mxu1  ;;  %v3741_v22 = vld [vmem:[%s5946_s1 + $0x214] sm:$0xf]  ;;  %v2949_v28 = vld [vmem:[%s5946_s1 + $0x298] sm:$0xf0]  ;;  %v3069_v53 = vld [vmem:[%s5946_s1 + $0x388] sm:$0xf0] }
  0xb2   :  { %2179 = vmatpush.bf16.msrb.mxu2 %v3040_v24  ;;  %v2885_v24 = vld [vmem:[%s5946_s1 + $0x218] sm:$0xf0] }
  0xb3   :  { %2198 = vmatpush.bf16.msrb.mxu3 %v3104_v29  ;;  %v5377_v16 = vadd.f32 %v1826_v61, %v1808_v59  ;;  %v1792_v26 = vadd.f32 %v1791_v13, %v1773_v12  ;;  %2075 = vmatmul.bf16.gmra.mxu0 %v4340_v44  ;;  %v3773_v29 = vld [vmem:[%s5946_s1 + $0x314] sm:$0xf]  ;;  %v2888_v34 = vor.u32 %v3741_v22, %v2885_v24  ;;  %v3189_v59 = vld [vmem:[%s5946_s1 + $0x478] sm:$0xf0] }
  0xb4   :  { %2142 = vmatpush.bf16.msrb.mxu0 %v2904_v42  ;;  %2094 = vmatmul.bf16.gmra.mxu1 %v4351_v50  ;;  %v3789_v44 = vld [vmem:[%s5946_s1 + $0x394] sm:$0xf]  ;;  %v2877_v50 = vld [vmem:[%s5946_s1 + $0x208] sm:$0xf0]  ;;  %v3016_v41 = vor.u32 %v3773_v29, %v3013_v32  ;;  %v3755_v42 = vld [vmem:[%s5946_s1 + $0x284] sm:$0xf] }
  0xb5   :  { %2161 = vmatpush.bf16.msrb.mxu1 %v2968_v48  ;;  %2113 = vmatmul.bf16.gmra.mxu2 %v4353_v51  ;;  %v2952_v51 = vor.u32 %v3757_v25, %v2949_v28  ;;  %v3771_v48 = vld [vmem:[%s5946_s1 + $0x304] sm:$0xf]  ;;  %v3080_v46 = vor.u32 %v3789_v44, %v3077_v33  ;;  %v3833_v61 = vld [vmem:[%s5946_s1 + $0x4f4] sm:$0xf]  ;;  %v2880_v9 = vor.u32 %v3739_v37, %v2877_v50  ;;  %v3253_v12 = vld [vmem:[%s5946_s1 + $0x4f8] sm:$0xf0] }
  0xb6   :  { %2180 = vmatpush.bf16.msrb.mxu2 %v3032_v45  ;;  %2132 = vmatmul.bf16.gmra.mxu3 %v4361_v56  ;;  %v2941_v56 = vld [vmem:[%s5946_s1 + $0x288] sm:$0xf0]  ;;  %v3849_v13 = vld [vmem:[%s5946_s1 + $0x574] sm:$0xf]  ;;  %v3381_v24 = vld [vmem:[%s5946_s1 + $0x5f8] sm:$0xf0]  ;;  %v3256_v28 = vor.u32 %v3833_v61, %v3253_v12 }
  0xb7   :  { %2199 = vmatpush.bf16.msrb.mxu3 %v3096_v54  ;;  %v3865_v22 = vld [vmem:[%s5946_s1 + $0x5f4] sm:$0xf]  ;;  %v3815_v44 = vld [vmem:[%s5946_s1 + $0x464] sm:$0xf]  ;;  %v3181_v33 = vld [vmem:[%s5946_s1 + $0x468] sm:$0xf0] }
  0xb8   :  { %2143 = vmatpush.bf16.msrb.mxu0 %v2896_v14  ;;  %v1810_v45 = vpop.f32.mrf.mxu2  ;;  %v1774_v55 = vpop.f32.mrf.mxu0  ;;  %v3317_v14 = vld [vmem:[%s5946_s1 + $0x578] sm:$0xf0]  ;;  %v3384_v32 = vor.u32 %v3865_v22, %v3381_v24  ;;  %v3245_v50 = vld [vmem:[%s5946_s1 + $0x4e8] sm:$0xf0]  ;;  %v3829_v61 = vld [vmem:[%s5946_s1 + $0x4d4] sm:$0xf] }
  0xb9   :  { %2162 = vmatpush.bf16.msrb.mxu1 %v2960_v17  ;;  %v1811_v54 = vadd.f32 %v1810_v45, %v1792_v26  ;;  %v1829_v52 = vpop.f32.mrf.mxu3  ;;  %v1775_v2 = vadd.f32 %v1774_v55, %v5246_v62  ;;  %v1793_v6 = vpop.f32.mrf.mxu1  ;;  %v2944_v62 = vor.u32 %v3755_v42, %v2941_v56  ;;  %v3072_v26 = vor.u32 %v3787_v49, %v3069_v53  ;;  %v3863_v45 = vld [vmem:[%s5946_s1 + $0x5e4] sm:$0xf]  ;;  %v3301_v12 = vld [vmem:[%s5946_s1 + $0x558] sm:$0xf0] }
  0xba   :  { %2181 = vmatpush.bf16.msrb.mxu2 %v3024_v18  ;;  %v3008_v18 = vor.u32 %v3771_v48, %v3005_v47  ;;  %v3320_v29 = vor.u32 %v3849_v13, %v3317_v14  ;;  %v3184_v53 = vor.u32 %v3815_v44, %v3181_v33  ;;  %v3365_v13 = vld [vmem:[%s5946_s1 + $0x5d8] sm:$0xf0]  ;;  %v3827_v22 = vld [vmem:[%s5946_s1 + $0x4c4] sm:$0xf]  ;;  %v3357_v33 = vld [vmem:[%s5946_s1 + $0x5c8] sm:$0xf0] }
  0xbb   :  { %2200 = vmatpush.bf16.msrb.mxu3 %v3088_v27  ;;  %v5450_v17 = vadd.f32 %v1829_v52, %v1811_v54  ;;  %v1794_v25 = vadd.f32 %v1793_v6, %v1775_v2  ;;  %v3192_v27 = vor.u32 %v3817_v57, %v3189_v59  ;;  %v3813_v57 = vld [vmem:[%s5946_s1 + $0x454] sm:$0xf]  ;;  %v3173_v59 = vld [vmem:[%s5946_s1 + $0x458] sm:$0xf0]  ;;  %v3859_v44 = vld [vmem:[%s5946_s1 + $0x5c4] sm:$0xf] }
  0xbc   :  { %2144 = vmatpush.bf16.msrb.mxu0 %v2888_v34  ;;  %v3831_v34 = vld [vmem:[%s5946_s1 + $0x4e4] sm:$0xf]  ;;  %v3237_v6 = vld [vmem:[%s5946_s1 + $0x4d8] sm:$0xf0]  ;;  %v3176_v14 = vor.u32 %v3813_v57, %v3173_v59 }
  0xbd   :  { %2163 = vmatpush.bf16.msrb.mxu1 %v2952_v51  ;;  %v3847_v51 = vld [vmem:[%s5946_s1 + $0x564] sm:$0xf]  ;;  %v3248_v52 = vor.u32 %v3831_v34, %v3245_v50 }
  0xbe   :  { %2182 = vmatpush.bf16.msrb.mxu2 %v3016_v41  ;;  %v3309_v41 = vld [vmem:[%s5946_s1 + $0x568] sm:$0xf0] }
  0xbf   :  { %2201 = vmatpush.bf16.msrb.mxu3 %v3080_v46  ;;  %v3373_v46 = vld [vmem:[%s5946_s1 + $0x5e8] sm:$0xf0]  ;;  %v3312_v55 = vor.u32 %v3847_v51, %v3309_v41 }
  0xc0   :  { %2145 = vmatpush.bf16.msrb.mxu0 %v2880_v9  ;;  %v1812_v37 = vpop.f32.mrf.mxu2  ;;  %v1843_v48 = vpop.f32.mrf.mxu0  ;;  %v3376_v2 = vor.u32 %v3863_v45, %v3373_v46  ;;  %v3845_v9 = vld [vmem:[%s5946_s1 + $0x554] sm:$0xf]  ;;  %v3360_v46 = vor.u32 %v3859_v44, %v3357_v33  ;;  %v3205_v33 = vld [vmem:[%s5946_s1 + $0x498] sm:$0xf0] }
  0xc1   :  { %2164 = vmatpush.bf16.msrb.mxu1 %v2944_v62  ;;  %v1813_v42 = vadd.f32 %v1812_v37, %v1794_v25  ;;  %v1831_v56 = vpop.f32.mrf.mxu3  ;;  %v1844_v47 = vadd.f32 %v1843_v48, %v5326_v21  ;;  %v1862_v49 = vpop.f32.mrf.mxu1  ;;  %v3240_v62 = vor.u32 %v3829_v61, %v3237_v6  ;;  %v3229_v25 = vld [vmem:[%s5946_s1 + $0x4c8] sm:$0xf0]  ;;  %v3157_v48 = vld [vmem:[%s5946_s1 + $0x438] sm:$0xf0]  ;;  %v3823_v6 = vld [vmem:[%s5946_s1 + $0x4a4] sm:$0xf] }
  0xc2   :  { %2183 = vmatpush.bf16.msrb.mxu2 %v3008_v18  ;;  %v3304_v18 = vor.u32 %v3845_v9, %v3301_v12  ;;  %v3232_v41 = vor.u32 %v3827_v22, %v3229_v25  ;;  %v3341_v22 = vld [vmem:[%s5946_s1 + $0x5a8] sm:$0xf0] }
  0xc3   :  { %2202 = vmatpush.bf16.msrb.mxu3 %v3072_v26  ;;  %v5483_v54 = vadd.f32 %v1831_v56, %v1813_v42  ;;  %v1863_v21 = vadd.f32 %v1862_v49, %v1844_v47  ;;  %2146 = vmatmul.bf16.vlgmr.msrb.gmra.mxu0 %v4484_v58  ;;  %v3861_v58 = vld [vmem:[%s5946_s1 + $0x5d4] sm:$0xf]  ;;  %v3843_v26 = vld [vmem:[%s5946_s1 + $0x544] sm:$0xf]  ;;  %v3221_v47 = vld [vmem:[%s5946_s1 + $0x4b8] sm:$0xf0] }
  0xc4   :  { %2214 = vmatpush.bf16.msra.mxu0 %v3192_v27  ;;  %2165 = vmatmul.bf16.vlgmr.msrb.gmra.mxu1 %v4495_v63  ;;  %v3811_v63 = vld [vmem:[%s5946_s1 + $0x444] sm:$0xf]  ;;  %v3293_v27 = vld [vmem:[%s5946_s1 + $0x548] sm:$0xf0]  ;;  %v3809_v56 = vld [vmem:[%s5946_s1 + $0x434] sm:$0xf] }
  0xc5   :  { %2233 = vmatpush.bf16.msra.mxu1 %v3256_v28  ;;  %2184 = vmatmul.bf16.vlgmr.msrb.gmra.mxu2 %v4497_v0  ;;  %v3165_v0 = vld [vmem:[%s5946_s1 + $0x448] sm:$0xf0]  ;;  %v3296_v42 = vor.u32 %v3843_v26, %v3293_v27  ;;  %v3841_v49 = vld [vmem:[%s5946_s1 + $0x534] sm:$0xf]  ;;  %v3160_v57 = vor.u32 %v3809_v56, %v3157_v48  ;;  %v3819_v48 = vld [vmem:[%s5946_s1 + $0x484] sm:$0xf] }
  0xc6   :  { %2252 = vmatpush.bf16.msra.mxu2 %v3320_v29  ;;  %2203 = vmatmul.bf16.vlgmr.msrb.gmra.mxu3 %v4505_v3  ;;  %v3368_v3 = vor.u32 %v3861_v58, %v3365_v13  ;;  %v3168_v50 = vor.u32 %v3811_v63, %v3165_v0  ;;  %v3213_v58 = vld [vmem:[%s5946_s1 + $0x4a8] sm:$0xf0]  ;;  %v3839_v13 = vld [vmem:[%s5946_s1 + $0x524] sm:$0xf] }
  0xc7   :  { %2271 = vmatpush.bf16.msra.mxu3 %v3384_v32  ;;  %v3855_v0 = vld [vmem:[%s5946_s1 + $0x5a4] sm:$0xf]  ;;  %v3216_v26 = vor.u32 %v3823_v6, %v3213_v58  ;;  %v3509_v6 = vld [vmem:[%s5946_s1 + $0x6f8] sm:$0xf0] }
  0xc8   :  { %2215 = vmatpush.bf16.msra.mxu0 %v3184_v53  ;;  %v1881_v24 = vpop.f32.mrf.mxu2  ;;  %v1845_v32 = vpop.f32.mrf.mxu0  ;;  %v3285_v53 = vld [vmem:[%s5946_s1 + $0x538] sm:$0xf0]  ;;  %v3344_v44 = vor.u32 %v3855_v0, %v3341_v22 }
  0xc9   :  { %2234 = vmatpush.bf16.msra.mxu1 %v3248_v52  ;;  %v1882_v28 = vadd.f32 %v1881_v24, %v1863_v21  ;;  %v1900_v29 = vpop.f32.mrf.mxu3  ;;  %v1846_v34 = vadd.f32 %v1845_v32, %v5377_v16  ;;  %v1864_v37 = vpop.f32.mrf.mxu1  ;;  %v3825_v16 = vld [vmem:[%s5946_s1 + $0x4b4] sm:$0xf]  ;;  %v3288_v61 = vor.u32 %v3841_v49, %v3285_v53  ;;  %v3807_v21 = vld [vmem:[%s5946_s1 + $0x424] sm:$0xf]  ;;  %v3325_v53 = vld [vmem:[%s5946_s1 + $0x588] sm:$0xf0] }
  0xca   :  { %2253 = vmatpush.bf16.msra.mxu2 %v3312_v55  ;;  %v3857_v52 = vld [vmem:[%s5946_s1 + $0x5b4] sm:$0xf]  ;;  %v3349_v55 = vld [vmem:[%s5946_s1 + $0x5b8] sm:$0xf0]  ;;  %v3224_v59 = vor.u32 %v3825_v16, %v3221_v47  ;;  %v3835_v16 = vld [vmem:[%s5946_s1 + $0x504] sm:$0xf] }
  0xcb   :  { %2272 = vmatpush.bf16.msra.mxu3 %v3376_v2  ;;  %v5538_v51 = vadd.f32 %v1900_v29, %v1882_v28  ;;  %v1865_v45 = vadd.f32 %v1864_v37, %v1846_v34  ;;  %v3149_v2 = vld [vmem:[%s5946_s1 + $0x428] sm:$0xf0]  ;;  %v3352_v12 = vor.u32 %v3857_v52, %v3349_v55  ;;  %v3805_v28 = vld [vmem:[%s5946_s1 + $0x414] sm:$0xf]  ;;  %v3141_v29 = vld [vmem:[%s5946_s1 + $0x418] sm:$0xf0] }
  0xcc   :  { %2216 = vmatpush.bf16.msra.mxu0 %v3176_v14  ;;  %v3277_v14 = vld [vmem:[%s5946_s1 + $0x528] sm:$0xf0]  ;;  %v3821_v32 = vld [vmem:[%s5946_s1 + $0x494] sm:$0xf]  ;;  %v3269_v37 = vld [vmem:[%s5946_s1 + $0x518] sm:$0xf0] }
  0xcd   :  { %2235 = vmatpush.bf16.msra.mxu1 %v3240_v62  ;;  %v3280_v27 = vor.u32 %v3839_v13, %v3277_v14  ;;  %v3837_v34 = vld [vmem:[%s5946_s1 + $0x514] sm:$0xf]  ;;  %v3261_v47 = vld [vmem:[%s5946_s1 + $0x508] sm:$0xf0]  ;;  %v3851_v49 = vld [vmem:[%s5946_s1 + $0x584] sm:$0xf] }
  0xce   :  { %2254 = vmatpush.bf16.msra.mxu2 %v3304_v18  ;;  %v3272_v56 = vor.u32 %v3837_v34, %v3269_v37  ;;  %v3264_v13 = vor.u32 %v3835_v16, %v3261_v47  ;;  %v3929_v14 = vld [vmem:[%s5946_s1 + $0x7f4] sm:$0xf]  ;;  %v3565_v34 = vld [vmem:[%s5946_s1 + $0x768] sm:$0xf0]  ;;  %v3493_v47 = vld [vmem:[%s5946_s1 + $0x6d8] sm:$0xf0] }
  0xcf   :  { %2273 = vmatpush.bf16.msra.mxu3 %v3368_v3  ;;  %v3152_v3 = vor.u32 %v3807_v21, %v3149_v2  ;;  %v3893_v16 = vld [vmem:[%s5946_s1 + $0x6d4] sm:$0xf] }
  0xd0   :  { %2217 = vmatpush.bf16.msra.mxu0 %v3168_v50  ;;  %v1883_v9 = vpop.f32.mrf.mxu2  ;;  %v5582_v63 = vpop.f32.mrf.mxu0  ;;  %v3333_v50 = vld [vmem:[%s5946_s1 + $0x598] sm:$0xf0] }
  0xd1   :  { %2236 = vmatpush.bf16.msra.mxu1 %v3232_v41  ;;  %v1884_v62 = vadd.f32 %v1883_v9, %v1865_v45  ;;  %v1902_v18 = vpop.f32.mrf.mxu3  ;;  %v5590_v24 = vpop.f32.mrf.mxu1  ;;  %v3144_v41 = vor.u32 %v3805_v28, %v3141_v29  ;;  %v3913_v9 = vld [vmem:[%s5946_s1 + $0x774] sm:$0xf]  ;;  %v3437_v28 = vld [vmem:[%s5946_s1 + $0x668] sm:$0xf0]  ;;  %v3895_v29 = vld [vmem:[%s5946_s1 + $0x6e4] sm:$0xf] }
  0xd2   :  { %2255 = vmatpush.bf16.msra.mxu2 %v3296_v42  ;;  %v3803_v42 = vld [vmem:[%s5946_s1 + $0x404] sm:$0xf] }
  0xd3   :  { %2274 = vmatpush.bf16.msra.mxu3 %v3360_v46  ;;  %v5592_v25 = vadd.f32 %v1902_v18, %v1884_v62  ;;  %2151 = vmatmul.bf16.gmra.mxu0 %v4616_v1  ;;  %v3853_v1 = vld [vmem:[%s5946_s1 + $0x594] sm:$0xf]  ;;  %v3637_v62 = vld [vmem:[%s5946_s1 + $0x7f8] sm:$0xf0]  ;;  %v3328_v18 = vor.u32 %v3851_v49, %v3325_v53 }
  0xd4   :  { %2218 = vmatpush.bf16.msra.mxu0 %v3160_v57  ;;  %2170 = vmatmul.bf16.gmra.mxu1 %v4627_v7  ;;  %v3133_v7 = vld [vmem:[%s5946_s1 + $0x408] sm:$0xf0]  ;;  %v3336_v46 = vor.u32 %v3853_v1, %v3333_v50  ;;  %v3881_v57 = vld [vmem:[%s5946_s1 + $0x674] sm:$0xf]  ;;  %v3927_v50 = vld [vmem:[%s5946_s1 + $0x7e4] sm:$0xf] }
  0xd5   :  { %2237 = vmatpush.bf16.msra.mxu1 %v3224_v59  ;;  %2189 = vmatmul.bf16.gmra.mxu2 %v4629_v8  ;;  %v3208_v8 = vor.u32 %v3821_v32, %v3205_v33  ;;  %v3445_v59 = vld [vmem:[%s5946_s1 + $0x678] sm:$0xf0]  ;;  %v3136_v2 = vor.u32 %v3803_v42, %v3133_v7  ;;  %v3911_v33 = vld [vmem:[%s5946_s1 + $0x764] sm:$0xf]  ;;  %v3909_v49 = vld [vmem:[%s5946_s1 + $0x754] sm:$0xf] }
  0xd6   :  { %2256 = vmatpush.bf16.msra.mxu2 %v3288_v61  ;;  %2208 = vmatmul.bf16.gmra.mxu3 %v4637_v11  ;;  %v3197_v11 = vld [vmem:[%s5946_s1 + $0x488] sm:$0xf0]  ;;  %v3897_v61 = vld [vmem:[%s5946_s1 + $0x6f4] sm:$0xf]  ;;  %v3448_v0 = vor.u32 %v3881_v57, %v3445_v59  ;;  %v3557_v53 = vld [vmem:[%s5946_s1 + $0x758] sm:$0xf0] }
  0xd7   :  { %2275 = vmatpush.bf16.msra.mxu3 %v3352_v12  ;;  %v3573_v12 = vld [vmem:[%s5946_s1 + $0x778] sm:$0xf0]  ;;  %v3200_v58 = vor.u32 %v3819_v48, %v3197_v11  ;;  %v3512_v22 = vor.u32 %v3897_v61, %v3509_v6  ;;  %v3877_v48 = vld [vmem:[%s5946_s1 + $0x654] sm:$0xf]  ;;  %v3496_v61 = vor.u32 %v3893_v16, %v3493_v47  ;;  %v3891_v6 = vld [vmem:[%s5946_s1 + $0x6c4] sm:$0xf] }
  0xd8   :  { %2219 = vmatpush.bf16.msra.mxu0 %v3152_v3  ;;  %v5637_v45 = vpop.f32.mrf.mxu2  ;;  %v5650_v55 = vpop.f32.mrf.mxu0  ;;  %v3576_v3 = vor.u32 %v3913_v9, %v3573_v12  ;;  %v3429_v11 = vld [vmem:[%s5946_s1 + $0x658] sm:$0xf0]  ;;  %v3485_v12 = vld [vmem:[%s5946_s1 + $0x6c8] sm:$0xf0]  ;;  %v3871_v16 = vld [vmem:[%s5946_s1 + $0x624] sm:$0xf] }
  0xd9   :  { %2238 = vmatpush.bf16.msra.mxu1 %v3216_v26  ;;  %v5648_v52 = vpop.f32.mrf.mxu3  ;;  %v5661_v21 = vpop.f32.mrf.mxu1  ;;  %v3640_v26 = vor.u32 %v3929_v14, %v3637_v62  ;;  %v3621_v57 = vld [vmem:[%s5946_s1 + $0x7d8] sm:$0xf0]  ;;  %v3432_v59 = vor.u32 %v3877_v48, %v3429_v11  ;;  %v3887_v47 = vld [vmem:[%s5946_s1 + $0x6a4] sm:$0xf] }
  0xda   :  { %2257 = vmatpush.bf16.msra.mxu2 %v3280_v27  ;;  %v3879_v27 = vld [vmem:[%s5946_s1 + $0x664] sm:$0xf] }
  0xdb   :  { %2276 = vmatpush.bf16.msra.mxu3 %v3344_v44  ;;  %v3501_v44 = vld [vmem:[%s5946_s1 + $0x6e8] sm:$0xf0]  ;;  %v3440_v7 = vor.u32 %v3879_v27, %v3437_v28  ;;  %v3873_v28 = vld [vmem:[%s5946_s1 + $0x634] sm:$0xf] }
  0xdc   :  { %2220 = vmatpush.bf16.msra.mxu0 %v3144_v41  ;;  %v3629_v41 = vld [vmem:[%s5946_s1 + $0x7e8] sm:$0xf0] }
  0xdd   :  { %2239 = vmatpush.bf16.msra.mxu1 %v3208_v8  ;;  %v3504_v8 = vor.u32 %v3895_v29, %v3501_v44  ;;  %v3413_v29 = vld [vmem:[%s5946_s1 + $0x638] sm:$0xf0]  ;;  %v3889_v44 = vld [vmem:[%s5946_s1 + $0x6b4] sm:$0xf] }
  0xde   :  { %2258 = vmatpush.bf16.msra.mxu2 %v3272_v56  ;;  %v3568_v56 = vor.u32 %v3911_v33, %v3565_v34  ;;  %v3477_v34 = vld [vmem:[%s5946_s1 + $0x6b8] sm:$0xf0] }
  0xdf   :  { %2277 = vmatpush.bf16.msra.mxu3 %v3336_v46  ;;  %v3632_v46 = vor.u32 %v3927_v50, %v3629_v41  ;;  %v3905_v50 = vld [vmem:[%s5946_s1 + $0x734] sm:$0xf]  ;;  %v3541_v41 = vld [vmem:[%s5946_s1 + $0x738] sm:$0xf0]  ;;  %v3480_v48 = vor.u32 %v3889_v44, %v3477_v34 }
  0xe0   :  { %2221 = vmatpush.bf16.msra.mxu0 %v3136_v2  ;;  %v5687_v32 = vpop.f32.mrf.mxu2  ;;  %v5700_v1 = vpop.f32.mrf.mxu0  ;;  %v3560_v2 = vor.u32 %v3909_v49, %v3557_v53  ;;  %v3544_v11 = vor.u32 %v3905_v50, %v3541_v41  ;;  %v3883_v50 = vld [vmem:[%s5946_s1 + $0x684] sm:$0xf] }
  0xe1   :  { %2240 = vmatpush.bf16.msra.mxu1 %v3200_v58  ;;  %v5698_v37 = vpop.f32.mrf.mxu3  ;;  %v5708_v42 = vpop.f32.mrf.mxu1  ;;  %v3907_v58 = vld [vmem:[%s5946_s1 + $0x744] sm:$0xf] }
  0xe2   :  { %2259 = vmatpush.bf16.msra.mxu2 %v3264_v13  ;;  %v3549_v13 = vld [vmem:[%s5946_s1 + $0x748] sm:$0xf0] }
  0xe3   :  { %2278 = vmatpush.bf16.msra.mxu3 %v3328_v18  ;;  %2222 = vmatmul.bf16.vlgmr.msra.gmra.mxu0 %v4748_v15  ;;  %v3925_v15 = vld [vmem:[%s5946_s1 + $0x7d4] sm:$0xf]  ;;  %v3923_v18 = vld [vmem:[%s5946_s1 + $0x7c4] sm:$0xf]  ;;  %v3552_v27 = vor.u32 %v3907_v58, %v3549_v13 }
  0xe4   :  { %2290 = vmatpush.bf16.msrb.mxu0 %v3448_v0  ;;  %2241 = vmatmul.bf16.vlgmr.msra.gmra.mxu1 %v4759_v19  ;;  %v3875_v19 = vld [vmem:[%s5946_s1 + $0x644] sm:$0xf]  ;;  %v3613_v0 = vld [vmem:[%s5946_s1 + $0x7c8] sm:$0xf0]  ;;  %v3869_v13 = vld [vmem:[%s5946_s1 + $0x614] sm:$0xf] }
  0xe5   :  { %2309 = vmatpush.bf16.msrb.mxu1 %v3512_v22  ;;  %2260 = vmatmul.bf16.vlgmr.msra.gmra.mxu2 %v4761_v20  ;;  %v3421_v20 = vld [vmem:[%s5946_s1 + $0x648] sm:$0xf0]  ;;  %v3616_v33 = vor.u32 %v3923_v18, %v3613_v0  ;;  %v3397_v18 = vld [vmem:[%s5946_s1 + $0x618] sm:$0xf0]  ;;  %v3885_v0 = vld [vmem:[%s5946_s1 + $0x694] sm:$0xf] }
  0xe6   :  { %2328 = vmatpush.bf16.msrb.mxu2 %v3576_v3  ;;  %2279 = vmatmul.bf16.vlgmr.msra.gmra.mxu3 %v4769_v23  ;;  %v3624_v23 = vor.u32 %v3925_v15, %v3621_v57  ;;  %v3424_v3 = vor.u32 %v3875_v19, %v3421_v20  ;;  %v3469_v15 = vld [vmem:[%s5946_s1 + $0x6a8] sm:$0xf0]  ;;  %v3903_v57 = vld [vmem:[%s5946_s1 + $0x724] sm:$0xf]  ;;  %v3400_v44 = vor.u32 %v3869_v13, %v3397_v18 }
  0xe7   :  { %2347 = vmatpush.bf16.msrb.mxu3 %v3640_v26  ;;  %v3488_v26 = vor.u32 %v3891_v6, %v3485_v12  ;;  %v3919_v19 = vld [vmem:[%s5946_s1 + $0x7a4] sm:$0xf]  ;;  %v3597_v20 = vld [vmem:[%s5946_s1 + $0x7a8] sm:$0xf0]  ;;  %v3472_v12 = vor.u32 %v3887_v47, %v3469_v15 }
  0xe8   :  { %2291 = vmatpush.bf16.msrb.mxu0 %v3440_v7  ;;  %v5747_v9 = vpop.f32.mrf.mxu2  ;;  %v5760_v62 = vpop.f32.mrf.mxu0  ;;  %v3921_v7 = vld [vmem:[%s5946_s1 + $0x7b4] sm:$0xf] }
  0xe9   :  { %2310 = vmatpush.bf16.msrb.mxu1 %v3504_v8  ;;  %v5758_v14 = vpop.f32.mrf.mxu3  ;;  %v5768_v22 = vpop.f32.mrf.mxu1  ;;  %v3605_v8 = vld [vmem:[%s5946_s1 + $0x7b8] sm:$0xf0] }
  0xea   :  { %2329 = vmatpush.bf16.msrb.mxu2 %v3568_v56  ;;  %v3416_v56 = vor.u32 %v3873_v28, %v3413_v29  ;;  %v3608_v53 = vor.u32 %v3921_v7, %v3605_v8  ;;  %v3525_v28 = vld [vmem:[%s5946_s1 + $0x718] sm:$0xf0]  ;;  %v3453_v7 = vld [vmem:[%s5946_s1 + $0x688] sm:$0xf0]  ;;  %v3899_v8 = vld [vmem:[%s5946_s1 + $0x704] sm:$0xf] }
  0xeb   :  { %2348 = vmatpush.bf16.msrb.mxu3 %v3632_v46  ;;  %v3405_v46 = vld [vmem:[%s5946_s1 + $0x628] sm:$0xf0]  ;;  %v3589_v29 = vld [vmem:[%s5946_s1 + $0x798] sm:$0xf0]  ;;  %v3456_v15 = vor.u32 %v3883_v50, %v3453_v7 }
  0xec   :  { %2292 = vmatpush.bf16.msrb.mxu0 %v3432_v59  ;;  %v3533_v59 = vld [vmem:[%s5946_s1 + $0x728] sm:$0xf0] }
  0xed   :  { %2311 = vmatpush.bf16.msrb.mxu1 %v3496_v61  ;;  %v3536_v58 = vor.u32 %v3903_v57, %v3533_v59 }
  0xee   :  { %2330 = vmatpush.bf16.msrb.mxu2 %v3560_v2 }
  0xef   :  { %2349 = vmatpush.bf16.msrb.mxu3 %v3624_v23  ;;  %v3408_v23 = vor.u32 %v3871_v16, %v3405_v46  ;;  %v3915_v16 = vld [vmem:[%s5946_s1 + $0x784] sm:$0xf]  ;;  %v3581_v46 = vld [vmem:[%s5946_s1 + $0x788] sm:$0xf0] }
  0xf0   :  { %2293 = vmatpush.bf16.msrb.mxu0 %v3424_v3  ;;  %v5803_v49 = vpop.f32.mrf.mxu2  ;;  %v5816_v2 = vpop.f32.mrf.mxu0  ;;  %v3600_v3 = vor.u32 %v3919_v19, %v3597_v20  ;;  %v3584_v59 = vor.u32 %v3915_v16, %v3581_v46  ;;  %v1849_v19 = vadd.f32 %v5582_v63, %v5450_v17 }
  0xf1   :  { %2312 = vmatpush.bf16.msrb.mxu1 %v3488_v26  ;;  %v5814_v61 = vpop.f32.mrf.mxu3  ;;  %v5824_v6 = vpop.f32.mrf.mxu1  ;;  %v3461_v26 = vld [vmem:[%s5946_s1 + $0x698] sm:$0xf0] }
  0xf2   :  { %2331 = vmatpush.bf16.msrb.mxu2 %v3552_v27  ;;  %v3901_v27 = vld [vmem:[%s5946_s1 + $0x714] sm:$0xf] }
  0xf3   :  { %2350 = vmatpush.bf16.msrb.mxu3 %v3616_v33  ;;  %2227 = vmatmul.bf16.gmra.mxu0 %v4880_v30  ;;  %v3917_v30 = vld [vmem:[%s5946_s1 + $0x794] sm:$0xf]  ;;  %v3464_v33 = vor.u32 %v3885_v0, %v3461_v26  ;;  %v3528_v34 = vor.u32 %v3901_v27, %v3525_v28  ;;  %v1851_v0 = vadd.f32 %v5650_v55, %v5483_v54 }
  0xf4   :  { %2294 = vmatpush.bf16.msrb.mxu0 %v3416_v56  ;;  %2246 = vmatmul.bf16.gmra.mxu1 %v4891_v35  ;;  %v3867_v35 = vld [vmem:[%s5946_s1 + $0x604] sm:$0xf]  ;;  %v3517_v56 = vld [vmem:[%s5946_s1 + $0x708] sm:$0xf0] }
  0xf5   :  { %2313 = vmatpush.bf16.msrb.mxu1 %v3480_v48  ;;  %2265 = vmatmul.bf16.gmra.mxu2 %v4893_v36  ;;  %v3389_v36 = vld [vmem:[%s5946_s1 + $0x608] sm:$0xf0]  ;;  %v3520_v57 = vor.u32 %v3899_v8, %v3517_v56  ;;  %v1870_v63 = vadd.f32 %v5661_v21, %v1851_v0  ;;  %v2394_v0 = vld [vmem:[%s5949_s3 + $0x20] sm:$0xff] }
  0xf6   :  { %2332 = vmatpush.bf16.msrb.mxu2 %v3544_v11  ;;  %2284 = vmatmul.bf16.gmra.mxu3 %v4901_v39  ;;  %v3592_v39 = vor.u32 %v3917_v30, %v3589_v29 }
  0xf7   :  { %2351 = vmatpush.bf16.msrb.mxu3 %v3608_v53  ;;  %v3392_v53 = vor.u32 %v3867_v35, %v3389_v36 }
  0xf8   :  { %2295 = vmatpush.bf16.msrb.mxu0 %v3408_v23  ;;  %v1962_v41 = vpop.f32.mrf.mxu2  ;;  %v1926_v11 = vpop.f32.mrf.mxu0  ;;  %v1868_v23 = vadd.f32 %v5590_v24, %v1849_v19 }
  0xf9   :  { %2314 = vmatpush.bf16.msrb.mxu1 %v3472_v12  ;;  %v1981_v48 = vpop.f32.mrf.mxu3  ;;  %v1945_v47 = vpop.f32.mrf.mxu1 }
  0xfa   :  { %2333 = vmatpush.bf16.msrb.mxu2 %v3536_v58  ;;  %v1887_v18 = vadd.f32 %v5637_v45, %v1868_v23 }
  0xfb   :  { %2352 = vmatpush.bf16.msrb.mxu3 %v3600_v3  ;;  %v1889_v3 = vadd.f32 %v5687_v32, %v1870_v63 }
  0xfc   :  { %2296 = vmatpush.bf16.msrb.mxu0 %v3400_v44  ;;  %v1906_v17 = vadd.f32 %v5648_v52, %v1887_v18 }
  0xfd   :  { %2315 = vmatpush.bf16.msrb.mxu1 %v3464_v33 }
  0xfe   :  { %2334 = vmatpush.bf16.msrb.mxu2 %v3528_v34  ;;  %v1925_v45 = vadd.f32 %v5816_v2, %v1906_v17 }
  0xff   :  { %2353 = vmatpush.bf16.msrb.mxu3 %v3592_v39 }
 0x100   :  { %2297 = vmatpush.bf16.msrb.mxu0 %v3392_v53  ;;  %v1964_v20 = vpop.f32.mrf.mxu2  ;;  %v1995_v58 = vpop.f32.mrf.mxu0 }
 0x101   :  { %2316 = vmatpush.bf16.msrb.mxu1 %v3456_v15  ;;  %v1983_v12 = vpop.f32.mrf.mxu3  ;;  %v2014_v13 = vpop.f32.mrf.mxu1 }
 0x102   :  { %2335 = vmatpush.bf16.msrb.mxu2 %v3520_v57 }
 0x103   :  { %2354 = vmatpush.bf16.msrb.mxu3 %v3584_v59  ;;  %2298 = vmatmul.bf16.vlgmr.msrb.gmra.mxu0 %v5012_v60  ;;  %v1922_v60 = vadd.f32 %v5760_v62, %v5592_v25 }
 0x104   :  { %2317 = vmatmul.bf16.vlgmr.msrb.gmra.mxu1 %v5023_v4  ;;  %v1908_v4 = vadd.f32 %v5698_v37, %v1889_v3 }
 0x105   :  { %2336 = vmatmul.bf16.vlgmr.msrb.gmra.mxu2 %v5025_v5  ;;  %v1920_v5 = vadd.f32 %v5700_v1, %v5538_v51  ;;  %v1941_v52 = vadd.f32 %v5768_v22, %v1922_v60 }
 0x106   :  { %2355 = vmatmul.bf16.vlgmr.msrb.gmra.mxu3 %v5033_v10  ;;  %v1944_v10 = vadd.f32 %v5824_v6, %v1925_v45  ;;  %v1927_v21 = vadd.f32 %v1926_v11, %v1908_v4 }
 0x107   :  { %v1939_v2 = vadd.f32 %v5708_v42, %v1920_v5  ;;  %v1960_v28 = vadd.f32 %v5803_v49, %v1941_v52  ;;  %v2390_v52 = vld [vmem:[%s5949_s3] sm:$0xff] }
 0x108   :  { %v2033_v24 = vpop.f32.mrf.mxu2  ;;  %v1997_v27 = vpop.f32.mrf.mxu0  ;;  %v1963_v55 = vadd.f32 %v1962_v41, %v1944_v10  ;;  %v1946_v62 = vadd.f32 %v1945_v47, %v1927_v21 }
 0x109   :  { %v2052_v26 = vpop.f32.mrf.mxu3  ;;  %v2016_v54 = vpop.f32.mrf.mxu1  ;;  %v1958_v25 = vadd.f32 %v5747_v9, %v1939_v2  ;;  %v1979_v51 = vadd.f32 %v5814_v61, %v1960_v28 }
 0x10a   :  { %v1982_v37 = vadd.f32 %v1981_v48, %v1963_v55  ;;  %v1965_v1 = vadd.f32 %v1964_v20, %v1946_v62 }
 0x10b   :  { %v1977_v42 = vadd.f32 %v5758_v14, %v1958_v25  ;;  %v1998_v49 = vadd.f32 %v1997_v27, %v1979_v51  ;;  %v2392_v27 = vld [vmem:[%s5949_s3 + $0x10] sm:$0xff] }
 0x10c   :  { %v1984_v33 = vadd.f32 %v1983_v12, %v1965_v1  ;;  %v2396_v12 = vld [vmem:[%s5949_s3 + $0x30] sm:$0xff] }
 0x10d   :  { %v1996_v9 = vadd.f32 %v1995_v58, %v1977_v42  ;;  %v2017_v50 = vadd.f32 %v2016_v54, %v1998_v49 }
 0x10f   :  { %v2015_v39 = vadd.f32 %v2014_v13, %v1996_v9 }
 0x110   :  { %v2035_v32 = vpop.f32.mrf.mxu2  ;;  %v2000_v29 = vpop.f32.mrf.mxu0 }
 0x111   :  { %v2054_v30 = vpop.f32.mrf.mxu3  ;;  %v2019_v44 = vpop.f32.mrf.mxu1  ;;  %v2001_v22 = vadd.f32 %v2000_v29, %v1982_v37  ;;  %v2036_v7 = vadd.f32 %v2035_v32, %v2017_v50 }
 0x113   :  { %2303 = vmatmul.bf16.gmra.mxu0 %v5144_v31  ;;  %v2020_v34 = vadd.f32 %v2019_v44, %v2001_v22  ;;  %v2055_v48 = vadd.f32 %v2054_v30, %v2036_v7 }
 0x114   :  { %2322 = vmatmul.bf16.gmra.mxu1 %v5155_v38  ;;  %v3935_v38 = vld [vmem:[%s5948_s2] sm:$0x3] }
 0x115   :  { %2341 = vmatmul.bf16.gmra.mxu2 %v5157_v40  ;;  %v315_v40 = vperm.slane %v3935_v38, 1  ;;  %v2376_v20 = vmul.f32 0.2, %v2055_v48  ;;  %vm2368_vm2 = vcmp.gt.f32.partialorder %v2055_v48, 0.0 }
 0x116   :  { %2360 = vmatmul.bf16.gmra.mxu3 %v5165_v43  ;;  %v2034_v43 = vadd.f32 %v2033_v24, %v2015_v39 }
 0x118   :  { %v2038_v6 = vpop.f32.mrf.mxu2  ;;  %v2002_v36 = vpop.f32.mrf.mxu0  ;;  %v2053_v15 = vadd.f32 %v2052_v26, %v2034_v43  ;;  %v2384_v26 = vsel %vm2368_vm2, %v2055_v48, %v2376_v20 }
 0x119   :  { %v2057_v35 = vpop.f32.mrf.mxu3  ;;  %v2021_v31 = vpop.f32.mrf.mxu1  ;;  %v2039_v61 = vadd.f32 %v2038_v6, %v2020_v34  ;;  %v2003_v41 = vadd.f32 %v2002_v36, %v1984_v33  ;;  %v2400_v21 = vmul.f32 %v2392_v27, %v2384_v26 }
 0x11a   :  { %v2374_v58 = vmul.f32 0.2, %v2053_v15  ;;  %vm2366_vm3 = vcmp.gt.f32.partialorder %v2053_v15, 0.0 }
 0x11b   :  { %v2058_v14 = vadd.f32 %v2057_v35, %v2039_v61  ;;  %v2022_v8 = vadd.f32 %v2021_v31, %v2003_v41 }
 0x11c   :  { %v2382_v10 = vsel %vm2366_vm3, %v2053_v15, %v2374_v58 }
 0x11d   :  { %v2378_v57 = vmul.f32 0.2, %v2058_v14  ;;  %vm2370_vm0 = vcmp.gt.f32.partialorder %v2058_v14, 0.0  ;;  %v2398_v32 = vmul.f32 %v2390_v52, %v2382_v10 }
 0x11f   :  { %v2386_v18 = vsel %vm2370_vm0, %v2058_v14, %v2378_v57 }
 0x120   :  { %v2040_v56 = vpop.f32.mrf.mxu2  ;;  %v2071_v46 = vpop.f32.mrf.mxu0  ;;  %v2402_v4 = vmul.f32 %v2394_v0, %v2386_v18 }
 0x121   :  { %v2041_v11 = vadd.f32 %v2040_v56, %v2022_v8  ;;  %v2059_v16 = vpop.f32.mrf.mxu3  ;;  %v2072_v47 = vadd.f32 %v2071_v46, %v315_v40  ;;  %v2090_v53 = vpop.f32.mrf.mxu1 }
 0x123   :  { %v2060_v59 = vadd.f32 %v2059_v16, %v2041_v11  ;;  %v2091_v19 = vadd.f32 %v2090_v53, %v2072_v47 }
 0x125   :  { %vm2372_vm1 = vcmp.gt.f32.partialorder %v2060_v59, 0.0  ;;  %v2380_v23 = vmul.f32 0.2, %v2060_v59 }
 0x127   :  { %v2388_v13 = vsel %vm2372_vm1, %v2060_v59, %v2380_v23 }
 0x128   :  { %v2404_v17 = vmul.f32 %v2396_v12, %v2388_v13  ;;  %v2109_v63 = vpop.f32.mrf.mxu2  ;;  %v2073_v45 = vpop.f32.mrf.mxu0 }
 0x129   :  { %v2110_v24 = vadd.f32 %v2109_v63, %v2091_v19  ;;  %v2128_v3 = vpop.f32.mrf.mxu3  ;;  %v2074_v54 = vadd.f32 %v2073_v45, %v315_v40  ;;  %v2092_v60 = vpop.f32.mrf.mxu1 }
 0x12a   :  { %2423 = vmatpush.msra.mxu0 %v2404_v17 }
 0x12b   :  { %v2129_v5 = vadd.f32 %v2128_v3, %v2110_v24  ;;  %v2093_v55 = vadd.f32 %v2092_v60, %v2074_v54 }
 0x12c   :  { %2424 = vmatpush.msra.mxu0 %v2402_v4 }
 0x12e   :  { %2425 = vmatpush.msra.mxu0 %v2400_v21 }
 0x130   :  { %v2111_v2 = vpop.f32.mrf.mxu2  ;;  %2426 = vmatpush.msra.mxu0 %v2398_v32  ;;  %v2076_v29 = vpop.f32.mrf.mxu0 }
 0x131   :  { %v2112_v28 = vadd.f32 %v2111_v2, %v2093_v55  ;;  %v2130_v30 = vpop.f32.mrf.mxu3  ;;  %v2077_v44 = vadd.f32 %v2076_v29, %v315_v40  ;;  %v2095_v25 = vpop.f32.mrf.mxu1 }
 0x133   :  { %v2131_v37 = vadd.f32 %v2130_v30, %v2112_v28  ;;  %v2096_v62 = vadd.f32 %v2095_v25, %v2077_v44 }
 0x138   :  { %v2114_v51 = vpop.f32.mrf.mxu2  ;;  %v2078_v42 = vpop.f32.mrf.mxu0 }
 0x139   :  { %v2115_v1 = vadd.f32 %v2114_v51, %v2096_v62  ;;  %v2133_v22 = vpop.f32.mrf.mxu3  ;;  %v2079_v49 = vadd.f32 %v2078_v42, %v315_v40  ;;  %v2097_v6 = vpop.f32.mrf.mxu1 }
 0x13b   :  { %v2134_v33 = vadd.f32 %v2133_v22, %v2115_v1  ;;  %v2098_v9 = vadd.f32 %v2097_v6, %v2079_v49 }
 0x140   :  { %v2116_v34 = vpop.f32.mrf.mxu2  ;;  %v2147_v31 = vpop.f32.mrf.mxu0 }
 0x141   :  { %v2117_v35 = vadd.f32 %v2116_v34, %v2098_v9  ;;  %v2135_v36 = vpop.f32.mrf.mxu3  ;;  %v2148_v50 = vadd.f32 %v2147_v31, %v2129_v5  ;;  %v2166_v61 = vpop.f32.mrf.mxu1 }
 0x143   :  { %v2136_v41 = vadd.f32 %v2135_v36, %v2117_v35  ;;  %v2167_v39 = vadd.f32 %v2166_v61, %v2148_v50  ;;  %v2406_v36 = vld [vmem:[%s5950_s4] sm:$0x3] }
 0x144   :  { %3641 = vmatmul.msk.f32.vlgmr.msra.gmra.mxu0 %vm2407_vm4, %v2406_v36 }
 0x148   :  { %v2185_v7 = vpop.f32.mrf.mxu2  ;;  %v2149_v14 = vpop.f32.mrf.mxu0 }
 0x149   :  { %v2186_v38 = vadd.f32 %v2185_v7, %v2167_v39  ;;  %v2204_v43 = vpop.f32.mrf.mxu3  ;;  %v2150_v8 = vadd.f32 %v2149_v14, %v2131_v37  ;;  %v2168_v56 = vpop.f32.mrf.mxu1 }
 0x14b   :  { %v2205_v48 = vadd.f32 %v2204_v43, %v2186_v38  ;;  %v2169_v11 = vadd.f32 %v2168_v56, %v2150_v8 }
 0x150   :  { %v2187_v40 = vpop.f32.mrf.mxu2  ;;  %v2152_v47 = vpop.f32.mrf.mxu0 }
 0x151   :  { %v2188_v16 = vadd.f32 %v2187_v40, %v2169_v11  ;;  %v2206_v46 = vpop.f32.mrf.mxu3  ;;  %v2171_v53 = vpop.f32.mrf.mxu1  ;;  %v2153_v5 = vadd.f32 %v2152_v47, %v2134_v33 }
 0x153   :  { %v2207_v15 = vadd.f32 %v2206_v46, %v2188_v16  ;;  %v2172_v52 = vadd.f32 %v2171_v53, %v2153_v5 }
 0x158   :  { %v2190_v57 = vpop.f32.mrf.mxu2  ;;  %v2154_v19 = vpop.f32.mrf.mxu0 }
 0x159   :  { %v2209_v59 = vpop.f32.mrf.mxu3  ;;  %v2173_v20 = vpop.f32.mrf.mxu1  ;;  %v2191_v2 = vadd.f32 %v2190_v57, %v2172_v52  ;;  %v2155_v28 = vadd.f32 %v2154_v19, %v2136_v41  ;;  %v2395_v52 = vld [vmem:[%s5949_s3 + $0x28] sm:$0xff] }
 0x15b   :  { %v2210_v30 = vadd.f32 %v2209_v59, %v2191_v2  ;;  %v2174_v29 = vadd.f32 %v2173_v20, %v2155_v28 }
 0x160   :  { %v2192_v23 = vpop.f32.mrf.mxu2  ;;  %v2223_v58 = vpop.f32.mrf.mxu0 }
 0x161   :  { %v2211_v12 = vpop.f32.mrf.mxu3  ;;  %v2242_v13 = vpop.f32.mrf.mxu1  ;;  %v2193_v25 = vadd.f32 %v2192_v23, %v2174_v29  ;;  %v2224_v49 = vadd.f32 %v2223_v58, %v2205_v48 }
 0x163   :  { %v2212_v42 = vadd.f32 %v2211_v12, %v2193_v25  ;;  %v2243_v31 = vadd.f32 %v2242_v13, %v2224_v49 }
 0x168   :  { %v2261_v18 = vpop.f32.mrf.mxu2  ;;  %v2225_v17 = vpop.f32.mrf.mxu0 }
 0x169   :  { %v2280_v0 = vpop.f32.mrf.mxu3  ;;  %v2244_v63 = vpop.f32.mrf.mxu1  ;;  %v2226_v22 = vadd.f32 %v2225_v17, %v2207_v15  ;;  %v2262_v39 = vadd.f32 %v2261_v18, %v2243_v31 }
 0x16b   :  { %v2245_v33 = vadd.f32 %v2244_v63, %v2226_v22  ;;  %v2281_v48 = vadd.f32 %v2280_v0, %v2262_v39  ;;  %v2458_v22 = vstv %s5951_s5 }
 0x170   :  { %v2263_v24 = vpop.f32.mrf.mxu2  ;;  %v2228_v45 = vpop.f32.mrf.mxu0 }
 0x171   :  { %v2282_v3 = vpop.f32.mrf.mxu3  ;;  %v2247_v26 = vpop.f32.mrf.mxu1  ;;  %v2229_v37 = vadd.f32 %v2228_v45, %v2210_v30  ;;  %v2264_v50 = vadd.f32 %v2263_v24, %v2245_v33  ;;  %v2391_v30 = vld [vmem:[%s5949_s3 + $0x8] sm:$0xff] }
 0x173   :  { %v2248_v6 = vadd.f32 %v2247_v26, %v2229_v37  ;;  %v2283_v14 = vadd.f32 %v2282_v3, %v2264_v50 }
 0x178   :  { %v2266_v27 = vpop.f32.mrf.mxu2  ;;  %v2230_v60 = vpop.f32.mrf.mxu0 }
 0x179   :  { %v2285_v54 = vpop.f32.mrf.mxu3  ;;  %v2249_v4 = vpop.f32.mrf.mxu1  ;;  %v2267_v9 = vadd.f32 %v2266_v27, %v2248_v6  ;;  %v2231_v34 = vadd.f32 %v2230_v60, %v2212_v42  ;;  %v2397_v60 = vld [vmem:[%s5949_s3 + $0x38] sm:$0xff] }
 0x17b   :  { %v2286_v7 = vadd.f32 %v2285_v54, %v2267_v9  ;;  %v2250_v38 = vadd.f32 %v2249_v4, %v2231_v34 }
 0x180   :  { %v2268_v10 = vpop.f32.mrf.mxu2  ;;  %v2299_v21 = vpop.f32.mrf.mxu0 }
 0x181   :  { %v2287_v55 = vpop.f32.mrf.mxu3  ;;  %v2318_v32 = vpop.f32.mrf.mxu1  ;;  %v2269_v8 = vadd.f32 %v2268_v10, %v2250_v38  ;;  %v2300_v46 = vadd.f32 %v2299_v21, %v2281_v48 }
 0x183   :  { %v2288_v16 = vadd.f32 %v2287_v55, %v2269_v8  ;;  %v2319_v20 = vadd.f32 %v2318_v32, %v2300_v46  ;;  %v2393_v32 = vld [vmem:[%s5949_s3 + $0x18] sm:$0xff] }
 0x188   :  { %v2337_v44 = vpop.f32.mrf.mxu2  ;;  %v2301_v51 = vpop.f32.mrf.mxu0 }
 0x189   :  { %v2356_v62 = vpop.f32.mrf.mxu3  ;;  %v2320_v1 = vpop.f32.mrf.mxu1  ;;  %v2302_v11 = vadd.f32 %v2301_v51, %v2283_v14  ;;  %v2338_v58 = vadd.f32 %v2337_v44, %v2319_v20 }
 0x18b   :  { %v2321_v57 = vadd.f32 %v2320_v1, %v2302_v11  ;;  %v2357_v3 = vadd.f32 %v2356_v62, %v2338_v58 }
 0x18d   :  { %v2375_v4 = vmul.f32 0.2, %v2357_v3  ;;  %vm2367_vm8 = vcmp.gt.f32.partialorder %v2357_v3, 0.0 }
 0x18f   :  { %v2383_v28 = vsel %vm2367_vm8, %v2357_v3, %v2375_v4 }
 0x190   :  { %v2339_v35 = vpop.f32.mrf.mxu2  ;;  %v2304_v41 = vpop.f32.mrf.mxu0  ;;  %v2399_v44 = vmul.f32 %v2391_v30, %v2383_v28 }
 0x191   :  { %v2358_v61 = vpop.f32.mrf.mxu3  ;;  %v2323_v43 = vpop.f32.mrf.mxu1  ;;  %v2305_v56 = vadd.f32 %v2304_v41, %v2286_v7  ;;  %v2340_v23 = vadd.f32 %v2339_v35, %v2321_v57 }
 0x193   :  { %v2324_v47 = vadd.f32 %v2323_v43, %v2305_v56  ;;  %v2359_v63 = vadd.f32 %v2358_v61, %v2340_v23 }
 0x195   :  { %v2377_v27 = vmul.f32 0.2, %v2359_v63  ;;  %vm2369_vm7 = vcmp.gt.f32.partialorder %v2359_v63, 0.0 }
 0x197   :  { %v2385_v21 = vsel %vm2369_vm7, %v2359_v63, %v2377_v27 }
 0x198   :  { %v2342_v40 = vpop.f32.mrf.mxu2  ;;  %v2306_v15 = vpop.f32.mrf.mxu0  ;;  %v2401_v29 = vmul.f32 %v2393_v32, %v2385_v21 }
 0x199   :  { %v2361_v53 = vpop.f32.mrf.mxu3  ;;  %v2343_v59 = vadd.f32 %v2342_v40, %v2324_v47  ;;  %v2307_v19 = vadd.f32 %v2306_v15, %v2288_v16  ;;  %v2325_v12 = vpop.f32.mrf.mxu1 }
 0x19b   :  { %v2362_v13 = vadd.f32 %v2361_v53, %v2343_v59  ;;  %v2326_v18 = vadd.f32 %v2325_v12, %v2307_v19 }
 0x19d   :  { %v2379_v45 = vmul.f32 0.2, %v2362_v13  ;;  %vm2371_vm5 = vcmp.gt.f32.partialorder %v2362_v13, 0.0 }
 0x19f   :  { %v2387_v10 = vsel %vm2371_vm5, %v2362_v13, %v2379_v45 }
 0x1a0   :  { %v2344_v17 = vpop.f32.mrf.mxu2  ;;  %v2403_v2 = vmul.f32 %v2395_v52, %v2387_v10 }
 0x1a1   :  { %v2345_v24 = vadd.f32 %v2344_v17, %v2326_v18  ;;  %v2363_v0 = vpop.f32.mrf.mxu3 }
 0x1a3   :  { %v2364_v26 = vadd.f32 %v2363_v0, %v2345_v24 }
 0x1a5   :  { %vm2373_vm6 = vcmp.gt.f32.partialorder %v2364_v26, 0.0  ;;  %v2381_v54 = vmul.f32 0.2, %v2364_v26 }
 0x1a7   :  { %v2389_v5 = vsel %vm2373_vm6, %v2364_v26, %v2381_v54 }
 0x1a8   :  { %v2405_v55 = vmul.f32 %v2397_v60, %v2389_v5 }
 0x1aa   :  { %2443 = vmatpush.msra.mxu1 %v2405_v55 }
 0x1ac   :  { %2444 = vmatpush.msra.mxu1 %v2403_v2 }
 0x1ae   :  { %2445 = vmatpush.msra.mxu1 %v2401_v29 }
 0x1b0   :  { %2446 = vmatpush.msra.mxu1 %v2399_v44 }
 0x1b1   :  { %3642 = vmatmul.msk.f32.vlgmr.msra.gmra.mxu1 %vm2407_vm4, %v2406_v36 }
 0x1c1   :  { %v2428_v25 = vpop.f32.mrf.mxu0 }
 0x1c2   :  { %v2452_v37 = vsel %vm2451_vm9, %v2428_v25, 0.0 }
 0x22e   :  { %v2448_v62 = vpop.f32.mrf.mxu1 }
 0x22f   :  { %v2453_v51 = vsel %vm2451_vm9, %v2448_v62, 0.0 }
 0x230   :  { %v2454_v1 = vadd.f32 %v2453_v51, %v2452_v37 }
 0x232   :  { %2455 = vadd.xlane.f32.xlu0 %v2454_v1 }
 0x2a5   :  { %v2456_v42 = vpop.xlane.xlu0 %2455 }
 0x2a6   :  { %v2459_v49 = vadd.f32 %v2458_v22, %v2456_v42 }
 0x2a8   :  { %v2460_v6 = vand.u32 2147483647, %v2459_v49  ;;  %vm2464_vm15 = vcmp.ge.f32.partialorder %v2459_v49, 0.0 }
 0x2aa   :  { %v2461_v33 = vsub.f32 0.0, %v2460_v6 }
 0x2ac   :  { %v2462_v9 = vmul.f32 1.442695, %v2461_v33 }
 0x2ae   :  { %3931 = vpow2.f32 %v2462_v9 }
 0x2b4   :  { %v3932_v34 = vpop.eup %3931 }
 0x2b5   :  { %v2465_v35 = vadd.f32 1.0, %v3932_v34 }
 0x2b7   :  { %3933 = vrcp.f32 %v2465_v35  ;;  %v2477_v61 = vand.u32 2147483648, %v2465_v35  ;;  %v2475_v39 = vand.u32 2147483647, %v2465_v35  ;;  %vm2471_vm11 = vweird.f32 %v2465_v35 }
 0x2b9   :  { %v2478_v38 = vor.u32 1.1754944e-38, %v2477_v61  ;;  %vm2476_vm13 = vcmp.eq.f32.partialorder %v2475_v39, 8.507059e+37 }
 0x2bd   :  { %v3934_v36 = vpop.eup %3933 }
 0x2be   :  { %v2467_v31 = vmul.f32 %v3934_v36, %v2465_v35  ;;  %vm2472_vm10 = vweird.f32 %v3934_v36 }
 0x2bf   :  { %vm2473_vm12 = vmor %vm2471_vm11, %vm2472_vm10 }
 0x2c0   :  { %v2468_v50 = vsub.f32 1.0, %v2467_v31 }
 0x2c2   :  { %v2469_v41 = vmul.f32 %v3934_v36, %v2468_v50 }
 0x2c4   :  { %v2470_v7 = vadd.f32 %v3934_v36, %v2469_v41 }
 0x2c6   :  { %v2474_v43 = vsel %vm2473_vm12, %v3934_v36, %v2470_v7 }
 0x2c7   :  { %v2479_v14 = vsel %vm2476_vm13, %v2478_v38, %v2474_v43 }
 0x2c8   :  { %v2481_v8 = vmul.f32 %v3932_v34, %v2479_v14 }
 0x2ca   :  { %v2482_v56 = vsel %vm2464_vm15, %v2479_v14, %v2481_v8 }
 0x2cb   :  { %2484 = vst.msk [vmem:[%s5952_s6] sm:$0x3] %vm2483_vm14, %v2482_v56 }

</bundles_post_ra>
